<compile_context>
chip_gen: v7x
topology: tpu7x:2x2x1
jax: 0.10.0
libtpu: 0.0.40
codegen_flags: <defaults>
</compile_context>

<pallas_src>
import math
from functools import partial

import jax
import jax.numpy as jnp
from jax.experimental import pallas as pl
from jax.experimental.pallas import tpu as pltpu


# ----------------------------------------------------------------------------
# Core Pallas kernel: tiled matmul, bf16 MXU inputs, fp32 accumulation in the
# resident output block, fused bias (+ optional ReLU) epilogue.
# Grid = (j over N tiles [parallel], k over K tiles [arbitrary, innermost]).
# ----------------------------------------------------------------------------
def _linear_kernel(x_ref, w_ref, b_ref, o_ref, *, relu, tk):
    k = pl.program_id(1)

    @pl.when(k == 0)
    def _():
        o_ref[...] = jnp.zeros_like(o_ref)

    kk = pl.multiple_of(k * tk, 128)
    o_ref[...] += jnp.dot(
        x_ref[:, pl.ds(kk, tk)], w_ref[...],
        preferred_element_type=jnp.float32,
    )

    @pl.when(k == pl.num_programs(1) - 1)
    def _():
        y = o_ref[...] + b_ref[...]
        if relu:
            y = jnp.maximum(y, 0.0)
        o_ref[...] = y


def _round_up(a, m):
    return (a + m - 1) // m * m


def _pick_tile(dim, cap):
    """Largest multiple of 128 that divides `dim` (itself a multiple of 128), <= cap."""
    best = 128
    t = 256
    while t <= min(cap, dim):
        if dim % t == 0:
            best = t
        t += 128
    return best


# ----------------------------------------------------------------------------
# One-time weight packing (done at init, NOT per forward):
#   (K, N) fp32 -> zero-padded (Kp, Np) bf16, bias -> (1, Np) fp32.
# ----------------------------------------------------------------------------
def _pack_matmul(w_kn, b_n):
    K, N = w_kn.shape
    Kp = _round_up(K, 128)
    Np = _round_up(N, 128)
    tk = _pick_tile(Kp, 2048)
    tn = _pick_tile(Np, 1024)
    wp = jnp.zeros((Kp, Np), jnp.bfloat16).at[:K, :N].set(
        w_kn.astype(jnp.bfloat16))
    bp = jnp.zeros((1, Np), jnp.float32).at[0, :N].set(
        b_n.astype(jnp.float32))
    return {"w": wp, "b": bp, "K": K, "N": N, "tk": tk, "tn": tn}


def _pack_torch_linear(w_oi, b):
    """PyTorch nn.Linear weight (out, in) -> packed (K=in, N=out)."""
    return _pack_matmul(jnp.transpose(w_oi), b)


def _pack_conv(w_oik, b, stride, padding):
    """PyTorch Conv1d weight (Cout, Cin, K) -> packed im2col matrix (Cin*K, Cout)."""
    cout, cin, ksz = w_oik.shape
    w_kn = jnp.transpose(w_oik, (1, 2, 0)).reshape(cin * ksz, cout)
    d = _pack_matmul(w_kn, b)
    d.update(ksize=ksz, stride=stride, padding=padding)
    return d


# ----------------------------------------------------------------------------
# Pallas linear call on pre-packed weights.
# ----------------------------------------------------------------------------
def packed_linear(x, layer, *, relu=False):
    """y = x @ W + b (optional ReLU).  x:(M,K) -> (M,N)."""
    w, b = layer["w"], layer["b"]
    K, N, tk, tn = layer["K"], layer["N"], layer["tk"], layer["tn"]
    Kp, Np = w.shape
    M = x.shape[0]
    Mp = _round_up(M, 8)

    # Activations are tiny compared to weights; cast+pad here is cheap.
    xp = jnp.zeros((Mp, Kp), jnp.bfloat16).at[:M, :K].set(
        x.astype(jnp.bfloat16))

    grid = (Np // tn, Kp // tk)

    # VMEM footprint: x (resident, assume double-buffered), weight tile
    # (double-buffered, bf16), bias tile, output tile (fp32).  Capped at
    # 32 MiB so the kernel stays portable to v7x (64 MiB physical VMEM).
    footprint = (2 * Mp * Kp * 2 + 2 * tk * tn * 2
                 + 2 * tn * 4 + 2 * Mp * tn * 4)
    vmem_limit = int(min(32 << 20, max(2 * footprint, 16 << 20)))

    out = pl.pallas_call(
        partial(_linear_kernel, relu=relu, tk=tk),
        out_shape=jax.ShapeDtypeStruct((Mp, Np), jnp.float32),
        grid_spec=pltpu.PrefetchScalarGridSpec(
            num_scalar_prefetch=0,
            grid=grid,
            in_specs=[
                pl.BlockSpec((Mp, Kp), lambda j, k: (0, 0)),   # x: loaded once
                pl.BlockSpec((tk, tn), lambda j, k: (k, j)),   # weight tiles
                pl.BlockSpec((1, tn), lambda j, k: (0, j)),    # bias
            ],
            out_specs=pl.BlockSpec((Mp, tn), lambda j, k: (0, j)),
        ),
        compiler_params=pltpu.CompilerParams(
            dimension_semantics=("parallel", "arbitrary"),
            vmem_limit_bytes=vmem_limit,
        ),
    )(xp, w, b)
    return out[:M, :N]


# ----------------------------------------------------------------------------
# Conv1d (PyTorch semantics) = im2col (glue) + shared Pallas matmul.
# ----------------------------------------------------------------------------
def conv1d(x, layer):
    """x:(B,Cin,L) -> (B,Cout,Lout) using pre-packed conv weights."""
    B, Cin, L = x.shape
    ksz, stride, padding = layer["ksize"], layer["stride"], layer["padding"]
    Cout = layer["N"]
    xpad = jnp.pad(x, ((0, 0), (0, 0), (padding, padding)))
    Lp = L + 2 * padding
    Lout = (Lp - ksz) // stride + 1

    idx = jnp.arange(Lout)[:, None] * stride + jnp.arange(ksz)[None, :]
    patches = xpad[:, :, idx]                                # (B,Cin,Lout,ksz)
    patches = jnp.transpose(patches, (0, 2, 1, 3)).reshape(B * Lout, Cin * ksz)

    y = packed_linear(patches, layer)                        # (B*Lout, Cout)
    return jnp.transpose(y.reshape(B, Lout, Cout), (0, 2, 1))


def maxpool1d(x, kernel):
    """nn.MaxPool1d(kernel, stride=1, padding=0) — stride=1 is explicit in VARN."""
    Lout = x.shape[2] - kernel + 1
    stacked = jnp.stack([x[:, :, i:i + Lout] for i in range(kernel)], axis=0)
    return jnp.max(stacked, axis=0)


# ----------------------------------------------------------------------------
# Deterministic parameter initialization (PyTorch-style uniform fan-in init),
# packed once for the Pallas kernels.
# ----------------------------------------------------------------------------
def _init_conv(key, cout, cin, k):
    fan_in = cin * k
    bound = 1.0 / math.sqrt(fan_in)
    k1, k2 = jax.random.split(key)
    w = jax.random.uniform(k1, (cout, cin, k), jnp.float32, -bound, bound)
    b = jax.random.uniform(k2, (cout,), jnp.float32, -bound, bound)
    return w, b


def _init_linear(key, out_f, in_f):
    bound = 1.0 / math.sqrt(in_f)
    k1, k2 = jax.random.split(key)
    w = jax.random.uniform(k1, (out_f, in_f), jnp.float32, -bound, bound)
    b = jax.random.uniform(k2, (out_f,), jnp.float32, -bound, bound)
    return w, b


def init_varn_params(seed=0):
    key = jax.random.PRNGKey(seed)
    keys = jax.random.split(key, 16)

    # audio_layer conv stack: (Cout, Cin, K, stride, padding)
    audio_cfg = [
        (16, 1, 64, 2, 32),
        (32, 16, 32, 1, 16),
        (64, 32, 16, 2, 8),
        (128, 64, 8, 2, 4),
        (256, 128, 4, 2, 2),
        (512, 256, 4, 2, 2),
        (1024, 512, 4, 2, 2),
    ]
    p = {"audio": []}
    for i, (co, ci, k, st, pad) in enumerate(audio_cfg):
        w, b = _init_conv(keys[i], co, ci, k)
        p["audio"].append(_pack_conv(w, b, st, pad))

    # stand-in for P3D199 video backbone: flatten -> Linear(3072, 8192)
    w, b = _init_linear(keys[7], 8192, 3 * 4 * 16 * 16)
    p["video_proj"] = _pack_torch_linear(w, b)

    w, b = _init_linear(keys[8], 4096, 16384)
    p["fusion"] = _pack_torch_linear(w, b)

    w_r1, b_r1 = _init_linear(keys[9], 2048, 4096)
    w_r2, b_r2 = _init_linear(keys[10], 512, 2048)
    w_r3, b_r3 = _init_linear(keys[11], 7, 512)
    w_p1, b_p1 = _init_linear(keys[12], 2048, 4096)
    w_p2, b_p2 = _init_linear(keys[13], 512, 2048)
    w_p3, b_p3 = _init_linear(keys[14], 1, 512)

    # Fused head level 1: both heads read the same input -> concat along N.
    p["head1"] = _pack_matmul(
        jnp.concatenate([jnp.transpose(w_r1), jnp.transpose(w_p1)], axis=1),
        jnp.concatenate([b_r1, b_p1]))

    # Fused head level 2: inputs differ per head -> block-diagonal weights
    # ([h_r | h_p] @ blkdiag(Wr2^T, Wp2^T) == [h_r @ Wr2^T | h_p @ Wp2^T]).
    w2 = jnp.zeros((4096, 1024), jnp.float32)
    w2 = w2.at[:2048, :512].set(jnp.transpose(w_r2))
    w2 = w2.at[2048:, 512:].set(jnp.transpose(w_p2))
    p["head2"] = _pack_matmul(w2, jnp.concatenate([b_r2, b_p2]))

    # Tiny final layers (512->7, 512->1, M=2): plain fp32 jnp.dot in XLA.
    p["reason_3"] = (w_r3, b_r3)
    p["predict_3"] = (w_p3, b_p3)
    return p


# ----------------------------------------------------------------------------
# VARN forward (eval mode; dropout == identity)
# ----------------------------------------------------------------------------
def varn_forward(params, v, a):
    B = v.shape[0]

    # --- video branch (P3D199 stand-in) ---
    v_feat = packed_linear(v.reshape(B, -1), params["video_proj"])   # (B, 8192)

    # --- audio branch: Conv1d / MaxPool1d stack ---
    au = params["audio"]
    x = conv1d(a, au[0]); x = maxpool1d(x, 8)
    x = conv1d(x, au[1]); x = maxpool1d(x, 8)
    x = conv1d(x, au[2])
    x = conv1d(x, au[3])
    x = conv1d(x, au[4]); x = maxpool1d(x, 4)
    x = conv1d(x, au[5])
    x = conv1d(x, au[6])
    a_feat = x.reshape(B, -1)                                        # (B, 8192)

    # --- fusion + fused twin heads ---
    fused = jnp.concatenate([v_feat, a_feat], axis=1)                # (B, 16384)
    h = packed_linear(fused, params["fusion"])                       # (B, 4096)

    h1 = packed_linear(h, params["head1"], relu=True)                # (B, 4096)
    # h1 == [relu(reason_1(h)) | relu(predict_1(h))]; block-diag level 2:
    h2 = packed_linear(h1, params["head2"], relu=True)               # (B, 1024)
    x1h, x2h = h2[:, :512], h2[:, 512:]

    w_r3, b_r3 = params["reason_3"]
    w_p3, b_p3 = params["predict_3"]
    x1 = x1h @ jnp.transpose(w_r3) + b_r3                            # (B, 7)
    x2 = x2h @ jnp.transpose(w_p3) + b_p3                            # (B, 1)
    return x1, x2


# ----------------------------------------------------------------------------
if __name__ == "__main__":
    B = 2
    key = jax.random.PRNGKey(0)
    kv, ka = jax.random.split(key)

    # video: (B, C=3, T=4, H=16, W=16); audio: (B, 1, 460)
    # audio length 460 makes the conv stack end at 1024 channels x 8 samples
    # = 8192 features, matching fusion's expected 16384-dim concat input.
    v = jax.random.normal(kv, (B, 3, 4, 16, 16), dtype=jnp.float32)
    a = jax.random.normal(ka, (B, 1, 460), dtype=jnp.float32)

    params = init_varn_params(seed=0)

    x1, x2 = varn_forward(params, v, a)
    jax.block_until_ready((x1, x2))

    assert x1.shape == (B, 7), x1.shape
    assert x2.shape == (B, 1), x2.shape
    print("KERNEL_OK")
</pallas_src>

<mosaic_0001>
module attributes {stable_mosaic.version = 11 : i64} {
  func.func @_linear_kernel(%arg0: i32, %arg1: i32, %arg2: memref<8x3072xbf16, #tpu.memory_space<vmem>>, %arg3: memref<1536x1024xbf16, #tpu.memory_space<vmem>>, %arg4: memref<1x1024xf32, #tpu.memory_space<vmem>>, %arg5: memref<8x1024xf32, #tpu.memory_space<vmem>>) attributes {dimension_semantics = [#tpu.dimension_semantics<parallel>, #tpu.dimension_semantics<arbitrary>], iteration_bounds = array<i64: 8, 2>, scalar_prefetch = 0 : i64, scratch_operands = 0 : i64, tpu.core_type = #tpu.core_type<tc>, window_params = [{pipeline_mode = #tpu.pipeline_mode<synchronous>, transform_indices = @transform_0, window_bounds = array<i64: 8, 3072>}, {transform_indices = @transform_1, window_bounds = array<i64: 1536, 1024>}, {transform_indices = @transform_2, window_bounds = array<i64: 1, 1024>}, {transform_indices = @transform_3, window_bounds = array<i64: 8, 1024>}]} {
    %c0_i32 = arith.constant 0 : i32
    %0 = arith.cmpi eq, %arg1, %c0_i32 : i32
    %1 = arith.extui %0 : i1 to i32
    %c0_i32_0 = arith.constant 0 : i32
    %2 = arith.cmpi ne, %1, %c0_i32_0 : i32
    scf.if %2 {
      %cst_8 = arith.constant 0.000000e+00 : f32
      %15 = vector.broadcast %cst_8 : f32 to vector<8x1024xf32>
      %c0_9 = arith.constant 0 : index
      %c0_10 = arith.constant 0 : index
      %16 = vector.load %arg5[%c0_9, %c0_10] : memref<8x1024xf32, #tpu.memory_space<vmem>>, vector<8x1024xf32>
      tpu.vector_store %arg5[%c0_9, %c0_10], %15 {strides = array<i32>} : memref<8x1024xf32, #tpu.memory_space<vmem>>, vector<8x1024xf32>,
    } else {
    }
    %c1536_i32 = arith.constant 1536 : i32
    %3 = arith.muli %arg1, %c1536_i32 : i32
    %4 = tpu.assume_multiple %3, 128 : i32
    %c0 = arith.constant 0 : index
    %c0_1 = arith.constant 0 : index
    %5 = vector.load %arg5[%c0, %c0_1] : memref<8x1024xf32, #tpu.memory_space<vmem>>, vector<8x1024xf32>
    %c0_2 = arith.constant 0 : index
    %6 = arith.index_cast %4 : i32 to index
    %7 = vector.load %arg2[%c0_2, %6] : memref<8x3072xbf16, #tpu.memory_space<vmem>>, vector<8x1536xbf16>
    %c0_3 = arith.constant 0 : index
    %c0_4 = arith.constant 0 : index
    %8 = vector.load %arg3[%c0_3, %c0_4] : memref<1536x1024xbf16, #tpu.memory_space<vmem>>, vector<1536x1024xbf16>
    %cst = arith.constant dense<0.000000e+00> : vector<8x1024xf32>
    %9 = tpu.matmul %7, %8, %cst {dimension_numbers = #tpu.dot_dimension_numbers<[1], [0], [0], [1], [0, 0, 1, 1], [], []>} : vector<8x1536xbf16>, vector<1536x1024xbf16>, vector<8x1024xf32> -> vector<8x1024xf32>
    %10 = arith.addf %5, %9 : vector<8x1024xf32>
    %c0_5 = arith.constant 0 : index
    %c0_6 = arith.constant 0 : index
    %11 = vector.load %arg5[%c0_5, %c0_6] : memref<8x1024xf32, #tpu.memory_space<vmem>>, vector<8x1024xf32>
    tpu.vector_store %arg5[%c0_5, %c0_6], %10 {strides = array<i32>} : memref<8x1024xf32, #tpu.memory_space<vmem>>, vector<8x1024xf32>,
    %c1_i32 = arith.constant 1 : i32
    %12 = arith.cmpi eq, %arg1, %c1_i32 : i32
    %13 = arith.extui %12 : i1 to i32
    %c0_i32_7 = arith.constant 0 : i32
    %14 = arith.cmpi ne, %13, %c0_i32_7 : i32
    scf.if %14 {
      %c0_8 = arith.constant 0 : index
      %c0_9 = arith.constant 0 : index
      %15 = vector.load %arg5[%c0_8, %c0_9] : memref<8x1024xf32, #tpu.memory_space<vmem>>, vector<8x1024xf32>
      %c0_10 = arith.constant 0 : index
      %c0_11 = arith.constant 0 : index
      %16 = vector.load %arg4[%c0_10, %c0_11] : memref<1x1024xf32, #tpu.memory_space<vmem>>, vector<1x1024xf32>
      %17 = vector.broadcast %16 : vector<1x1024xf32> to vector<8x1024xf32>
      %18 = arith.addf %15, %17 : vector<8x1024xf32>
      %c0_12 = arith.constant 0 : index
      %c0_13 = arith.constant 0 : index
      %19 = vector.load %arg5[%c0_12, %c0_13] : memref<8x1024xf32, #tpu.memory_space<vmem>>, vector<8x1024xf32>
      tpu.vector_store %arg5[%c0_12, %c0_13], %18 {strides = array<i32>} : memref<8x1024xf32, #tpu.memory_space<vmem>>, vector<8x1024xf32>,
    } else {
    }
    return
  }
  func.func @transform_0(%arg0: i32, %arg1: i32) -> (i32, i32) {
    %c0_i32 = arith.constant 0 : i32
    %c0_i32_0 = arith.constant 0 : i32
    %c0_i32_1 = arith.constant 0 : i32
    return %c0_i32, %c0_i32_0 : i32, i32
  }
  func.func @transform_1(%arg0: i32, %arg1: i32) -> (i32, i32) {
    %c0_i32 = arith.constant 0 : i32
    return %arg1, %arg0 : i32, i32
  }
  func.func @transform_2(%arg0: i32, %arg1: i32) -> (i32, i32) {
    %c0_i32 = arith.constant 0 : i32
    %c0_i32_0 = arith.constant 0 : i32
    return %c0_i32, %arg0 : i32, i32
  }
  func.func @transform_3(%arg0: i32, %arg1: i32) -> (i32, i32) {
    %c0_i32 = arith.constant 0 : i32
    %c0_i32_0 = arith.constant 0 : i32
    return %c0_i32, %arg0 : i32, i32
  }
}

</mosaic_0001>

<bundles_post_ra>
// kernel: tpu_custom_call.1
= control target key start
LH: loop header
LB: loop body
LE: loop exit
PB: predicated region body
PF: predicated region fallthrough
CT: control target
= control target key end

     0   :  { %s8642_s0 = inlined_call_operand.hbm [shape: bf16[8,3072], index: 0, kind: input, shape index: {}]   ;;  %s8643_s1 = inlined_call_operand.hbm [shape: bf16[3072,8192], index: 1, kind: input, shape index: {}]   ;;  %s8644_s2 = inlined_call_operand.hbm [shape: f32[1,8192], index: 2, kind: input, shape index: {}]   ;;  %s8645_s3 = inlined_call_operand.hbm [shape: f32[8,8192], index: 3, kind: output, shape index: {}]  }
   0x1   :  { %8656 = sst [smem:[#allocation16_spill]] %s8643_s1 }
   0x2   :  { %8657 = sst [smem:[#allocation17_spill]] %s8645_s3 }
   0x3   :  { %8 = vsyncpa [#allocation3], 0 }
   0x4   :  { %9 = vsyncpa [#allocation6], 0 }
   0x5   :  { %11 = vsyncpa [#allocation6 + $0x1], 0 }
   0x6   :  { %12 = vsyncpa [#allocation4], 0 }
   0x7   :  { %14 = vsyncpa [#allocation4 + $0x1], 0  ;;  %s7332_s12 = smov 0   ;;  %s7334_s13 = smov 0  }
   0x8   :  { %s7336_s14 = smov 0   ;;  %s7338_s15 = smov 0  }
   0x9   :  { %s7340_s16 = smov 0   ;;  %s7342_s17 = smov 0  }
   0xa   :  { %s7344_s18 = smov 0   ;;  %s7346_s19 = smov 0  }
   0xb   :  { %s7348_s20 = smov 0   ;;  %s7350_s21 = smov 0  }
   0xc   :  { %s7352_s22 = smov 0  }
   0xd LB: > { %8658 = sst [smem:[#allocation13_spill]] %s7294_s20  ;;  %s29_s23 = sadd.s32 1, %s7294_s20  ;;  %s7302_s22 = sphi %s7352_s22, %s20_s22   ;;  %s7298_s21 = sphi %s7350_s21, %s8693_s21   ;;  %s7294_s20 = sphi %s7348_s20, %s8684_s20   ;;  %s7290_s19 = sphi %s7346_s19, %s8692_s19   ;;  %s7286_s18 = sphi %s7344_s18, %s8683_s18   ;;  %s7282_s17 = sphi %s7342_s17, %s8691_s17   ;;  %s7278_s16 = sphi %s7340_s16, %s8690_s16   ;;  %s7274_s15 = sphi %s7338_s15, %s8689_s15   ;;  %s7270_s14 = sphi %s7336_s14, %s8688_s14   ;;  %s7266_s13 = sphi %s7334_s13, %s8687_s13   ;;  %s7262_s12 = sphi %s7332_s12, %s8686_s12  }
   0xe   : > { %s32_s24 = sadd.s32 1, %s7298_s21  ;;  %p30_p0 = scmp.ge.s32.totalorder %s29_s23, 2 }
   0xf   : > { %s62_s25 = sadd.s32 1, %s7282_s17  ;;  %p69_p1 = scmp.ne.s32.totalorder %s7282_s17, %s7278_s16 }
  0x10   : > { %p70_p2 = scmp.eq.s32.totalorder %s7302_s22, 0  ;;  %s8695_s23 = smov (%p30_p0, %s29_s23), 0 }
  0x11   : > { %8659 = sst [smem:[#allocation14_spill]] %s8695_s23  ;;  %s8697_s24 = smov (!%p30_p0, %s32_s24), %s7298_s21 }
  0x12   : > { %s57_s26 = ssub.s32 %s7294_s20, %s8695_s23  ;;  %p7400_p3 = por %p70_p2, %p69_p1 }
  0x13   : > { %p34_p4 = scmp.ge.s32.totalorder %s8697_s24, 8  ;;  %p8649_p5 = scmp.lt.s32.totalorder %s7302_s22, 16 }
  0x14   : > { %s162_s28 = sand.u32 1, %s7302_s22   ;;  %s164_s29 = sand.u32 1, %s7282_s17  }
  0x15   : > { %s8699_s24 = smov (%p34_p4, %s8697_s24), 0  ;;  %s6948_s4 = smul.u32 6144, %s164_s29 }
  0x16   : > { %8661 = sst [smem:[#allocation15_spill]] %s8699_s24  ;;  %s7411_s30 = ssub.s32 %s7298_s21, %s8699_s24 }
  0x17   : > { %s59_s5 = sor.u32 %s7411_s30, %s57_s26  ;;  %s6147_s6 = sshll.u32 %s7298_s21, 3 }
  0x18   : > { %p60_p6 = scmp.eq.s32.totalorder %s59_s5, 0  ;;  %s6945_s7 = smul.u32 12288, %s7294_s20 }
  0x19   : > { %s166_s8 = scalar_lea.vmem [#allocation5], %s6948_s4  ;;  %p7425_p7 = pnand %p8649_p5, %p7400_p3 }
  0x1a   : > { %s176_s9 = sshll.u32 %s166_s8, 4  ;;  %s173_s11 = sadd.s32 %s6945_s7, %s6147_s6  ;;  %s7419_s9 = int_to_ptr.vmem [resolvable:$true] %s176_s9 }
  0x1b   : > { %s7417_s10 = scalar_select %p60_p6, %s7282_s17, %s62_s25  }
  0x1c   : > { %s6149_s23 = sshll.u32 %s173_s11, 6  ;;  %s8663_s1 = sld [smem:[#allocation16_spill]] }
  0x1d   : > { %s7434_s25 = scalar_lea.sflag [#allocation6], %s162_s28  ;;  %p7086_p9 = pneg %p7425_p7 }
  0x22   : > { %s7432_s26 = scalar_lea.hbm %s8663_s1, %s6149_s23  ;;  %s7089_s5 = scalar_lea.hbm %s8663_s1, 1572864 }
  0x23   : > { %s7084_s4 = scalar_lea.hbm %s7432_s26, 98304  ;;  %p7090_p12 = scmp.lt.u32.totalorder %s7432_s26, %s8663_s1 }
  0x24   : > { %p7085_p8 = scmp.ne.s32.totalorder %s7432_s26, %s7084_s4  ;;  %p7091_p13 = scmp.lt.u32.totalorder %s7089_s5, %s7084_s4 }
  0x25   : > { %p7093_p1 = scmp.lt.u32.totalorder %s7084_s4, %s7432_s26 }
  0x26   : > { %p7087_p10 = pnand %p7086_p9, %p7085_p8  ;;  %p7092_p0 = por %p7091_p13, %p7090_p12 }
  0x28   : > { %p7088_p11 = pneg %p7087_p10  ;;  %p7094_p3 = por %p7093_p1, %p7092_p0 }
  0x2a   : > { %p7095_p4 = pnand %p7094_p3, %p7088_p11 }
  0x2c   : > { %7098 = shalt.err (!%p7095_p4)
}
  0x2d   : > { %s7099_s28 = scalar_lea.vmem %s7419_s9, 98304  ;;  %s7304_s7 = smov [#allocation5]  }
  0x2e   : > { %p7100_p6 = scmp.ne.s32.totalorder %s7419_s9, %s7099_s28  ;;  %s7104_s8 = sshll.u32 %s7304_s7, 4  ;;  %s7105_s8 = int_to_ptr.vmem [resolvable:$false] %s7104_s8 }
  0x2f   : > { %s7106_s11 = scalar_lea.vmem %s7105_s8, 196608  ;;  %p7107_p5 = scmp.lt.s32.totalorder %s7419_s9, %s7105_s8 }
  0x30   : > { %p7102_p8 = pnand %p7100_p6, %p7086_p9  ;;  %p7108_p12 = scmp.lt.s32.totalorder %s7106_s11, %s7099_s28 }
  0x32   : > { %p7103_p10 = pneg %p7102_p8  ;;  %p7109_p13 = por %p7108_p12, %p7107_p5 }
  0x34   : > { %p7110_p0 = pnand %p7109_p13, %p7103_p10 }
  0x36   : > { %7113 = shalt.err (!%p7110_p0)
}
  0x37   : > { %s7305_s29 = smov 4096   ;;  %s7306_s4 = smov 512  }
  0x38   : > { %s7307_s27 = smov 32   ;;  %s7463_s24 = sadd.s32 4294967295, %s7302_s22  }
  0x39   : > { %6967 = dma.hbm_to_vmem [thread:$0]  (!%p7425_p7), %s7432_s26, 98304, %s7419_s9, %s7434_s25, %s7305_s29, %s7306_s4, %s7307_s27  }
  0x3a   : > { %s6143_s5 = sadd.s32 4294967294, %s7302_s22   ;;  %p75_p5 = scmp.ne.s32.totalorder %s7278_s16, %s7274_s15 }
  0x3b   : > { %p8650_p9 = scmp.eq.s32.totalorder %s7463_s24, 0  ;;  %p101_p11 = scmp.ne.s32.totalorder %s7266_s13, %s7262_s12 }
  0x3c   : > { %p131_p3 = scmp.eq.s32.totalorder %s6143_s5, 15  ;;  %p6144_p8 = scmp.ge.s32.totalorder %s7302_s22, 1 }
  0x3d   : > { %p7474_p7 = por %p8650_p9, %p75_p5  ;;  %p7480_p4 = por %p101_p11, %p8650_p9 }
  0x3e   : > { %p7484_p6 = por %p131_p3, %p101_p11  ;;  %p138_p10 = scmp.lt.s32.totalorder %s7302_s22, 17 }
  0x3f   : > { %s8664_s3 = scalar_select %p7474_p7, 1, 0 }
  0x40   : > { %s8665_s15 = scalar_select %p7480_p4, 1, 0 }
  0x41   : > { %s8666_s9 = scalar_select %p7484_p6, 1, 0 }
  0x42   : > { %p7490_p12 = pnand %p6144_p8, %p138_p10  ;;  %s7308_s23 = smov [#allocation2]  }
  0x43   : > { %s151_s6 = sshll.u32 %s7308_s23, 4  ;;  %p86_p0 = scmp.eq.s32.totalorder %s7411_s30, 0  ;;  %s152_s6 = int_to_ptr.vmem [resolvable:$true] %s151_s6 }
  0x44   : > { %s8667_s26 = scalar_select %p7490_p12, 1, 0 }
  0x45   : > { %p6960_p13 = pneg %p7490_p12  ;;  %s88_s28 = sadd.s32 1, %s7270_s14 }
  0x46   : > { %p8652_p5 = scmp.ne.s32.totalorder %s7270_s14, %s7266_s13  ;;  %s188_s8 = sand.u32 1, %s7270_s14  }
  0x47   : > { %p7502_p11 = pnand %p6960_p13, %p8650_p9  ;;  %s7114_s30 = scalar_lea.hbm %s8642_s0, 1536 }
  0x48   : > { %s7508_s11 = scalar_select %p86_p0, %s7270_s14, %s88_s28  }
  0x49   : > { %p7515_p3 = por %p8652_p5, %p70_p2  ;;  %p7115_p8 = scmp.ne.s32.totalorder %s8642_s0, %s7114_s30 }
  0x4a   : > { %p7116_p10 = pneg %p7502_p11  ;;  %p7121_p0 = scmp.lt.u32.totalorder %s7114_s30, %s8642_s0 }
  0x4b   : > { %s8669_s29 = scalar_select %p7515_p3, 1, 0 }
  0x4c   : > { %p7117_p13 = pnand %p7116_p10, %p7115_p8 }
  0x4e   : > { %p7118_p9 = pneg %p7117_p13 }
  0x50   : > { %p7123_p2 = pnand %p7121_p0, %p7118_p9 }
  0x52   : > { %7126 = shalt.err (!%p7123_p2)
}
  0x53   : > { %s7127_s20 = scalar_lea.vmem %s152_s6, 1536  ;;  %p7135_p4 = scmp.lt.s32.totalorder %s152_s6, %s152_s6 }
  0x54   : > { %p7128_p1 = scmp.ne.s32.totalorder %s152_s6, %s7127_s20  ;;  %p7136_p7 = scmp.lt.s32.totalorder %s7127_s20, %s7127_s20 }
  0x56   : > { %p7130_p5 = pnand %p7128_p1, %p7116_p10  ;;  %p7137_p12 = por %p7136_p7, %p7135_p4 }
  0x58   : > { %p7131_p6 = pneg %p7130_p5 }
  0x5a   : > { %p7138_p3 = pnand %p7137_p12, %p7131_p6 }
  0x5c   : > { %7141 = shalt.err (!%p7138_p3)
}
  0x5d   : > { %6963 = dma.hbm_to_vmem [thread:$0]  (!%p7502_p11), %s8642_s0, 1536, %s152_s6, [#allocation3]  }
  0x5e   : > { %p8670_p9 = scmp.ne.s32.totalorder %s7270_s14, %s7266_s13  ;;  %p8671_p1 = scmp.eq.s32.totalorder %s7463_s24, 15 }
  0x5f   : > { %s6150_s20 = sshll.u32 %s188_s8, 3  ;;  %s6946_s30 = sshll.u32 %s7298_s21, 7 }
  0x60   : > { %p7540_p5 = por %p8671_p1, %p8670_p9  ;;  %s7548_s23 = scalar_lea.hbm %s8644_s2, %s6946_s30 }
  0x61   : > { %s190_s28 = scalar_lea.vmem [#allocation7], %s6150_s20  ;;  %p8673_p7 = scmp.ne.s32.totalorder %s8669_s29, 0 }
  0x62   : > { %s198_s4 = sshll.u32 %s190_s28, 4  ;;  %p8674_p4 = scmp.lt.s32.totalorder %s7302_s22, 16  ;;  %s7550_s4 = int_to_ptr.vmem [resolvable:$true] %s198_s4 }
  0x63   : > { %s7142_s8 = scalar_lea.hbm %s7548_s23, 128  ;;  %s7147_s30 = scalar_lea.hbm %s8644_s2, 1024 }
  0x64   : > { %p7556_p6 = pnand %p8674_p4, %p8673_p7  ;;  %p7143_p12 = scmp.ne.s32.totalorder %s7548_s23, %s7142_s8 }
  0x65   : > { %p7148_p10 = scmp.lt.u32.totalorder %s7548_s23, %s8644_s2  ;;  %p7149_p13 = scmp.lt.u32.totalorder %s7147_s30, %s7142_s8 }
  0x66   : > { %p7144_p11 = pneg %p7556_p6  ;;  %p7151_p2 = scmp.lt.u32.totalorder %s7142_s8, %s7548_s23 }
  0x67   : > { %p7150_p0 = por %p7149_p13, %p7148_p10 }
  0x68   : > { %p7145_p3 = pnand %p7144_p11, %p7143_p12 }
  0x69   : > { %p7152_p9 = por %p7151_p2, %p7150_p0 }
  0x6a   : > { %p7146_p8 = pneg %p7145_p3 }
  0x6c   : > { %p7153_p1 = pnand %p7152_p9, %p7146_p8 }
  0x6e   : > { %7156 = shalt.err (!%p7153_p1)
}
  0x6f   : > { %s7157_s7 = scalar_lea.vmem %s7550_s4, 128  ;;  %s7309_s28 = smov [#allocation7]  }
  0x70   : > { %p7158_p7 = scmp.ne.s32.totalorder %s7550_s4, %s7157_s7  ;;  %s7162_s27 = sshll.u32 %s7309_s28, 4  ;;  %s7163_s27 = int_to_ptr.vmem [resolvable:$false] %s7162_s27 }
  0x71   : > { %s7164_s20 = scalar_lea.vmem %s7163_s27, 256  ;;  %p7165_p3 = scmp.lt.s32.totalorder %s7550_s4, %s7163_s27 }
  0x72   : > { %p7160_p4 = pnand %p7158_p7, %p7144_p11  ;;  %p7166_p10 = scmp.lt.s32.totalorder %s7164_s20, %s7157_s7 }
  0x74   : > { %p7161_p12 = pneg %p7160_p4  ;;  %p7167_p13 = por %p7166_p10, %p7165_p3 }
  0x76   : > { %p7168_p0 = pnand %p7167_p13, %p7161_p12 }
  0x78   : > { %7171 = shalt.err (!%p7168_p0)
}
  0x79   : > { %6970 = dma.hbm_to_vmem [thread:$0]  (!%p7556_p6), %s7548_s23, 128, %s7550_s4, %s7434_s25  }
  0x7a   : > { %p8676_p8 = scmp.ne.s32.totalorder %s8667_s26, 0 }
  0x7b   : > { %p8677_p11 = scmp.eq.s32.totalorder (!%p8676_p8), %s7463_s24, 0 }
  0x7c   : > { %207 = sbr.rel (%p8676_p8) target bundleno = 1178 (0x49a), region = 32 }
  0x83   : > { %7245 = dma.done.wait (%p8677_p11), [#allocation3], 1536   ;;  %p8678_p2 = pmov %p8677_p11 }
  0x84   : > { %s213_s8 = sand.u32 1, %s7463_s24   ;;  %s215_s30 = sand.u32 1, %s7278_s16  }
  0x85   : > { %7247 = vsyncadd (%p8678_p2), [#allocation3], 4294965760  ;;  %s6949_s29 = smul.u32 6144, %s215_s30  ;;  %s214_s6 = scalar_lea.sflag [#allocation6], %s213_s8 }
  0x86   : > { %p8679_p9 = scmp.ne.s32.totalorder %s8664_s3, 0 }
  0x87   : > { %s7594_s5 = scalar_lea.vmem [#allocation5], %s6949_s29 }
  0x88   : > { %7249 = dma.done.wait (%p8679_p9), %s214_s6, 98304  }
  0x89   : > { %7251 = vsyncadd (%p8679_p9), %s214_s6, 4294868992  ;;  %s7601_s25 = sand.u32 1, %s7266_s13   ;;  %p8680_p6 = scmp.ne.s32.totalorder %s8665_s15, 0 }
  0x8a   : > { %s6155_s26 = sshll.u32 %s7601_s25, 3 }
  0x8b   : > { %s7604_s23 = scalar_lea.vmem [#allocation7], %s6155_s26 }
  0x8c   : > { %7253 = dma.done.wait (%p8680_p6), %s214_s6, 128  }
  0x8d   : > { %7255 = vsyncadd (%p8680_p6), %s214_s6, 4294967168  ;;  %s6156_s24 = sshll.u32 %s7601_s25, 6  ;;  %p6157_p1 = scmp.ne.s32.totalorder %s7286_s18, 0 }
  0x8e   : > { %s7611_s4 = scalar_lea.vmem [#allocation8], %s6156_s24  ;;  %v7310_v0 = vmov (!%p6157_p1), 0.0  }
  0x8f   : > { %261 = sbr.rel (%p6157_p1) target bundleno = 150 (0x96), region = 48  ;;  %262 = vst [vmem:[%s7611_s4] sm:$0xff] (!%p6157_p1), %v7310_v0  ;;  %263 = vst [vmem:[%s7611_s4 + $0x8] sm:$0xff] (!%p6157_p1), %v7310_v0 }
  0x90   : > { %264 = vst [vmem:[%s7611_s4 + $0x10] sm:$0xff] (!%p6157_p1), %v7310_v0  ;;  %265 = vst [vmem:[%s7611_s4 + $0x18] sm:$0xff] (!%p6157_p1), %v7310_v0 }
  0x91   : > { %266 = vst [vmem:[%s7611_s4 + $0x20] sm:$0xff] (!%p6157_p1), %v7310_v0  ;;  %267 = vst [vmem:[%s7611_s4 + $0x28] sm:$0xff] (!%p6157_p1), %v7310_v0 }
  0x92   : > { %268 = vst [vmem:[%s7611_s4 + $0x30] sm:$0xff] (!%p6157_p1), %v7310_v0  ;;  %269 = vst [vmem:[%s7611_s4 + $0x38] sm:$0xff] (!%p6157_p1), %v7310_v0 }
  0x96 PF: > { %v289_v1 = vld [vmem:[%s7594_s5] sm:$0xff]  ;;  %s270_s3 = smul.u32 1536, %s7286_s18  ;;  %p6939_p7 = scmp.ne.s32.totalorder %s7286_s18, 1 }
  0x97   : > { %v293_v2 = vld [vmem:[%s7594_s5 + $0x20] sm:$0xff] }
  0x98   : > { %v417_v3 = vld [vmem:[%s7594_s5 + $0x400] sm:$0xff]  ;;  %v6172_v4 = vcombine.high %v289_v1, %v293_v2  ;;  %v6171_v6 = vcombine.low %v289_v1, %v293_v2  ;;  %s7643_s15 = sshra.s32 %s270_s3, 7 }
  0x99   : > { %v421_v5 = vld [vmem:[%s7594_s5 + $0x420] sm:$0xff]  ;;  %s6158_s7 = sshll.u32 %s7643_s15, 2 }
  0x9a   : > { %v297_v7 = vld [vmem:[%s7594_s5 + $0x40] sm:$0xff]  ;;  %v6300_v9 = vcombine.high %v417_v3, %v421_v5  ;;  %v6299_v10 = vcombine.low %v417_v3, %v421_v5  ;;  %4939 = vmatprep.subr.bf16.mxu0 %v6172_v4  ;;  %s7654_s28 = scalar_lea.vmem [#allocation2], %s6158_s7 }
  0x9b   : > { %v301_v8 = vld [vmem:[%s7594_s5 + $0x60] sm:$0xff]  ;;  %4940 = vmatpush1.bf16.msra.mxu0 %v6171_v6  ;;  %v7660_v55 = vld [vmem:[%s7654_s28 + $0x8] sm:$0xff] }
  0x9c   : > { %v6180_v11 = vcombine.high %v297_v7, %v301_v8  ;;  %v425_v12 = vld [vmem:[%s7594_s5 + $0x440] sm:$0xff]  ;;  %4980 = vmatprep.subr.bf16.mxu1 %v6300_v9  ;;  %v6179_v19 = vcombine.low %v297_v7, %v301_v8  ;;  %v7670_v60 = vcombine.high %v7660_v55, %v7660_v55 }
  0x9d   : > { %v429_v13 = vld [vmem:[%s7594_s5 + $0x460] sm:$0xff]  ;;  %4981 = vmatpush1.bf16.msra.mxu1 %v6299_v10 }
  0x9e   : > { %v305_v14 = vld [vmem:[%s7594_s5 + $0x80] sm:$0xff]  ;;  %v6308_v15 = vcombine.high %v425_v12, %v429_v13  ;;  %4941 = vmatprep.subr.bf16.mxu0 %v6180_v11  ;;  %v6307_v20 = vcombine.low %v425_v12, %v429_v13  ;;  %5012 = vmatprep.mubr.bf16.mxu1 %v7670_v60 }
  0x9f   : > { %v309_v16 = vld [vmem:[%s7594_s5 + $0xa0] sm:$0xff]  ;;  %4942 = vmatpush1.bf16.msra.mxu0 %v6179_v19 }
  0xa0   : > { %v433_v17 = vld [vmem:[%s7594_s5 + $0x480] sm:$0xff]  ;;  %v6188_v21 = vcombine.high %v305_v14, %v309_v16  ;;  %4982 = vmatprep.subr.bf16.mxu1 %v6308_v15  ;;  %v6187_v27 = vcombine.low %v305_v14, %v309_v16 }
  0xa1   : > { %v437_v18 = vld [vmem:[%s7594_s5 + $0x4a0] sm:$0xff]  ;;  %4983 = vmatpush1.bf16.msra.mxu1 %v6307_v20 }
  0xa2   : > { %v6316_v22 = vcombine.high %v433_v17, %v437_v18  ;;  %v313_v23 = vld [vmem:[%s7594_s5 + $0xc0] sm:$0xff]  ;;  %4943 = vmatprep.subr.bf16.mxu0 %v6188_v21  ;;  %v6315_v28 = vcombine.low %v433_v17, %v437_v18 }
  0xa3   : > { %v317_v24 = vld [vmem:[%s7594_s5 + $0xe0] sm:$0xff]  ;;  %4944 = vmatpush1.bf16.msra.mxu0 %v6187_v27 }
  0xa4   : > { %v441_v25 = vld [vmem:[%s7594_s5 + $0x4c0] sm:$0xff]  ;;  %v6196_v29 = vcombine.high %v313_v23, %v317_v24  ;;  %4984 = vmatprep.subr.bf16.mxu1 %v6316_v22  ;;  %v6195_v35 = vcombine.low %v313_v23, %v317_v24 }
  0xa5   : > { %v445_v26 = vld [vmem:[%s7594_s5 + $0x4e0] sm:$0xff]  ;;  %4985 = vmatpush1.bf16.msra.mxu1 %v6315_v28 }
  0xa6   : > { %v6324_v30 = vcombine.high %v441_v25, %v445_v26  ;;  %v321_v31 = vld [vmem:[%s7594_s5 + $0x100] sm:$0xff]  ;;  %4945 = vmatprep.subr.bf16.mxu0 %v6196_v29  ;;  %v6323_v36 = vcombine.low %v441_v25, %v445_v26 }
  0xa7   : > { %v325_v32 = vld [vmem:[%s7594_s5 + $0x120] sm:$0xff]  ;;  %4946 = vmatpush1.bf16.msra.mxu0 %v6195_v35 }
  0xa8   : > { %v449_v33 = vld [vmem:[%s7594_s5 + $0x500] sm:$0xff]  ;;  %v6204_v37 = vcombine.high %v321_v31, %v325_v32  ;;  %4986 = vmatprep.subr.bf16.mxu1 %v6324_v30  ;;  %v6203_v43 = vcombine.low %v321_v31, %v325_v32 }
  0xa9   : > { %v453_v34 = vld [vmem:[%s7594_s5 + $0x520] sm:$0xff]  ;;  %4987 = vmatpush1.bf16.msra.mxu1 %v6323_v36 }
  0xaa   : > { %v6332_v38 = vcombine.high %v449_v33, %v453_v34  ;;  %v329_v39 = vld [vmem:[%s7594_s5 + $0x140] sm:$0xff]  ;;  %4947 = vmatprep.subr.bf16.mxu0 %v6204_v37  ;;  %v6331_v44 = vcombine.low %v449_v33, %v453_v34 }
  0xab   : > { %v333_v40 = vld [vmem:[%s7594_s5 + $0x160] sm:$0xff]  ;;  %4948 = vmatpush1.bf16.msra.mxu0 %v6203_v43 }
  0xac   : > { %v457_v41 = vld [vmem:[%s7594_s5 + $0x540] sm:$0xff]  ;;  %v6212_v45 = vcombine.high %v329_v39, %v333_v40  ;;  %4988 = vmatprep.subr.bf16.mxu1 %v6332_v38  ;;  %v6211_v51 = vcombine.low %v329_v39, %v333_v40 }
  0xad   : > { %v461_v42 = vld [vmem:[%s7594_s5 + $0x560] sm:$0xff]  ;;  %4989 = vmatpush1.bf16.msra.mxu1 %v6331_v44 }
  0xae   : > { %v6340_v46 = vcombine.high %v457_v41, %v461_v42  ;;  %v337_v47 = vld [vmem:[%s7594_s5 + $0x180] sm:$0xff]  ;;  %4949 = vmatprep.subr.bf16.mxu0 %v6212_v45  ;;  %v6339_v52 = vcombine.low %v457_v41, %v461_v42 }
  0xaf   : > { %v341_v48 = vld [vmem:[%s7594_s5 + $0x1a0] sm:$0xff]  ;;  %4950 = vmatpush1.bf16.msra.mxu0 %v6211_v51 }
  0xb0   : > { %v465_v49 = vld [vmem:[%s7594_s5 + $0x580] sm:$0xff]  ;;  %v6220_v53 = vcombine.high %v337_v47, %v341_v48  ;;  %4990 = vmatprep.subr.bf16.mxu1 %v6340_v46  ;;  %v6219_v63 = vcombine.low %v337_v47, %v341_v48 }
  0xb1   : > { %v469_v50 = vld [vmem:[%s7594_s5 + $0x5a0] sm:$0xff]  ;;  %4991 = vmatpush1.bf16.msra.mxu1 %v6339_v52 }
  0xb2   : > { %v7657_v54 = vld [vmem:[%s7654_s28] sm:$0xff]  ;;  %v6348_v56 = vcombine.high %v465_v49, %v469_v50  ;;  %4951 = vmatprep.subr.bf16.mxu0 %v6220_v53  ;;  %v6347_v0 = vcombine.low %v465_v49, %v469_v50 }
  0xb3   : > { %v345_v57 = vld [vmem:[%s7594_s5 + $0x1c0] sm:$0xff]  ;;  %v7666_v59 = vcombine.high %v7657_v54, %v7657_v54  ;;  %4952 = vmatpush1.bf16.msra.mxu0 %v6219_v63 }
  0xb4   : > { %v349_v58 = vld [vmem:[%s7594_s5 + $0x1e0] sm:$0xff]  ;;  %4992 = vmatprep.subr.bf16.mxu1 %v6348_v56 }
  0xb5   : > { %v473_v61 = vld [vmem:[%s7594_s5 + $0x5c0] sm:$0xff]  ;;  %4971 = vmatprep.mubr.bf16.mxu0 %v7666_v59  ;;  %v6228_v1 = vcombine.high %v345_v57, %v349_v58  ;;  %v6227_v7 = vcombine.low %v345_v57, %v349_v58  ;;  %4993 = vmatpush1.bf16.msra.mxu1 %v6347_v0 }
  0xb6   : > { %v477_v62 = vld [vmem:[%s7594_s5 + $0x5e0] sm:$0xff] }
  0xb7   : > { %v6356_v2 = vcombine.high %v473_v61, %v477_v62  ;;  %v353_v3 = vld [vmem:[%s7594_s5 + $0x200] sm:$0xff]  ;;  %4953 = vmatprep.subr.bf16.mxu0 %v6228_v1  ;;  %v6355_v8 = vcombine.low %v473_v61, %v477_v62 }
  0xb8   : > { %v357_v4 = vld [vmem:[%s7594_s5 + $0x220] sm:$0xff]  ;;  %4954 = vmatpush1.bf16.msra.mxu0 %v6227_v7 }
  0xb9   : > { %v481_v5 = vld [vmem:[%s7594_s5 + $0x600] sm:$0xff]  ;;  %v6236_v9 = vcombine.high %v353_v3, %v357_v4  ;;  %4994 = vmatprep.subr.bf16.mxu1 %v6356_v2  ;;  %v6235_v15 = vcombine.low %v353_v3, %v357_v4 }
  0xba   : > { %v485_v6 = vld [vmem:[%s7594_s5 + $0x620] sm:$0xff]  ;;  %4995 = vmatpush1.bf16.msra.mxu1 %v6355_v8 }
  0xbb   : > { %v6364_v10 = vcombine.high %v481_v5, %v485_v6  ;;  %v361_v11 = vld [vmem:[%s7594_s5 + $0x240] sm:$0xff]  ;;  %4955 = vmatprep.subr.bf16.mxu0 %v6236_v9  ;;  %v6363_v16 = vcombine.low %v481_v5, %v485_v6 }
  0xbc   : > { %v365_v12 = vld [vmem:[%s7594_s5 + $0x260] sm:$0xff]  ;;  %4956 = vmatpush1.bf16.msra.mxu0 %v6235_v15 }
  0xbd   : > { %v489_v13 = vld [vmem:[%s7594_s5 + $0x640] sm:$0xff]  ;;  %v6244_v17 = vcombine.high %v361_v11, %v365_v12  ;;  %4996 = vmatprep.subr.bf16.mxu1 %v6364_v10  ;;  %v6243_v23 = vcombine.low %v361_v11, %v365_v12 }
  0xbe   : > { %v493_v14 = vld [vmem:[%s7594_s5 + $0x660] sm:$0xff]  ;;  %4997 = vmatpush1.bf16.msra.mxu1 %v6363_v16 }
  0xbf   : > { %v6372_v18 = vcombine.high %v489_v13, %v493_v14  ;;  %v369_v19 = vld [vmem:[%s7594_s5 + $0x280] sm:$0xff]  ;;  %4957 = vmatprep.subr.bf16.mxu0 %v6244_v17  ;;  %v6371_v24 = vcombine.low %v489_v13, %v493_v14  ;;  %v7716_v17 = vcombine.low %v7657_v54, %v7657_v54 }
  0xc0   : > { %v373_v20 = vld [vmem:[%s7594_s5 + $0x2a0] sm:$0xff]  ;;  %4958 = vmatpush1.bf16.msra.mxu0 %v6243_v23  ;;  %v7728_v23 = vld [vmem:[%s7654_s28 + $0x18] sm:$0xff] }
  0xc1   : > { %v497_v21 = vld [vmem:[%s7594_s5 + $0x680] sm:$0xff]  ;;  %v6252_v25 = vcombine.high %v369_v19, %v373_v20  ;;  %4998 = vmatprep.subr.bf16.mxu1 %v6372_v18  ;;  %v6251_v31 = vcombine.low %v369_v19, %v373_v20  ;;  %v7721_v20 = vld [vmem:[%s7654_s28 + $0x10] sm:$0xff] }
  0xc2   : > { %v501_v22 = vld [vmem:[%s7594_s5 + $0x6a0] sm:$0xff]  ;;  %4999 = vmatpush1.bf16.msra.mxu1 %v6371_v24 }
  0xc3   : > { %v6380_v26 = vcombine.high %v497_v21, %v501_v22  ;;  %v377_v27 = vld [vmem:[%s7594_s5 + $0x2c0] sm:$0xff]  ;;  %4959 = vmatprep.subr.bf16.mxu0 %v6252_v25  ;;  %v6379_v32 = vcombine.low %v497_v21, %v501_v22  ;;  %v7725_v21 = vcombine.low %v7660_v55, %v7660_v55 }
  0xc4   : > { %v381_v28 = vld [vmem:[%s7594_s5 + $0x2e0] sm:$0xff]  ;;  %4960 = vmatpush1.bf16.msra.mxu0 %v6251_v31 }
  0xc5   : > { %v505_v29 = vld [vmem:[%s7594_s5 + $0x6c0] sm:$0xff]  ;;  %v6260_v33 = vcombine.high %v377_v27, %v381_v28  ;;  %5000 = vmatprep.subr.bf16.mxu1 %v6380_v26  ;;  %v6259_v39 = vcombine.low %v377_v27, %v381_v28  ;;  %v7734_v28 = vcombine.high %v7721_v20, %v7721_v20 }
  0xc6   : > { %v509_v30 = vld [vmem:[%s7594_s5 + $0x6e0] sm:$0xff]  ;;  %5001 = vmatpush1.bf16.msra.mxu1 %v6379_v32 }
  0xc7   : > { %v6388_v34 = vcombine.high %v505_v29, %v509_v30  ;;  %v385_v35 = vld [vmem:[%s7594_s5 + $0x300] sm:$0xff]  ;;  %4961 = vmatprep.subr.bf16.mxu0 %v6260_v33  ;;  %v6387_v40 = vcombine.low %v505_v29, %v509_v30  ;;  %v7741_v30 = vcombine.high %v7728_v23, %v7728_v23 }
  0xc8   : > { %v389_v36 = vld [vmem:[%s7594_s5 + $0x320] sm:$0xff]  ;;  %4962 = vmatpush1.bf16.msra.mxu0 %v6259_v39 }
  0xc9   : > { %v513_v37 = vld [vmem:[%s7594_s5 + $0x700] sm:$0xff]  ;;  %v6268_v41 = vcombine.high %v385_v35, %v389_v36  ;;  %5002 = vmatprep.subr.bf16.mxu1 %v6388_v34  ;;  %v6267_v47 = vcombine.low %v385_v35, %v389_v36 }
  0xca   : > { %v517_v38 = vld [vmem:[%s7594_s5 + $0x720] sm:$0xff]  ;;  %5003 = vmatpush1.bf16.msra.mxu1 %v6387_v40 }
  0xcb   : > { %v6396_v42 = vcombine.high %v513_v37, %v517_v38  ;;  %v393_v43 = vld [vmem:[%s7594_s5 + $0x340] sm:$0xff]  ;;  %4963 = vmatprep.subr.bf16.mxu0 %v6268_v41  ;;  %v6395_v48 = vcombine.low %v513_v37, %v517_v38 }
  0xcc   : > { %v397_v44 = vld [vmem:[%s7594_s5 + $0x360] sm:$0xff]  ;;  %4964 = vmatpush1.bf16.msra.mxu0 %v6267_v47 }
  0xcd   : > { %v521_v45 = vld [vmem:[%s7594_s5 + $0x740] sm:$0xff]  ;;  %v6276_v49 = vcombine.high %v393_v43, %v397_v44  ;;  %5004 = vmatprep.subr.bf16.mxu1 %v6396_v42  ;;  %v6275_v57 = vcombine.low %v393_v43, %v397_v44 }
  0xce   : > { %v525_v46 = vld [vmem:[%s7594_s5 + $0x760] sm:$0xff]  ;;  %5005 = vmatpush1.bf16.msra.mxu1 %v6395_v48 }
  0xcf   : > { %v6404_v50 = vcombine.high %v521_v45, %v525_v46  ;;  %v401_v51 = vld [vmem:[%s7594_s5 + $0x380] sm:$0xff]  ;;  %4965 = vmatprep.subr.bf16.mxu0 %v6276_v49  ;;  %v6403_v58 = vcombine.low %v521_v45, %v525_v46 }
  0xd0   : > { %v405_v52 = vld [vmem:[%s7594_s5 + $0x3a0] sm:$0xff]  ;;  %4966 = vmatpush1.bf16.msra.mxu0 %v6275_v57 }
  0xd1   : > { %v529_v53 = vld [vmem:[%s7594_s5 + $0x780] sm:$0xff]  ;;  %v6284_v61 = vcombine.high %v401_v51, %v405_v52  ;;  %5006 = vmatprep.subr.bf16.mxu1 %v6404_v50  ;;  %v6283_v3 = vcombine.low %v401_v51, %v405_v52 }
  0xd2   : > { %v533_v56 = vld [vmem:[%s7594_s5 + $0x7a0] sm:$0xff]  ;;  %5007 = vmatpush1.bf16.msra.mxu1 %v6403_v58 }
  0xd3   : > { %v6412_v62 = vcombine.high %v529_v53, %v533_v56  ;;  %v409_v63 = vld [vmem:[%s7594_s5 + $0x3c0] sm:$0xff]  ;;  %4967 = vmatprep.subr.bf16.mxu0 %v6284_v61  ;;  %v6411_v4 = vcombine.low %v529_v53, %v533_v56 }
  0xd4   : > { %v413_v0 = vld [vmem:[%s7594_s5 + $0x3e0] sm:$0xff]  ;;  %4968 = vmatpush1.bf16.msra.mxu0 %v6283_v3 }
  0xd5   : > { %v537_v1 = vld [vmem:[%s7594_s5 + $0x7c0] sm:$0xff]  ;;  %v6292_v5 = vcombine.high %v409_v63, %v413_v0  ;;  %5008 = vmatprep.subr.bf16.mxu1 %v6412_v62  ;;  %v6291_v11 = vcombine.low %v409_v63, %v413_v0 }
  0xd6   : > { %v541_v2 = vld [vmem:[%s7594_s5 + $0x7e0] sm:$0xff]  ;;  %5009 = vmatpush1.bf16.msra.mxu1 %v6411_v4 }
  0xd7   : > { %v6420_v6 = vcombine.high %v537_v1, %v541_v2  ;;  %v545_v7 = vld [vmem:[%s7594_s5 + $0x800] sm:$0xff]  ;;  %4969 = vmatprep.subr.bf16.mxu0 %v6292_v5  ;;  %v6419_v12 = vcombine.low %v537_v1, %v541_v2 }
  0xd8   : > { %v549_v8 = vld [vmem:[%s7594_s5 + $0x820] sm:$0xff]  ;;  %4970 = vmatpush1.bf16.msra.mxu0 %v6291_v11 }
  0xd9   : > { %v673_v9 = vld [vmem:[%s7594_s5 + $0xc00] sm:$0xff]  ;;  %v6428_v13 = vcombine.high %v545_v7, %v549_v8  ;;  %5010 = vmatprep.subr.bf16.mxu1 %v6420_v6  ;;  %v6427_v22 = vcombine.low %v545_v7, %v549_v8 }
  0xda   : > { %v677_v10 = vld [vmem:[%s7594_s5 + $0xc20] sm:$0xff]  ;;  %5011 = vmatpush1.bf16.msra.mxu1 %v6419_v12 }
  0xdb   : > { %v6556_v14 = vcombine.high %v673_v9, %v677_v10  ;;  %v553_v15 = vld [vmem:[%s7594_s5 + $0x840] sm:$0xff]  ;;  %5021 = vmatprep.subr.bf16.mxu0 %v6428_v13  ;;  %v6555_v24 = vcombine.low %v673_v9, %v677_v10  ;;  %4972 = vmatmul.mubr.bf16.vlgmr.msra.gmra.mrb[0].mxu0 %v7716_v17 }
  0xdc   : > { %v557_v16 = vld [vmem:[%s7594_s5 + $0x860] sm:$0xff]  ;;  %5022 = vmatpush1.bf16.msra.mxu0 %v6427_v22  ;;  %5053 = vmatprep.mubr.bf16.mxu0 %v7734_v28 }
  0xdd   : > { %v681_v18 = vld [vmem:[%s7594_s5 + $0xc40] sm:$0xff]  ;;  %v6436_v25 = vcombine.high %v553_v15, %v557_v16  ;;  %5062 = vmatprep.subr.bf16.mxu1 %v6556_v14  ;;  %5013 = vmatmul.mubr.bf16.vlgmr.msra.gmra.mrb[0].mxu1 %v7725_v21  ;;  %v6435_v31 = vcombine.low %v553_v15, %v557_v16 }
  0xde   : > { %v685_v19 = vld [vmem:[%s7594_s5 + $0xc60] sm:$0xff]  ;;  %5063 = vmatpush1.bf16.msra.mxu1 %v6555_v24  ;;  %5094 = vmatprep.mubr.bf16.mxu1 %v7741_v30 }
  0xdf   : > { %v6564_v54 = vcombine.high %v681_v18, %v685_v19  ;;  %v561_v26 = vld [vmem:[%s7594_s5 + $0x880] sm:$0xff]  ;;  %5023 = vmatprep.subr.bf16.mxu0 %v6436_v25  ;;  %v6563_v32 = vcombine.low %v681_v18, %v685_v19 }
  0xe0   : > { %v565_v27 = vld [vmem:[%s7594_s5 + $0x8a0] sm:$0xff]  ;;  %5024 = vmatpush1.bf16.msra.mxu0 %v6435_v31 }
  0xe1   : > { %v689_v55 = vld [vmem:[%s7594_s5 + $0xc80] sm:$0xff]  ;;  %v6444_v33 = vcombine.high %v561_v26, %v565_v27  ;;  %5064 = vmatprep.subr.bf16.mxu1 %v6564_v54  ;;  %v6443_v39 = vcombine.low %v561_v26, %v565_v27 }
  0xe2   : > { %v693_v29 = vld [vmem:[%s7594_s5 + $0xca0] sm:$0xff]  ;;  %5065 = vmatpush1.bf16.msra.mxu1 %v6563_v32 }
  0xe3   : > { %v6572_v34 = vcombine.high %v689_v55, %v693_v29  ;;  %v569_v35 = vld [vmem:[%s7594_s5 + $0x8c0] sm:$0xff]  ;;  %5025 = vmatprep.subr.bf16.mxu0 %v6444_v33  ;;  %v6571_v40 = vcombine.low %v689_v55, %v693_v29 }
  0xe4   : > { %v573_v36 = vld [vmem:[%s7594_s5 + $0x8e0] sm:$0xff]  ;;  %5026 = vmatpush1.bf16.msra.mxu0 %v6443_v39 }
  0xe5   : > { %v697_v37 = vld [vmem:[%s7594_s5 + $0xcc0] sm:$0xff]  ;;  %v6452_v41 = vcombine.high %v569_v35, %v573_v36  ;;  %5066 = vmatprep.subr.bf16.mxu1 %v6572_v34  ;;  %v6451_v47 = vcombine.low %v569_v35, %v573_v36 }
  0xe6   : > { %v701_v38 = vld [vmem:[%s7594_s5 + $0xce0] sm:$0xff]  ;;  %5067 = vmatpush1.bf16.msra.mxu1 %v6571_v40 }
  0xe7   : > { %v6580_v42 = vcombine.high %v697_v37, %v701_v38  ;;  %v577_v43 = vld [vmem:[%s7594_s5 + $0x900] sm:$0xff]  ;;  %5027 = vmatprep.subr.bf16.mxu0 %v6452_v41  ;;  %v6579_v48 = vcombine.low %v697_v37, %v701_v38 }
  0xe8   : > { %v581_v44 = vld [vmem:[%s7594_s5 + $0x920] sm:$0xff]  ;;  %5028 = vmatpush1.bf16.msra.mxu0 %v6451_v47 }
  0xe9   : > { %v705_v45 = vld [vmem:[%s7594_s5 + $0xd00] sm:$0xff]  ;;  %v6460_v49 = vcombine.high %v577_v43, %v581_v44  ;;  %5068 = vmatprep.subr.bf16.mxu1 %v6580_v42  ;;  %v6459_v57 = vcombine.low %v577_v43, %v581_v44 }
  0xea   : > { %v709_v46 = vld [vmem:[%s7594_s5 + $0xd20] sm:$0xff]  ;;  %5069 = vmatpush1.bf16.msra.mxu1 %v6579_v48 }
  0xeb   : > { %v6588_v50 = vcombine.high %v705_v45, %v709_v46  ;;  %v585_v51 = vld [vmem:[%s7594_s5 + $0x940] sm:$0xff]  ;;  %5029 = vmatprep.subr.bf16.mxu0 %v6460_v49  ;;  %v6587_v58 = vcombine.low %v705_v45, %v709_v46 }
  0xec   : > { %v589_v52 = vld [vmem:[%s7594_s5 + $0x960] sm:$0xff]  ;;  %5030 = vmatpush1.bf16.msra.mxu0 %v6459_v57 }
  0xed   : > { %v713_v53 = vld [vmem:[%s7594_s5 + $0xd40] sm:$0xff]  ;;  %v6468_v61 = vcombine.high %v585_v51, %v589_v52  ;;  %5070 = vmatprep.subr.bf16.mxu1 %v6588_v50  ;;  %v6467_v3 = vcombine.low %v585_v51, %v589_v52 }
  0xee   : > { %v717_v56 = vld [vmem:[%s7594_s5 + $0xd60] sm:$0xff]  ;;  %5071 = vmatpush1.bf16.msra.mxu1 %v6587_v58 }
  0xef   : > { %v6596_v62 = vcombine.high %v713_v53, %v717_v56  ;;  %v593_v63 = vld [vmem:[%s7594_s5 + $0x980] sm:$0xff]  ;;  %5031 = vmatprep.subr.bf16.mxu0 %v6468_v61  ;;  %v6595_v4 = vcombine.low %v713_v53, %v717_v56 }
  0xf0   : > { %v597_v0 = vld [vmem:[%s7594_s5 + $0x9a0] sm:$0xff]  ;;  %5032 = vmatpush1.bf16.msra.mxu0 %v6467_v3 }
  0xf1   : > { %v721_v1 = vld [vmem:[%s7594_s5 + $0xd80] sm:$0xff]  ;;  %v6476_v5 = vcombine.high %v593_v63, %v597_v0  ;;  %5072 = vmatprep.subr.bf16.mxu1 %v6596_v62  ;;  %v6475_v11 = vcombine.low %v593_v63, %v597_v0 }
  0xf2   : > { %v725_v2 = vld [vmem:[%s7594_s5 + $0xda0] sm:$0xff]  ;;  %5073 = vmatpush1.bf16.msra.mxu1 %v6595_v4 }
  0xf3   : > { %v6604_v6 = vcombine.high %v721_v1, %v725_v2  ;;  %v601_v7 = vld [vmem:[%s7594_s5 + $0x9c0] sm:$0xff]  ;;  %5033 = vmatprep.subr.bf16.mxu0 %v6476_v5  ;;  %v6603_v12 = vcombine.low %v721_v1, %v725_v2 }
  0xf4   : > { %v605_v8 = vld [vmem:[%s7594_s5 + $0x9e0] sm:$0xff]  ;;  %5034 = vmatpush1.bf16.msra.mxu0 %v6475_v11 }
  0xf5   : > { %v729_v9 = vld [vmem:[%s7594_s5 + $0xdc0] sm:$0xff]  ;;  %v6484_v13 = vcombine.high %v601_v7, %v605_v8  ;;  %5074 = vmatprep.subr.bf16.mxu1 %v6604_v6  ;;  %v6483_v22 = vcombine.low %v601_v7, %v605_v8 }
  0xf6   : > { %v733_v10 = vld [vmem:[%s7594_s5 + $0xde0] sm:$0xff]  ;;  %5075 = vmatpush1.bf16.msra.mxu1 %v6603_v12 }
  0xf7   : > { %v6612_v14 = vcombine.high %v729_v9, %v733_v10  ;;  %v609_v15 = vld [vmem:[%s7594_s5 + $0xa00] sm:$0xff]  ;;  %5035 = vmatprep.subr.bf16.mxu0 %v6484_v13  ;;  %v6611_v24 = vcombine.low %v729_v9, %v733_v10 }
  0xf8   : > { %v613_v16 = vld [vmem:[%s7594_s5 + $0xa20] sm:$0xff]  ;;  %5036 = vmatpush1.bf16.msra.mxu0 %v6483_v22 }
  0xf9   : > { %v737_v18 = vld [vmem:[%s7594_s5 + $0xe00] sm:$0xff]  ;;  %v6492_v25 = vcombine.high %v609_v15, %v613_v16  ;;  %5076 = vmatprep.subr.bf16.mxu1 %v6612_v14  ;;  %v6491_v31 = vcombine.low %v609_v15, %v613_v16 }
  0xfa   : > { %v741_v19 = vld [vmem:[%s7594_s5 + $0xe20] sm:$0xff]  ;;  %5077 = vmatpush1.bf16.msra.mxu1 %v6611_v24 }
  0xfb   : > { %v6620_v54 = vcombine.high %v737_v18, %v741_v19  ;;  %v617_v26 = vld [vmem:[%s7594_s5 + $0xa40] sm:$0xff]  ;;  %5037 = vmatprep.subr.bf16.mxu0 %v6492_v25  ;;  %v6619_v32 = vcombine.low %v737_v18, %v741_v19 }
  0xfc   : > { %v621_v27 = vld [vmem:[%s7594_s5 + $0xa60] sm:$0xff]  ;;  %5038 = vmatpush1.bf16.msra.mxu0 %v6491_v31 }
  0xfd   : > { %v745_v55 = vld [vmem:[%s7594_s5 + $0xe40] sm:$0xff]  ;;  %v6500_v33 = vcombine.high %v617_v26, %v621_v27  ;;  %5078 = vmatprep.subr.bf16.mxu1 %v6620_v54  ;;  %v6499_v39 = vcombine.low %v617_v26, %v621_v27 }
  0xfe   : > { %v749_v29 = vld [vmem:[%s7594_s5 + $0xe60] sm:$0xff]  ;;  %5079 = vmatpush1.bf16.msra.mxu1 %v6619_v32 }
  0xff   : > { %v6628_v34 = vcombine.high %v745_v55, %v749_v29  ;;  %v625_v35 = vld [vmem:[%s7594_s5 + $0xa80] sm:$0xff]  ;;  %5039 = vmatprep.subr.bf16.mxu0 %v6500_v33  ;;  %v6627_v40 = vcombine.low %v745_v55, %v749_v29 }
 0x100   : > { %v629_v36 = vld [vmem:[%s7594_s5 + $0xaa0] sm:$0xff]  ;;  %5040 = vmatpush1.bf16.msra.mxu0 %v6499_v39 }
 0x101   : > { %v753_v37 = vld [vmem:[%s7594_s5 + $0xe80] sm:$0xff]  ;;  %v6508_v41 = vcombine.high %v625_v35, %v629_v36  ;;  %5080 = vmatprep.subr.bf16.mxu1 %v6628_v34  ;;  %v6507_v47 = vcombine.low %v625_v35, %v629_v36 }
 0x102   : > { %v757_v38 = vld [vmem:[%s7594_s5 + $0xea0] sm:$0xff]  ;;  %5081 = vmatpush1.bf16.msra.mxu1 %v6627_v40 }
 0x103   : > { %v6636_v42 = vcombine.high %v753_v37, %v757_v38  ;;  %v633_v43 = vld [vmem:[%s7594_s5 + $0xac0] sm:$0xff]  ;;  %5041 = vmatprep.subr.bf16.mxu0 %v6508_v41  ;;  %v6635_v48 = vcombine.low %v753_v37, %v757_v38  ;;  %v7806_v37 = vcombine.low %v7721_v20, %v7721_v20  ;;  %v7815_v41 = vcombine.low %v7728_v23, %v7728_v23 }
 0x104   : > { %v637_v44 = vld [vmem:[%s7594_s5 + $0xae0] sm:$0xff]  ;;  %5042 = vmatpush1.bf16.msra.mxu0 %v6507_v47 }
 0x105   : > { %v761_v45 = vld [vmem:[%s7594_s5 + $0xec0] sm:$0xff]  ;;  %v6516_v49 = vcombine.high %v633_v43, %v637_v44  ;;  %5082 = vmatprep.subr.bf16.mxu1 %v6636_v42  ;;  %v6515_v57 = vcombine.low %v633_v43, %v637_v44  ;;  %v7818_v43 = vld [vmem:[%s7654_s28 + $0x28] sm:$0xff] }
 0x106   : > { %v765_v46 = vld [vmem:[%s7594_s5 + $0xee0] sm:$0xff]  ;;  %5083 = vmatpush1.bf16.msra.mxu1 %v6635_v48 }
 0x107   : > { %v6644_v50 = vcombine.high %v761_v45, %v765_v46  ;;  %v641_v51 = vld [vmem:[%s7594_s5 + $0xb00] sm:$0xff]  ;;  %5043 = vmatprep.subr.bf16.mxu0 %v6516_v49  ;;  %v6643_v58 = vcombine.low %v761_v45, %v765_v46 }
 0x108   : > { %v645_v52 = vld [vmem:[%s7594_s5 + $0xb20] sm:$0xff]  ;;  %5044 = vmatpush1.bf16.msra.mxu0 %v6515_v57 }
 0x109   : > { %v769_v53 = vld [vmem:[%s7594_s5 + $0xf00] sm:$0xff]  ;;  %v6524_v61 = vcombine.high %v641_v51, %v645_v52  ;;  %5084 = vmatprep.subr.bf16.mxu1 %v6644_v50  ;;  %v6523_v3 = vcombine.low %v641_v51, %v645_v52  ;;  %v7831_v50 = vcombine.high %v7818_v43, %v7818_v43 }
 0x10a   : > { %v773_v56 = vld [vmem:[%s7594_s5 + $0xf20] sm:$0xff]  ;;  %5085 = vmatpush1.bf16.msra.mxu1 %v6643_v58 }
 0x10b   : > { %v6652_v62 = vcombine.high %v769_v53, %v773_v56  ;;  %v649_v63 = vld [vmem:[%s7594_s5 + $0xb40] sm:$0xff]  ;;  %5045 = vmatprep.subr.bf16.mxu0 %v6524_v61  ;;  %v6651_v4 = vcombine.low %v769_v53, %v773_v56 }
 0x10c   : > { %v653_v0 = vld [vmem:[%s7594_s5 + $0xb60] sm:$0xff]  ;;  %5046 = vmatpush1.bf16.msra.mxu0 %v6523_v3 }
 0x10d   : > { %v777_v1 = vld [vmem:[%s7594_s5 + $0xf40] sm:$0xff]  ;;  %v6532_v5 = vcombine.high %v649_v63, %v653_v0  ;;  %5086 = vmatprep.subr.bf16.mxu1 %v6652_v62  ;;  %v6531_v11 = vcombine.low %v649_v63, %v653_v0 }
 0x10e   : > { %v781_v2 = vld [vmem:[%s7594_s5 + $0xf60] sm:$0xff]  ;;  %5087 = vmatpush1.bf16.msra.mxu1 %v6651_v4 }
 0x10f   : > { %v6660_v6 = vcombine.high %v777_v1, %v781_v2  ;;  %v657_v7 = vld [vmem:[%s7594_s5 + $0xb80] sm:$0xff]  ;;  %5047 = vmatprep.subr.bf16.mxu0 %v6532_v5  ;;  %v6659_v12 = vcombine.low %v777_v1, %v781_v2 }
 0x110   : > { %v661_v8 = vld [vmem:[%s7594_s5 + $0xba0] sm:$0xff]  ;;  %5048 = vmatpush1.bf16.msra.mxu0 %v6531_v11 }
 0x111   : > { %v785_v9 = vld [vmem:[%s7594_s5 + $0xf80] sm:$0xff]  ;;  %v6540_v13 = vcombine.high %v657_v7, %v661_v8  ;;  %5088 = vmatprep.subr.bf16.mxu1 %v6660_v6  ;;  %v6539_v22 = vcombine.low %v657_v7, %v661_v8 }
 0x112   : > { %v789_v10 = vld [vmem:[%s7594_s5 + $0xfa0] sm:$0xff]  ;;  %5089 = vmatpush1.bf16.msra.mxu1 %v6659_v12 }
 0x113   : > { %v6668_v14 = vcombine.high %v785_v9, %v789_v10  ;;  %v665_v15 = vld [vmem:[%s7594_s5 + $0xbc0] sm:$0xff]  ;;  %5049 = vmatprep.subr.bf16.mxu0 %v6540_v13  ;;  %v6667_v24 = vcombine.low %v785_v9, %v789_v10 }
 0x114   : > { %v669_v16 = vld [vmem:[%s7594_s5 + $0xbe0] sm:$0xff]  ;;  %5050 = vmatpush1.bf16.msra.mxu0 %v6539_v22 }
 0x115   : > { %v793_v18 = vld [vmem:[%s7594_s5 + $0xfc0] sm:$0xff]  ;;  %v6548_v25 = vcombine.high %v665_v15, %v669_v16  ;;  %5090 = vmatprep.subr.bf16.mxu1 %v6668_v14  ;;  %v6547_v31 = vcombine.low %v665_v15, %v669_v16 }
 0x116   : > { %v797_v19 = vld [vmem:[%s7594_s5 + $0xfe0] sm:$0xff]  ;;  %5091 = vmatpush1.bf16.msra.mxu1 %v6667_v24 }
 0x117   : > { %v6676_v54 = vcombine.high %v793_v18, %v797_v19  ;;  %v801_v26 = vld [vmem:[%s7594_s5 + $0x1000] sm:$0xff]  ;;  %5051 = vmatprep.subr.bf16.mxu0 %v6548_v25  ;;  %v6675_v32 = vcombine.low %v793_v18, %v797_v19 }
 0x118   : > { %v805_v27 = vld [vmem:[%s7594_s5 + $0x1020] sm:$0xff]  ;;  %5052 = vmatpush1.bf16.msra.mxu0 %v6547_v31 }
 0x119   : > { %v929_v55 = vld [vmem:[%s7594_s5 + $0x1400] sm:$0xff]  ;;  %v6684_v33 = vcombine.high %v801_v26, %v805_v27  ;;  %5092 = vmatprep.subr.bf16.mxu1 %v6676_v54  ;;  %v6683_v42 = vcombine.low %v801_v26, %v805_v27 }
 0x11a   : > { %v933_v29 = vld [vmem:[%s7594_s5 + $0x1420] sm:$0xff]  ;;  %5093 = vmatpush1.bf16.msra.mxu1 %v6675_v32 }
 0x11b   : > { %v6812_v34 = vcombine.high %v929_v55, %v933_v29  ;;  %v809_v35 = vld [vmem:[%s7594_s5 + $0x1040] sm:$0xff]  ;;  %5103 = vmatprep.subr.bf16.mxu0 %v6684_v33  ;;  %v6811_v44 = vcombine.low %v929_v55, %v933_v29  ;;  %5054 = vmatmul.mubr.bf16.vlgmr.msra.gmra.mrb[4].mxu0 %v7806_v37 }
 0x11c   : > { %v813_v36 = vld [vmem:[%s7594_s5 + $0x1060] sm:$0xff]  ;;  %5104 = vmatpush1.bf16.msra.mxu0 %v6683_v42 }
 0x11d   : > { %v937_v38 = vld [vmem:[%s7594_s5 + $0x1440] sm:$0xff]  ;;  %v6692_v45 = vcombine.high %v809_v35, %v813_v36  ;;  %5144 = vmatprep.subr.bf16.mxu1 %v6812_v34  ;;  %5095 = vmatmul.mubr.bf16.vlgmr.msra.gmra.mrb[4].mxu1 %v7815_v41  ;;  %v6691_v51 = vcombine.low %v809_v35, %v813_v36 }
 0x11e   : > { %v941_v39 = vld [vmem:[%s7594_s5 + $0x1460] sm:$0xff]  ;;  %5145 = vmatpush1.bf16.msra.mxu1 %v6811_v44  ;;  %5176 = vmatprep.mubr.bf16.mxu1 %v7831_v50 }
 0x11f   : > { %v7811_v40 = vld [vmem:[%s7654_s28 + $0x20] sm:$0xff]  ;;  %v6820_v20 = vcombine.high %v937_v38, %v941_v39  ;;  %5105 = vmatprep.subr.bf16.mxu0 %v6692_v45  ;;  %v6819_v52 = vcombine.low %v937_v38, %v941_v39 }
 0x120   : > { %v817_v46 = vld [vmem:[%s7594_s5 + $0x1080] sm:$0xff]  ;;  %v7824_v48 = vcombine.high %v7811_v40, %v7811_v40  ;;  %5106 = vmatpush1.bf16.msra.mxu0 %v6691_v51 }
 0x121   : > { %v821_v47 = vld [vmem:[%s7594_s5 + $0x10a0] sm:$0xff]  ;;  %5146 = vmatprep.subr.bf16.mxu1 %v6820_v20 }
 0x122   : > { %v945_v23 = vld [vmem:[%s7594_s5 + $0x1480] sm:$0xff]  ;;  %v6700_v53 = vcombine.high %v817_v46, %v821_v47  ;;  %5135 = vmatprep.mubr.bf16.mxu0 %v7824_v48  ;;  %v6699_v63 = vcombine.low %v817_v46, %v821_v47  ;;  %5147 = vmatpush1.bf16.msra.mxu1 %v6819_v52 }
 0x123   : > { %v949_v49 = vld [vmem:[%s7594_s5 + $0x14a0] sm:$0xff] }
 0x124   : > { %v6828_v56 = vcombine.high %v945_v23, %v949_v49  ;;  %v825_v57 = vld [vmem:[%s7594_s5 + $0x10c0] sm:$0xff]  ;;  %5107 = vmatprep.subr.bf16.mxu0 %v6700_v53  ;;  %v6827_v0 = vcombine.low %v945_v23, %v949_v49 }
 0x125   : > { %v829_v58 = vld [vmem:[%s7594_s5 + $0x10e0] sm:$0xff]  ;;  %5108 = vmatpush1.bf16.msra.mxu0 %v6699_v63 }
 0x126   : > { %v953_v61 = vld [vmem:[%s7594_s5 + $0x14c0] sm:$0xff]  ;;  %v6708_v1 = vcombine.high %v825_v57, %v829_v58  ;;  %5148 = vmatprep.subr.bf16.mxu1 %v6828_v56  ;;  %v6707_v7 = vcombine.low %v825_v57, %v829_v58 }
 0x127   : > { %v957_v62 = vld [vmem:[%s7594_s5 + $0x14e0] sm:$0xff]  ;;  %5149 = vmatpush1.bf16.msra.mxu1 %v6827_v0 }
 0x128   : > { %v6836_v2 = vcombine.high %v953_v61, %v957_v62  ;;  %v833_v3 = vld [vmem:[%s7594_s5 + $0x1100] sm:$0xff]  ;;  %5109 = vmatprep.subr.bf16.mxu0 %v6708_v1  ;;  %v6835_v8 = vcombine.low %v953_v61, %v957_v62 }
 0x129   : > { %v837_v4 = vld [vmem:[%s7594_s5 + $0x1120] sm:$0xff]  ;;  %5110 = vmatpush1.bf16.msra.mxu0 %v6707_v7 }
 0x12a   : > { %v961_v5 = vld [vmem:[%s7594_s5 + $0x1500] sm:$0xff]  ;;  %v6716_v9 = vcombine.high %v833_v3, %v837_v4  ;;  %5150 = vmatprep.subr.bf16.mxu1 %v6836_v2  ;;  %v6715_v15 = vcombine.low %v833_v3, %v837_v4 }
 0x12b   : > { %v965_v6 = vld [vmem:[%s7594_s5 + $0x1520] sm:$0xff]  ;;  %5151 = vmatpush1.bf16.msra.mxu1 %v6835_v8 }
 0x12c   : > { %v6844_v10 = vcombine.high %v961_v5, %v965_v6  ;;  %v841_v11 = vld [vmem:[%s7594_s5 + $0x1140] sm:$0xff]  ;;  %5111 = vmatprep.subr.bf16.mxu0 %v6716_v9  ;;  %v6843_v16 = vcombine.low %v961_v5, %v965_v6 }
 0x12d   : > { %v845_v12 = vld [vmem:[%s7594_s5 + $0x1160] sm:$0xff]  ;;  %5112 = vmatpush1.bf16.msra.mxu0 %v6715_v15 }
 0x12e   : > { %v969_v13 = vld [vmem:[%s7594_s5 + $0x1540] sm:$0xff]  ;;  %v6724_v18 = vcombine.high %v841_v11, %v845_v12  ;;  %5152 = vmatprep.subr.bf16.mxu1 %v6844_v10  ;;  %v6723_v26 = vcombine.low %v841_v11, %v845_v12 }
 0x12f   : > { %v973_v14 = vld [vmem:[%s7594_s5 + $0x1560] sm:$0xff]  ;;  %5153 = vmatpush1.bf16.msra.mxu1 %v6843_v16 }
 0x130   : > { %v6852_v19 = vcombine.high %v969_v13, %v973_v14  ;;  %v849_v22 = vld [vmem:[%s7594_s5 + $0x1180] sm:$0xff]  ;;  %5113 = vmatprep.subr.bf16.mxu0 %v6724_v18  ;;  %v6851_v27 = vcombine.low %v969_v13, %v973_v14 }
 0x131   : > { %v853_v24 = vld [vmem:[%s7594_s5 + $0x11a0] sm:$0xff]  ;;  %5114 = vmatpush1.bf16.msra.mxu0 %v6723_v26 }
 0x132   : > { %v977_v25 = vld [vmem:[%s7594_s5 + $0x1580] sm:$0xff]  ;;  %v6732_v55 = vcombine.high %v849_v22, %v853_v24  ;;  %5154 = vmatprep.subr.bf16.mxu1 %v6852_v19  ;;  %v6731_v35 = vcombine.low %v849_v22, %v853_v24 }
 0x133   : > { %v981_v54 = vld [vmem:[%s7594_s5 + $0x15a0] sm:$0xff]  ;;  %5155 = vmatpush1.bf16.msra.mxu1 %v6851_v27 }
 0x134   : > { %v6860_v29 = vcombine.high %v977_v25, %v981_v54  ;;  %v857_v31 = vld [vmem:[%s7594_s5 + $0x11c0] sm:$0xff]  ;;  %5115 = vmatprep.subr.bf16.mxu0 %v6732_v55  ;;  %v6859_v36 = vcombine.low %v977_v25, %v981_v54 }
 0x135   : > { %v861_v32 = vld [vmem:[%s7594_s5 + $0x11e0] sm:$0xff]  ;;  %5116 = vmatpush1.bf16.msra.mxu0 %v6731_v35 }
 0x136   : > { %v985_v33 = vld [vmem:[%s7594_s5 + $0x15c0] sm:$0xff]  ;;  %v6740_v38 = vcombine.high %v857_v31, %v861_v32  ;;  %5156 = vmatprep.subr.bf16.mxu1 %v6860_v29  ;;  %v6739_v46 = vcombine.low %v857_v31, %v861_v32 }
 0x137   : > { %v989_v34 = vld [vmem:[%s7594_s5 + $0x15e0] sm:$0xff]  ;;  %5157 = vmatpush1.bf16.msra.mxu1 %v6859_v36 }
 0x138   : > { %v6868_v39 = vcombine.high %v985_v33, %v989_v34  ;;  %v865_v42 = vld [vmem:[%s7594_s5 + $0x1200] sm:$0xff]  ;;  %5117 = vmatprep.subr.bf16.mxu0 %v6740_v38  ;;  %v6867_v47 = vcombine.low %v985_v33, %v989_v34 }
 0x139   : > { %v869_v44 = vld [vmem:[%s7594_s5 + $0x1220] sm:$0xff]  ;;  %5118 = vmatpush1.bf16.msra.mxu0 %v6739_v46 }
 0x13a   : > { %v993_v45 = vld [vmem:[%s7594_s5 + $0x1600] sm:$0xff]  ;;  %v6748_v23 = vcombine.high %v865_v42, %v869_v44  ;;  %5158 = vmatprep.subr.bf16.mxu1 %v6868_v39  ;;  %v6747_v57 = vcombine.low %v865_v42, %v869_v44 }
 0x13b   : > { %v997_v20 = vld [vmem:[%s7594_s5 + $0x1620] sm:$0xff]  ;;  %5159 = vmatpush1.bf16.msra.mxu1 %v6867_v47 }
 0x13c   : > { %v6876_v49 = vcombine.high %v993_v45, %v997_v20  ;;  %v873_v51 = vld [vmem:[%s7594_s5 + $0x1240] sm:$0xff]  ;;  %5119 = vmatprep.subr.bf16.mxu0 %v6748_v23  ;;  %v6875_v58 = vcombine.low %v993_v45, %v997_v20 }
 0x13d   : > { %v877_v52 = vld [vmem:[%s7594_s5 + $0x1260] sm:$0xff]  ;;  %5120 = vmatpush1.bf16.msra.mxu0 %v6747_v57  ;;  %v290_v57 = vld [vmem:[%s7594_s5 + $0x8] sm:$0xff] }
 0x13e   : > { %v1001_v53 = vld [vmem:[%s7594_s5 + $0x1640] sm:$0xff]  ;;  %v6756_v61 = vcombine.high %v873_v51, %v877_v52  ;;  %5160 = vmatprep.subr.bf16.mxu1 %v6876_v49  ;;  %v6755_v3 = vcombine.low %v873_v51, %v877_v52 }
 0x13f   : > { %v1005_v56 = vld [vmem:[%s7594_s5 + $0x1660] sm:$0xff]  ;;  %5161 = vmatpush1.bf16.msra.mxu1 %v6875_v58  ;;  %v294_v58 = vld [vmem:[%s7594_s5 + $0x28] sm:$0xff] }
 0x140   : > { %v6884_v62 = vcombine.high %v1001_v53, %v1005_v56  ;;  %v881_v63 = vld [vmem:[%s7594_s5 + $0x1280] sm:$0xff]  ;;  %5121 = vmatprep.subr.bf16.mxu0 %v6756_v61  ;;  %v6883_v4 = vcombine.low %v1001_v53, %v1005_v56  ;;  %v418_v61 = vld [vmem:[%s7594_s5 + $0x408] sm:$0xff] }
 0x141   : > { %v885_v0 = vld [vmem:[%s7594_s5 + $0x12a0] sm:$0xff]  ;;  %5122 = vmatpush1.bf16.msra.mxu0 %v6755_v3  ;;  %v298_v3 = vld [vmem:[%s7594_s5 + $0x48] sm:$0xff] }
 0x142   : > { %v1009_v1 = vld [vmem:[%s7594_s5 + $0x1680] sm:$0xff]  ;;  %v6764_v5 = vcombine.high %v881_v63, %v885_v0  ;;  %5162 = vmatprep.subr.bf16.mxu1 %v6884_v62  ;;  %v6763_v11 = vcombine.low %v881_v63, %v885_v0  ;;  %v422_v62 = vld [vmem:[%s7594_s5 + $0x428] sm:$0xff] }
 0x143   : > { %v1013_v2 = vld [vmem:[%s7594_s5 + $0x16a0] sm:$0xff]  ;;  %5163 = vmatpush1.bf16.msra.mxu1 %v6883_v4  ;;  %v302_v4 = vld [vmem:[%s7594_s5 + $0x68] sm:$0xff] }
 0x144   : > { %v6892_v6 = vcombine.high %v1009_v1, %v1013_v2  ;;  %v889_v7 = vld [vmem:[%s7594_s5 + $0x12c0] sm:$0xff]  ;;  %5123 = vmatprep.subr.bf16.mxu0 %v6764_v5  ;;  %v6891_v12 = vcombine.low %v1009_v1, %v1013_v2  ;;  %v6174_v1 = vcombine.high %v290_v57, %v294_v58  ;;  %v6302_v2 = vcombine.high %v418_v61, %v422_v62 }
 0x145   : > { %v893_v8 = vld [vmem:[%s7594_s5 + $0x12e0] sm:$0xff]  ;;  %5124 = vmatpush1.bf16.msra.mxu0 %v6763_v11  ;;  %v7896_v5 = vcombine.low %v7811_v40, %v7811_v40  ;;  %v6182_v11 = vcombine.high %v298_v3, %v302_v4  ;;  %v310_v40 = vld [vmem:[%s7594_s5 + $0xa8] sm:$0xff] }
 0x146   : > { %v1017_v9 = vld [vmem:[%s7594_s5 + $0x16c0] sm:$0xff]  ;;  %v6772_v13 = vcombine.high %v889_v7, %v893_v8  ;;  %5164 = vmatprep.subr.bf16.mxu1 %v6892_v6  ;;  %v6771_v22 = vcombine.low %v889_v7, %v893_v8  ;;  %v426_v6 = vld [vmem:[%s7594_s5 + $0x448] sm:$0xff]  ;;  %v7902_v8 = vcombine.low %v7818_v43, %v7818_v43  ;;  %v6181_v43 = vcombine.low %v298_v3, %v302_v4 }
 0x147   : > { %v1021_v10 = vld [vmem:[%s7594_s5 + $0x16e0] sm:$0xff]  ;;  %5165 = vmatpush1.bf16.msra.mxu1 %v6891_v12  ;;  %v430_v7 = vld [vmem:[%s7594_s5 + $0x468] sm:$0xff] }
 0x148   : > { %v6900_v14 = vcombine.high %v1017_v9, %v1021_v10  ;;  %v897_v15 = vld [vmem:[%s7594_s5 + $0x1300] sm:$0xff]  ;;  %5125 = vmatprep.subr.bf16.mxu0 %v6772_v13  ;;  %v6899_v24 = vcombine.low %v1017_v9, %v1021_v10  ;;  %v6173_v9 = vcombine.low %v290_v57, %v294_v58  ;;  %v6301_v10 = vcombine.low %v418_v61, %v422_v62  ;;  %v306_v13 = vld [vmem:[%s7594_s5 + $0x88] sm:$0xff] }
 0x149   : > { %v901_v16 = vld [vmem:[%s7594_s5 + $0x1320] sm:$0xff]  ;;  %5126 = vmatpush1.bf16.msra.mxu0 %v6771_v22  ;;  %v6310_v12 = vcombine.high %v426_v6, %v430_v7  ;;  %v314_v22 = vld [vmem:[%s7594_s5 + $0xc8] sm:$0xff] }
 0x14a   : > { %v1025_v18 = vld [vmem:[%s7594_s5 + $0x1700] sm:$0xff]  ;;  %v6780_v25 = vcombine.high %v897_v15, %v901_v16  ;;  %5166 = vmatprep.subr.bf16.mxu1 %v6900_v14  ;;  %v6779_v31 = vcombine.low %v897_v15, %v901_v16  ;;  %v434_v14 = vld [vmem:[%s7594_s5 + $0x488] sm:$0xff]  ;;  %v6309_v16 = vcombine.low %v426_v6, %v430_v7 }
 0x14b   : > { %v1029_v19 = vld [vmem:[%s7594_s5 + $0x1720] sm:$0xff]  ;;  %5167 = vmatpush1.bf16.msra.mxu1 %v6899_v24  ;;  %v438_v15 = vld [vmem:[%s7594_s5 + $0x4a8] sm:$0xff] }
 0x14c   : > { %v6908_v54 = vcombine.high %v1025_v18, %v1029_v19  ;;  %v905_v26 = vld [vmem:[%s7594_s5 + $0x1340] sm:$0xff]  ;;  %5127 = vmatprep.subr.bf16.mxu0 %v6780_v25  ;;  %v6907_v32 = vcombine.low %v1025_v18, %v1029_v19  ;;  %v6190_v18 = vcombine.high %v306_v13, %v310_v40  ;;  %v6318_v19 = vcombine.high %v434_v14, %v438_v15  ;;  %v318_v24 = vld [vmem:[%s7594_s5 + $0xe8] sm:$0xff] }
 0x14d   : > { %v909_v27 = vld [vmem:[%s7594_s5 + $0x1360] sm:$0xff]  ;;  %5128 = vmatpush1.bf16.msra.mxu0 %v6779_v31  ;;  %v442_v25 = vld [vmem:[%s7594_s5 + $0x4c8] sm:$0xff] }
 0x14e   : > { %v1033_v55 = vld [vmem:[%s7594_s5 + $0x1740] sm:$0xff]  ;;  %v6788_v33 = vcombine.high %v905_v26, %v909_v27  ;;  %5168 = vmatprep.subr.bf16.mxu1 %v6908_v54  ;;  %v6787_v42 = vcombine.low %v905_v26, %v909_v27  ;;  %v446_v54 = vld [vmem:[%s7594_s5 + $0x4e8] sm:$0xff]  ;;  %v6189_v26 = vcombine.low %v306_v13, %v310_v40  ;;  %v6317_v27 = vcombine.low %v434_v14, %v438_v15 }
 0x14f   : > { %v1037_v29 = vld [vmem:[%s7594_s5 + $0x1760] sm:$0xff]  ;;  %5169 = vmatpush1.bf16.msra.mxu1 %v6907_v32  ;;  %v322_v31 = vld [vmem:[%s7594_s5 + $0x108] sm:$0xff] }
 0x150   : > { %v6916_v34 = vcombine.high %v1033_v55, %v1037_v29  ;;  %v913_v35 = vld [vmem:[%s7594_s5 + $0x1380] sm:$0xff]  ;;  %5129 = vmatprep.subr.bf16.mxu0 %v6788_v33  ;;  %v6915_v44 = vcombine.low %v1033_v55, %v1037_v29  ;;  %v6198_v55 = vcombine.high %v314_v22, %v318_v24  ;;  %v6326_v29 = vcombine.high %v442_v25, %v446_v54  ;;  %v326_v32 = vld [vmem:[%s7594_s5 + $0x128] sm:$0xff] }
 0x151   : > { %v917_v36 = vld [vmem:[%s7594_s5 + $0x13a0] sm:$0xff]  ;;  %5130 = vmatpush1.bf16.msra.mxu0 %v6787_v42  ;;  %v450_v33 = vld [vmem:[%s7594_s5 + $0x508] sm:$0xff] }
 0x152   : > { %v1041_v38 = vld [vmem:[%s7594_s5 + $0x1780] sm:$0xff]  ;;  %v6796_v45 = vcombine.high %v913_v35, %v917_v36  ;;  %5170 = vmatprep.subr.bf16.mxu1 %v6916_v34  ;;  %v6795_v51 = vcombine.low %v913_v35, %v917_v36  ;;  %v454_v34 = vld [vmem:[%s7594_s5 + $0x528] sm:$0xff]  ;;  %v6197_v35 = vcombine.low %v314_v22, %v318_v24  ;;  %v6325_v36 = vcombine.low %v442_v25, %v446_v54 }
 0x153   : > { %v1045_v39 = vld [vmem:[%s7594_s5 + $0x17a0] sm:$0xff]  ;;  %5171 = vmatpush1.bf16.msra.mxu1 %v6915_v44  ;;  %v330_v42 = vld [vmem:[%s7594_s5 + $0x148] sm:$0xff] }
 0x154   : > { %v6924_v20 = vcombine.high %v1041_v38, %v1045_v39  ;;  %v921_v46 = vld [vmem:[%s7594_s5 + $0x13c0] sm:$0xff]  ;;  %5131 = vmatprep.subr.bf16.mxu0 %v6796_v45  ;;  %v6923_v52 = vcombine.low %v1041_v38, %v1045_v39  ;;  %v6206_v38 = vcombine.high %v322_v31, %v326_v32  ;;  %v6334_v39 = vcombine.high %v450_v33, %v454_v34  ;;  %v334_v44 = vld [vmem:[%s7594_s5 + $0x168] sm:$0xff] }
 0x155   : > { %v925_v47 = vld [vmem:[%s7594_s5 + $0x13e0] sm:$0xff]  ;;  %5132 = vmatpush1.bf16.msra.mxu0 %v6795_v51  ;;  %v458_v45 = vld [vmem:[%s7594_s5 + $0x548] sm:$0xff]  ;;  %v6213_v57 = vcombine.low %v330_v42, %v334_v44 }
 0x156   : > { %v1049_v23 = vld [vmem:[%s7594_s5 + $0x17c0] sm:$0xff]  ;;  %v6804_v53 = vcombine.high %v921_v46, %v925_v47  ;;  %5172 = vmatprep.subr.bf16.mxu1 %v6924_v20  ;;  %v6803_v63 = vcombine.low %v921_v46, %v925_v47  ;;  %v462_v20 = vld [vmem:[%s7594_s5 + $0x568] sm:$0xff]  ;;  %v6205_v46 = vcombine.low %v322_v31, %v326_v32  ;;  %v6333_v47 = vcombine.low %v450_v33, %v454_v34 }
 0x157   : > { %v1053_v49 = vld [vmem:[%s7594_s5 + $0x17e0] sm:$0xff]  ;;  %5173 = vmatpush1.bf16.msra.mxu1 %v6923_v52  ;;  %v338_v51 = vld [vmem:[%s7594_s5 + $0x188] sm:$0xff]  ;;  %v6341_v58 = vcombine.low %v458_v45, %v462_v20 }
 0x158   : > { %v6932_v56 = vcombine.high %v1049_v23, %v1053_v49  ;;  %5133 = vmatprep.subr.bf16.mxu0 %v6804_v53  ;;  %v6931_v0 = vcombine.low %v1049_v23, %v1053_v49  ;;  %v6214_v23 = vcombine.high %v330_v42, %v334_v44  ;;  %v6342_v49 = vcombine.high %v458_v45, %v462_v20  ;;  %v342_v52 = vld [vmem:[%s7594_s5 + $0x1a8] sm:$0xff] }
 0x159   : > { %5134 = vmatpush1.bf16.msra.mxu0 %v6803_v63  ;;  %v466_v53 = vld [vmem:[%s7594_s5 + $0x588] sm:$0xff]  ;;  %v6222_v61 = vcombine.high %v338_v51, %v342_v52  ;;  %v6221_v3 = vcombine.low %v338_v51, %v342_v52 }
 0x15a   : > { %5174 = vmatprep.subr.bf16.mxu1 %v6932_v56  ;;  %5185 = vmatprep.subr.bf16.mxu0 %v6174_v1  ;;  %v470_v56 = vld [vmem:[%s7594_s5 + $0x5a8] sm:$0xff] }
 0x15b   : > { %5175 = vmatpush1.bf16.msra.mxu1 %v6931_v0  ;;  %v6350_v62 = vcombine.high %v466_v53, %v470_v56  ;;  %v346_v63 = vld [vmem:[%s7594_s5 + $0x1c8] sm:$0xff]  ;;  %v6349_v4 = vcombine.low %v466_v53, %v470_v56 }
 0x15c   : > { %5226 = vmatprep.subr.bf16.mxu1 %v6302_v2  ;;  %5136 = vmatmul.mubr.bf16.vlgmr.msra.gmra.mrb[8].mxu0 %v7896_v5  ;;  %v350_v0 = vld [vmem:[%s7594_s5 + $0x1e8] sm:$0xff] }
 0x15d   : > { %5186 = vmatpush1.bf16.msra.mxu0 %v6173_v9  ;;  %5217 = vmatprep.mubr.bf16.mxu0 %v7666_v59  ;;  %v474_v1 = vld [vmem:[%s7594_s5 + $0x5c8] sm:$0xff]  ;;  %v6230_v6 = vcombine.high %v346_v63, %v350_v0  ;;  %v6229_v13 = vcombine.low %v346_v63, %v350_v0 }
 0x15e   : > { %5177 = vmatmul.mubr.bf16.vlgmr.msra.gmra.mrb[8].mxu1 %v7902_v8  ;;  %5187 = vmatprep.subr.bf16.mxu0 %v6182_v11  ;;  %v478_v2 = vld [vmem:[%s7594_s5 + $0x5e8] sm:$0xff] }
 0x15f   : > { %5227 = vmatpush1.bf16.msra.mxu1 %v6301_v10  ;;  %5258 = vmatprep.mubr.bf16.mxu1 %v7670_v60  ;;  %v6358_v7 = vcombine.high %v474_v1, %v478_v2  ;;  %v354_v9 = vld [vmem:[%s7594_s5 + $0x208] sm:$0xff]  ;;  %v6357_v40 = vcombine.low %v474_v1, %v478_v2 }
 0x160   : > { %5228 = vmatprep.subr.bf16.mxu1 %v6310_v12  ;;  %v358_v10 = vld [vmem:[%s7594_s5 + $0x228] sm:$0xff] }
 0x161   : > { %5188 = vmatpush1.bf16.msra.mxu0 %v6181_v43  ;;  %v482_v11 = vld [vmem:[%s7594_s5 + $0x608] sm:$0xff]  ;;  %v6238_v14 = vcombine.high %v354_v9, %v358_v10  ;;  %v6237_v22 = vcombine.low %v354_v9, %v358_v10 }
 0x162   : > { %5189 = vmatprep.subr.bf16.mxu0 %v6190_v18  ;;  %v486_v12 = vld [vmem:[%s7594_s5 + $0x628] sm:$0xff] }
 0x163   : > { %5229 = vmatpush1.bf16.msra.mxu1 %v6309_v16  ;;  %v6366_v15 = vcombine.high %v482_v11, %v486_v12  ;;  %v362_v43 = vld [vmem:[%s7594_s5 + $0x248] sm:$0xff]  ;;  %v6365_v24 = vcombine.low %v482_v11, %v486_v12 }
 0x164   : > { %5230 = vmatprep.subr.bf16.mxu1 %v6318_v19  ;;  %v366_v16 = vld [vmem:[%s7594_s5 + $0x268] sm:$0xff] }
 0x165   : > { %5190 = vmatpush1.bf16.msra.mxu0 %v6189_v26  ;;  %v490_v18 = vld [vmem:[%s7594_s5 + $0x648] sm:$0xff]  ;;  %v6246_v25 = vcombine.high %v362_v43, %v366_v16  ;;  %v6245_v31 = vcombine.low %v362_v43, %v366_v16 }
 0x166   : > { %5191 = vmatprep.subr.bf16.mxu0 %v6198_v55  ;;  %v494_v19 = vld [vmem:[%s7594_s5 + $0x668] sm:$0xff] }
 0x167   : > { %5231 = vmatpush1.bf16.msra.mxu1 %v6317_v27  ;;  %v6374_v54 = vcombine.high %v490_v18, %v494_v19  ;;  %v370_v26 = vld [vmem:[%s7594_s5 + $0x288] sm:$0xff]  ;;  %v6373_v32 = vcombine.low %v490_v18, %v494_v19 }
 0x168   : > { %5232 = vmatprep.subr.bf16.mxu1 %v6326_v29  ;;  %v374_v27 = vld [vmem:[%s7594_s5 + $0x2a8] sm:$0xff] }
 0x169   : > { %5192 = vmatpush1.bf16.msra.mxu0 %v6197_v35  ;;  %v498_v55 = vld [vmem:[%s7594_s5 + $0x688] sm:$0xff]  ;;  %v6254_v33 = vcombine.high %v370_v26, %v374_v27  ;;  %v6253_v42 = vcombine.low %v370_v26, %v374_v27 }
 0x16a   : > { %5193 = vmatprep.subr.bf16.mxu0 %v6206_v38  ;;  %v502_v29 = vld [vmem:[%s7594_s5 + $0x6a8] sm:$0xff] }
 0x16b   : > { %5233 = vmatpush1.bf16.msra.mxu1 %v6325_v36  ;;  %v6382_v34 = vcombine.high %v498_v55, %v502_v29  ;;  %v378_v35 = vld [vmem:[%s7594_s5 + $0x2c8] sm:$0xff]  ;;  %v6381_v44 = vcombine.low %v498_v55, %v502_v29 }
 0x16c   : > { %5234 = vmatprep.subr.bf16.mxu1 %v6334_v39  ;;  %v382_v36 = vld [vmem:[%s7594_s5 + $0x2e8] sm:$0xff] }
 0x16d   : > { %5194 = vmatpush1.bf16.msra.mxu0 %v6205_v46  ;;  %v506_v38 = vld [vmem:[%s7594_s5 + $0x6c8] sm:$0xff]  ;;  %v6262_v45 = vcombine.high %v378_v35, %v382_v36  ;;  %v6261_v51 = vcombine.low %v378_v35, %v382_v36 }
 0x16e   : > { %5195 = vmatprep.subr.bf16.mxu0 %v6214_v23  ;;  %v510_v39 = vld [vmem:[%s7594_s5 + $0x6e8] sm:$0xff] }
 0x16f   : > { %5235 = vmatpush1.bf16.msra.mxu1 %v6333_v47  ;;  %v6390_v20 = vcombine.high %v506_v38, %v510_v39  ;;  %v386_v46 = vld [vmem:[%s7594_s5 + $0x308] sm:$0xff]  ;;  %v6389_v52 = vcombine.low %v506_v38, %v510_v39 }
 0x170   : > { %5236 = vmatprep.subr.bf16.mxu1 %v6342_v49  ;;  %v390_v47 = vld [vmem:[%s7594_s5 + $0x328] sm:$0xff] }
 0x171   : > { %5196 = vmatpush1.bf16.msra.mxu0 %v6213_v57  ;;  %v514_v23 = vld [vmem:[%s7594_s5 + $0x708] sm:$0xff]  ;;  %v6270_v53 = vcombine.high %v386_v46, %v390_v47  ;;  %v6269_v63 = vcombine.low %v386_v46, %v390_v47 }
 0x172   : > { %5197 = vmatprep.subr.bf16.mxu0 %v6222_v61  ;;  %v518_v49 = vld [vmem:[%s7594_s5 + $0x728] sm:$0xff] }
 0x173   : > { %5237 = vmatpush1.bf16.msra.mxu1 %v6341_v58  ;;  %v6398_v56 = vcombine.high %v514_v23, %v518_v49  ;;  %v394_v57 = vld [vmem:[%s7594_s5 + $0x348] sm:$0xff]  ;;  %v6397_v0 = vcombine.low %v514_v23, %v518_v49 }
 0x174   : > { %5238 = vmatprep.subr.bf16.mxu1 %v6350_v62  ;;  %v398_v58 = vld [vmem:[%s7594_s5 + $0x368] sm:$0xff] }
 0x175   : > { %5198 = vmatpush1.bf16.msra.mxu0 %v6221_v3  ;;  %v522_v61 = vld [vmem:[%s7594_s5 + $0x748] sm:$0xff]  ;;  %v6278_v1 = vcombine.high %v394_v57, %v398_v58  ;;  %v6277_v9 = vcombine.low %v394_v57, %v398_v58 }
 0x176   : > { %5199 = vmatprep.subr.bf16.mxu0 %v6230_v6  ;;  %v526_v62 = vld [vmem:[%s7594_s5 + $0x768] sm:$0xff] }
 0x177   : > { %5239 = vmatpush1.bf16.msra.mxu1 %v6349_v4  ;;  %v6406_v2 = vcombine.high %v522_v61, %v526_v62  ;;  %v402_v3 = vld [vmem:[%s7594_s5 + $0x388] sm:$0xff]  ;;  %v6405_v10 = vcombine.low %v522_v61, %v526_v62 }
 0x178   : > { %5240 = vmatprep.subr.bf16.mxu1 %v6358_v7  ;;  %v406_v4 = vld [vmem:[%s7594_s5 + $0x3a8] sm:$0xff] }
 0x179   : > { %5200 = vmatpush1.bf16.msra.mxu0 %v6229_v13  ;;  %v530_v6 = vld [vmem:[%s7594_s5 + $0x788] sm:$0xff]  ;;  %v6286_v11 = vcombine.high %v402_v3, %v406_v4  ;;  %v6285_v43 = vcombine.low %v402_v3, %v406_v4 }
 0x17a   : > { %5201 = vmatprep.subr.bf16.mxu0 %v6238_v14  ;;  %v534_v7 = vld [vmem:[%s7594_s5 + $0x7a8] sm:$0xff] }
 0x17b   : > { %5241 = vmatpush1.bf16.msra.mxu1 %v6357_v40  ;;  %v6414_v12 = vcombine.high %v530_v6, %v534_v7  ;;  %v410_v13 = vld [vmem:[%s7594_s5 + $0x3c8] sm:$0xff]  ;;  %v6413_v16 = vcombine.low %v530_v6, %v534_v7 }
 0x17c   : > { %5242 = vmatprep.subr.bf16.mxu1 %v6366_v15  ;;  %v414_v40 = vld [vmem:[%s7594_s5 + $0x3e8] sm:$0xff] }
 0x17d   : > { %5202 = vmatpush1.bf16.msra.mxu0 %v6237_v22  ;;  %v538_v14 = vld [vmem:[%s7594_s5 + $0x7c8] sm:$0xff]  ;;  %v6294_v18 = vcombine.high %v410_v13, %v414_v40  ;;  %v6293_v26 = vcombine.low %v410_v13, %v414_v40 }
 0x17e   : > { %5203 = vmatprep.subr.bf16.mxu0 %v6246_v25  ;;  %v542_v15 = vld [vmem:[%s7594_s5 + $0x7e8] sm:$0xff] }
 0x17f   : > { %5243 = vmatpush1.bf16.msra.mxu1 %v6365_v24  ;;  %v6422_v19 = vcombine.high %v538_v14, %v542_v15  ;;  %v546_v22 = vld [vmem:[%s7594_s5 + $0x808] sm:$0xff]  ;;  %v6421_v27 = vcombine.low %v538_v14, %v542_v15 }
 0x180   : > { %5244 = vmatprep.subr.bf16.mxu1 %v6374_v54  ;;  %v550_v24 = vld [vmem:[%s7594_s5 + $0x828] sm:$0xff] }
 0x181   : > { %5204 = vmatpush1.bf16.msra.mxu0 %v6245_v31  ;;  %v674_v25 = vld [vmem:[%s7594_s5 + $0xc08] sm:$0xff]  ;;  %v6430_v55 = vcombine.high %v546_v22, %v550_v24  ;;  %v6429_v35 = vcombine.low %v546_v22, %v550_v24 }
 0x182   : > { %5205 = vmatprep.subr.bf16.mxu0 %v6254_v33  ;;  %v678_v54 = vld [vmem:[%s7594_s5 + $0xc28] sm:$0xff] }
 0x183   : > { %5245 = vmatpush1.bf16.msra.mxu1 %v6373_v32  ;;  %v6558_v29 = vcombine.high %v674_v25, %v678_v54  ;;  %v554_v31 = vld [vmem:[%s7594_s5 + $0x848] sm:$0xff]  ;;  %v6557_v36 = vcombine.low %v674_v25, %v678_v54 }
 0x184   : > { %5246 = vmatprep.subr.bf16.mxu1 %v6382_v34  ;;  %v558_v32 = vld [vmem:[%s7594_s5 + $0x868] sm:$0xff] }
 0x185   : > { %5206 = vmatpush1.bf16.msra.mxu0 %v6253_v42  ;;  %v682_v33 = vld [vmem:[%s7594_s5 + $0xc48] sm:$0xff]  ;;  %v6438_v38 = vcombine.high %v554_v31, %v558_v32  ;;  %v6437_v46 = vcombine.low %v554_v31, %v558_v32 }
 0x186   : > { %5207 = vmatprep.subr.bf16.mxu0 %v6262_v45  ;;  %v686_v34 = vld [vmem:[%s7594_s5 + $0xc68] sm:$0xff] }
 0x187   : > { %5247 = vmatpush1.bf16.msra.mxu1 %v6381_v44  ;;  %v6566_v39 = vcombine.high %v682_v33, %v686_v34  ;;  %v562_v42 = vld [vmem:[%s7594_s5 + $0x888] sm:$0xff]  ;;  %v6565_v47 = vcombine.low %v682_v33, %v686_v34 }
 0x188   : > { %5248 = vmatprep.subr.bf16.mxu1 %v6390_v20  ;;  %v566_v44 = vld [vmem:[%s7594_s5 + $0x8a8] sm:$0xff] }
 0x189   : > { %5208 = vmatpush1.bf16.msra.mxu0 %v6261_v51  ;;  %v690_v45 = vld [vmem:[%s7594_s5 + $0xc88] sm:$0xff]  ;;  %v6446_v23 = vcombine.high %v562_v42, %v566_v44  ;;  %v6445_v57 = vcombine.low %v562_v42, %v566_v44 }
 0x18a   : > { %5209 = vmatprep.subr.bf16.mxu0 %v6270_v53  ;;  %v694_v20 = vld [vmem:[%s7594_s5 + $0xca8] sm:$0xff] }
 0x18b   : > { %5249 = vmatpush1.bf16.msra.mxu1 %v6389_v52  ;;  %v6574_v49 = vcombine.high %v690_v45, %v694_v20  ;;  %v570_v51 = vld [vmem:[%s7594_s5 + $0x8c8] sm:$0xff]  ;;  %v6573_v58 = vcombine.low %v690_v45, %v694_v20 }
 0x18c   : > { %5250 = vmatprep.subr.bf16.mxu1 %v6398_v56  ;;  %v574_v52 = vld [vmem:[%s7594_s5 + $0x8e8] sm:$0xff] }
 0x18d   : > { %5210 = vmatpush1.bf16.msra.mxu0 %v6269_v63  ;;  %v698_v53 = vld [vmem:[%s7594_s5 + $0xcc8] sm:$0xff]  ;;  %v6454_v61 = vcombine.high %v570_v51, %v574_v52  ;;  %v6453_v3 = vcombine.low %v570_v51, %v574_v52 }
 0x18e   : > { %5211 = vmatprep.subr.bf16.mxu0 %v6278_v1  ;;  %v702_v56 = vld [vmem:[%s7594_s5 + $0xce8] sm:$0xff] }
 0x18f   : > { %5251 = vmatpush1.bf16.msra.mxu1 %v6397_v0  ;;  %v6582_v62 = vcombine.high %v698_v53, %v702_v56  ;;  %v578_v63 = vld [vmem:[%s7594_s5 + $0x908] sm:$0xff]  ;;  %v6581_v4 = vcombine.low %v698_v53, %v702_v56 }
 0x190   : > { %5252 = vmatprep.subr.bf16.mxu1 %v6406_v2  ;;  %v582_v0 = vld [vmem:[%s7594_s5 + $0x928] sm:$0xff] }
 0x191   : > { %5212 = vmatpush1.bf16.msra.mxu0 %v6277_v9  ;;  %v706_v1 = vld [vmem:[%s7594_s5 + $0xd08] sm:$0xff]  ;;  %v6462_v6 = vcombine.high %v578_v63, %v582_v0  ;;  %v6461_v13 = vcombine.low %v578_v63, %v582_v0 }
 0x192   : > { %5213 = vmatprep.subr.bf16.mxu0 %v6286_v11  ;;  %v710_v2 = vld [vmem:[%s7594_s5 + $0xd28] sm:$0xff] }
 0x193   : > { %5253 = vmatpush1.bf16.msra.mxu1 %v6405_v10  ;;  %v6590_v7 = vcombine.high %v706_v1, %v710_v2  ;;  %v586_v9 = vld [vmem:[%s7594_s5 + $0x948] sm:$0xff]  ;;  %v6589_v40 = vcombine.low %v706_v1, %v710_v2 }
 0x194   : > { %5254 = vmatprep.subr.bf16.mxu1 %v6414_v12  ;;  %v590_v10 = vld [vmem:[%s7594_s5 + $0x968] sm:$0xff] }
 0x195   : > { %5214 = vmatpush1.bf16.msra.mxu0 %v6285_v43  ;;  %v714_v11 = vld [vmem:[%s7594_s5 + $0xd48] sm:$0xff]  ;;  %v6470_v14 = vcombine.high %v586_v9, %v590_v10  ;;  %v6469_v22 = vcombine.low %v586_v9, %v590_v10 }
 0x196   : > { %5215 = vmatprep.subr.bf16.mxu0 %v6294_v18  ;;  %v718_v12 = vld [vmem:[%s7594_s5 + $0xd68] sm:$0xff] }
 0x197   : > { %5255 = vmatpush1.bf16.msra.mxu1 %v6413_v16  ;;  %v6598_v15 = vcombine.high %v714_v11, %v718_v12  ;;  %v594_v43 = vld [vmem:[%s7594_s5 + $0x988] sm:$0xff]  ;;  %v6597_v24 = vcombine.low %v714_v11, %v718_v12 }
 0x198   : > { %5256 = vmatprep.subr.bf16.mxu1 %v6422_v19  ;;  %v598_v16 = vld [vmem:[%s7594_s5 + $0x9a8] sm:$0xff] }
 0x199   : > { %5216 = vmatpush1.bf16.msra.mxu0 %v6293_v26  ;;  %v722_v18 = vld [vmem:[%s7594_s5 + $0xd88] sm:$0xff]  ;;  %v6478_v25 = vcombine.high %v594_v43, %v598_v16 }
 0x19a   : > { %5267 = vmatprep.subr.bf16.mxu0 %v6430_v55  ;;  %v726_v19 = vld [vmem:[%s7594_s5 + $0xda8] sm:$0xff] }
 0x19b   : > { %5257 = vmatpush1.bf16.msra.mxu1 %v6421_v27  ;;  %v6606_v26 = vcombine.high %v722_v18, %v726_v19  ;;  %v602_v27 = vld [vmem:[%s7594_s5 + $0x9c8] sm:$0xff]  ;;  %v6605_v45 = vcombine.low %v722_v18, %v726_v19 }
 0x19c   : > { %5308 = vmatprep.subr.bf16.mxu1 %v6558_v29  ;;  %5218 = vmatmul.mubr.bf16.vlgmr.msra.gmra.mrb[12].mxu0 %v7716_v17  ;;  %v606_v55 = vld [vmem:[%s7594_s5 + $0x9e8] sm:$0xff] }
 0x19d   : > { %5268 = vmatpush1.bf16.msra.mxu0 %v6429_v35  ;;  %5299 = vmatprep.mubr.bf16.mxu0 %v7734_v28  ;;  %v730_v32 = vld [vmem:[%s7594_s5 + $0xdc8] sm:$0xff]  ;;  %v6486_v20 = vcombine.high %v602_v27, %v606_v55  ;;  %v6485_v53 = vcombine.low %v602_v27, %v606_v55 }
 0x19e   : > { %5259 = vmatmul.mubr.bf16.vlgmr.msra.gmra.mrb[12].mxu1 %v7725_v21  ;;  %5269 = vmatprep.subr.bf16.mxu0 %v6438_v38  ;;  %v734_v33 = vld [vmem:[%s7594_s5 + $0xde8] sm:$0xff]  ;;  %v6477_v38 = vcombine.low %v594_v43, %v598_v16 }
 0x19f   : > { %5309 = vmatpush1.bf16.msra.mxu1 %v6557_v36  ;;  %5340 = vmatprep.mubr.bf16.mxu1 %v7741_v30  ;;  %v738_v51 = vld [vmem:[%s7594_s5 + $0xe08] sm:$0xff]  ;;  %v6613_v56 = vcombine.low %v730_v32, %v734_v33 }
 0x1a0   : > { %5310 = vmatprep.subr.bf16.mxu1 %v6566_v39  ;;  %v742_v52 = vld [vmem:[%s7594_s5 + $0xe28] sm:$0xff] }
 0x1a1   : > { %5270 = vmatpush1.bf16.msra.mxu0 %v6437_v46  ;;  %v746_v63 = vld [vmem:[%s7594_s5 + $0xe48] sm:$0xff]  ;;  %v6621_v2 = vcombine.low %v738_v51, %v742_v52 }
 0x1a2   : > { %5271 = vmatprep.subr.bf16.mxu0 %v6446_v23  ;;  %v610_v23 = vld [vmem:[%s7594_s5 + $0xa08] sm:$0xff] }
 0x1a3   : > { %5311 = vmatpush1.bf16.msra.mxu1 %v6565_v47  ;;  %v6614_v47 = vcombine.high %v730_v32, %v734_v33  ;;  %v750_v0 = vld [vmem:[%s7594_s5 + $0xe68] sm:$0xff] }
 0x1a4   : > { %5312 = vmatprep.subr.bf16.mxu1 %v6574_v49  ;;  %v614_v49 = vld [vmem:[%s7594_s5 + $0xa28] sm:$0xff]  ;;  %v6629_v12 = vcombine.low %v746_v63, %v750_v0 }
 0x1a5   : > { %5272 = vmatpush1.bf16.msra.mxu0 %v6445_v57  ;;  %v6494_v57 = vcombine.high %v610_v23, %v614_v49  ;;  %v6493_v1 = vcombine.low %v610_v23, %v614_v49  ;;  %v754_v9 = vld [vmem:[%s7594_s5 + $0xe88] sm:$0xff] }
 0x1a6   : > { %5273 = vmatprep.subr.bf16.mxu0 %v6454_v61  ;;  %v618_v61 = vld [vmem:[%s7594_s5 + $0xa48] sm:$0xff] }
 0x1a7   : > { %5313 = vmatpush1.bf16.msra.mxu1 %v6573_v58  ;;  %v6622_v58 = vcombine.high %v738_v51, %v742_v52  ;;  %v758_v10 = vld [vmem:[%s7594_s5 + $0xea8] sm:$0xff] }
 0x1a8   : > { %5314 = vmatprep.subr.bf16.mxu1 %v6582_v62  ;;  %v622_v62 = vld [vmem:[%s7594_s5 + $0xa68] sm:$0xff]  ;;  %v6637_v19 = vcombine.low %v754_v9, %v758_v10 }
 0x1a9   : > { %5274 = vmatpush1.bf16.msra.mxu0 %v6453_v3  ;;  %v6502_v3 = vcombine.high %v618_v61, %v622_v62  ;;  %v6501_v11 = vcombine.low %v618_v61, %v622_v62  ;;  %v762_v43 = vld [vmem:[%s7594_s5 + $0xec8] sm:$0xff] }
 0x1aa   : > { %5275 = vmatprep.subr.bf16.mxu0 %v6462_v6  ;;  %v626_v6 = vld [vmem:[%s7594_s5 + $0xa88] sm:$0xff] }
 0x1ab   : > { %5315 = vmatpush1.bf16.msra.mxu1 %v6581_v4  ;;  %v6630_v4 = vcombine.high %v746_v63, %v750_v0  ;;  %v766_v16 = vld [vmem:[%s7594_s5 + $0xee8] sm:$0xff] }
 0x1ac   : > { %5316 = vmatprep.subr.bf16.mxu1 %v6590_v7  ;;  %v630_v7 = vld [vmem:[%s7594_s5 + $0xaa8] sm:$0xff] }
 0x1ad   : > { %5276 = vmatpush1.bf16.msra.mxu0 %v6461_v13  ;;  %v6510_v13 = vcombine.high %v626_v6, %v630_v7  ;;  %v6509_v18 = vcombine.low %v626_v6, %v630_v7  ;;  %v774_v27 = vld [vmem:[%s7594_s5 + $0xf28] sm:$0xff] }
 0x1ae   : > { %5277 = vmatprep.subr.bf16.mxu0 %v6470_v14  ;;  %v4973_v54 = vpop.f32.mrb[0].mxu0  ;;  %v634_v14 = vld [vmem:[%s7594_s5 + $0xac8] sm:$0xff] }
 0x1af   : > { %5317 = vmatpush1.bf16.msra.mxu1 %v6589_v40  ;;  %v4975_v31 = vpop.f32.mrb[1].mxu0  ;;  %v6638_v40 = vcombine.high %v754_v9, %v758_v10  ;;  %v650_v33 = vld [vmem:[%s7594_s5 + $0xb48] sm:$0xff] }
 0x1b0   : > { %5318 = vmatprep.subr.bf16.mxu1 %v6598_v15  ;;  %v5014_v29 = vpop.f32.mrb[0].mxu1  ;;  %v4977_v36 = vpop.f32.mrb[2].mxu0  ;;  %v638_v15 = vld [vmem:[%s7594_s5 + $0xae8] sm:$0xff] }
 0x1b1   : > { %v8000_v34 = vadd.f32 %v5014_v29, %v4973_v54  ;;  %v5016_v35 = vpop.f32.mrb[1].mxu1  ;;  %5278 = vmatpush1.bf16.msra.mxu0 %v6469_v22  ;;  %v4978_v44 = vpop.f32.mrb[3].mxu0  ;;  %v6518_v22 = vcombine.high %v634_v14, %v638_v15  ;;  %v646_v54 = vld [vmem:[%s7594_s5 + $0xb28] sm:$0xff]  ;;  %v6517_v55 = vcombine.low %v634_v14, %v638_v15  ;;  %v6645_v29 = vcombine.low %v762_v43, %v766_v16 }
 0x1b2   : > { %v8002_v39 = vadd.f32 %v5016_v35, %v4975_v31  ;;  %v5018_v42 = vpop.f32.mrb[2].mxu1  ;;  %5279 = vmatprep.subr.bf16.mxu0 %v6478_v25  ;;  %v642_v25 = vld [vmem:[%s7594_s5 + $0xb08] sm:$0xff] }
 0x1b3   : > { %5319 = vmatpush1.bf16.msra.mxu1 %v6597_v24  ;;  %v5019_v46 = vpop.f32.mrb[3].mxu1  ;;  %v6646_v24 = vcombine.high %v762_v43, %v766_v16  ;;  %v6526_v31 = vcombine.high %v642_v25, %v646_v54  ;;  %v654_v35 = vld [vmem:[%s7594_s5 + $0xb68] sm:$0xff]  ;;  %v6525_v42 = vcombine.low %v642_v25, %v646_v54 }
 0x1b4   : > { %5320 = vmatprep.subr.bf16.mxu1 %v6606_v26  ;;  %v770_v26 = vld [vmem:[%s7594_s5 + $0xf08] sm:$0xff]  ;;  %v6533_v51 = vcombine.low %v650_v33, %v654_v35 }
 0x1b5   : > { %5280 = vmatpush1.bf16.msra.mxu0 %v6477_v38  ;;  %v6654_v32 = vcombine.high %v770_v26, %v774_v27  ;;  %v778_v36 = vld [vmem:[%s7594_s5 + $0xf48] sm:$0xff]  ;;  %v6653_v44 = vcombine.low %v770_v26, %v774_v27 }
 0x1b6   : > { %5281 = vmatprep.subr.bf16.mxu0 %v6486_v20  ;;  %v782_v38 = vld [vmem:[%s7594_s5 + $0xf68] sm:$0xff] }
 0x1b7   : > { %5321 = vmatpush1.bf16.msra.mxu1 %v6605_v45  ;;  %v6534_v45 = vcombine.high %v650_v33, %v654_v35  ;;  %v6662_v20 = vcombine.high %v778_v36, %v782_v38  ;;  %v658_v46 = vld [vmem:[%s7594_s5 + $0xb88] sm:$0xff]  ;;  %v6661_v52 = vcombine.low %v778_v36, %v782_v38 }
 0x1b8   : > { %5322 = vmatprep.subr.bf16.mxu1 %v6614_v47  ;;  %v662_v47 = vld [vmem:[%s7594_s5 + $0xba8] sm:$0xff] }
 0x1b9   : > { %5282 = vmatpush1.bf16.msra.mxu0 %v6485_v53  ;;  %v786_v23 = vld [vmem:[%s7594_s5 + $0xf88] sm:$0xff]  ;;  %v6542_v53 = vcombine.high %v658_v46, %v662_v47  ;;  %v6541_v63 = vcombine.low %v658_v46, %v662_v47 }
 0x1ba   : > { %5283 = vmatprep.subr.bf16.mxu0 %v6494_v57  ;;  %v790_v49 = vld [vmem:[%s7594_s5 + $0xfa8] sm:$0xff] }
 0x1bb   : > { %5323 = vmatpush1.bf16.msra.mxu1 %v6613_v56  ;;  %v6670_v56 = vcombine.high %v786_v23, %v790_v49  ;;  %v666_v57 = vld [vmem:[%s7594_s5 + $0xbc8] sm:$0xff]  ;;  %v6669_v0 = vcombine.low %v786_v23, %v790_v49 }
 0x1bc   : > { %5324 = vmatprep.subr.bf16.mxu1 %v6622_v58  ;;  %v670_v58 = vld [vmem:[%s7594_s5 + $0xbe8] sm:$0xff] }
 0x1bd   : > { %5284 = vmatpush1.bf16.msra.mxu0 %v6493_v1  ;;  %v794_v61 = vld [vmem:[%s7594_s5 + $0xfc8] sm:$0xff]  ;;  %v6550_v1 = vcombine.high %v666_v57, %v670_v58  ;;  %v6549_v9 = vcombine.low %v666_v57, %v670_v58 }
 0x1be   : > { %5285 = vmatprep.subr.bf16.mxu0 %v6502_v3  ;;  %v798_v62 = vld [vmem:[%s7594_s5 + $0xfe8] sm:$0xff] }
 0x1bf   : > { %5325 = vmatpush1.bf16.msra.mxu1 %v6621_v2  ;;  %v6678_v2 = vcombine.high %v794_v61, %v798_v62  ;;  %v802_v3 = vld [vmem:[%s7594_s5 + $0x1008] sm:$0xff]  ;;  %v6677_v10 = vcombine.low %v794_v61, %v798_v62 }
 0x1c0   : > { %5326 = vmatprep.subr.bf16.mxu1 %v6630_v4  ;;  %v806_v4 = vld [vmem:[%s7594_s5 + $0x1028] sm:$0xff] }
 0x1c1   : > { %5286 = vmatpush1.bf16.msra.mxu0 %v6501_v11  ;;  %v930_v6 = vld [vmem:[%s7594_s5 + $0x1408] sm:$0xff]  ;;  %v6686_v11 = vcombine.high %v802_v3, %v806_v4  ;;  %v6685_v43 = vcombine.low %v802_v3, %v806_v4 }
 0x1c2   : > { %5287 = vmatprep.subr.bf16.mxu0 %v6510_v13  ;;  %v934_v7 = vld [vmem:[%s7594_s5 + $0x1428] sm:$0xff] }
 0x1c3   : > { %5327 = vmatpush1.bf16.msra.mxu1 %v6629_v12  ;;  %v6814_v12 = vcombine.high %v930_v6, %v934_v7  ;;  %v810_v13 = vld [vmem:[%s7594_s5 + $0x1048] sm:$0xff]  ;;  %v6813_v16 = vcombine.low %v930_v6, %v934_v7 }
 0x1c4   : > { %5328 = vmatprep.subr.bf16.mxu1 %v6638_v40  ;;  %v814_v40 = vld [vmem:[%s7594_s5 + $0x1068] sm:$0xff] }
 0x1c5   : > { %5288 = vmatpush1.bf16.msra.mxu0 %v6509_v18  ;;  %v938_v14 = vld [vmem:[%s7594_s5 + $0x1448] sm:$0xff]  ;;  %v6694_v18 = vcombine.high %v810_v13, %v814_v40  ;;  %v6693_v26 = vcombine.low %v810_v13, %v814_v40 }
 0x1c6   : > { %5289 = vmatprep.subr.bf16.mxu0 %v6518_v22  ;;  %v942_v15 = vld [vmem:[%s7594_s5 + $0x1468] sm:$0xff] }
 0x1c7   : > { %5329 = vmatpush1.bf16.msra.mxu1 %v6637_v19  ;;  %v6822_v19 = vcombine.high %v938_v14, %v942_v15  ;;  %v818_v22 = vld [vmem:[%s7594_s5 + $0x1088] sm:$0xff]  ;;  %v6821_v27 = vcombine.low %v938_v14, %v942_v15 }
 0x1c8   : > { %5330 = vmatprep.subr.bf16.mxu1 %v6646_v24  ;;  %v822_v24 = vld [vmem:[%s7594_s5 + $0x10a8] sm:$0xff] }
 0x1c9   : > { %5290 = vmatpush1.bf16.msra.mxu0 %v6517_v55  ;;  %v946_v25 = vld [vmem:[%s7594_s5 + $0x1488] sm:$0xff]  ;;  %v6702_v55 = vcombine.high %v818_v22, %v822_v24  ;;  %v6701_v36 = vcombine.low %v818_v22, %v822_v24 }
 0x1ca   : > { %5291 = vmatprep.subr.bf16.mxu0 %v6526_v31  ;;  %v950_v54 = vld [vmem:[%s7594_s5 + $0x14a8] sm:$0xff] }
 0x1cb   : > { %5331 = vmatpush1.bf16.msra.mxu1 %v6645_v29  ;;  %v6830_v29 = vcombine.high %v946_v25, %v950_v54  ;;  %v826_v31 = vld [vmem:[%s7594_s5 + $0x10c8] sm:$0xff]  ;;  %v6829_v38 = vcombine.low %v946_v25, %v950_v54 }
 0x1cc   : > { %5332 = vmatprep.subr.bf16.mxu1 %v6654_v32  ;;  %v830_v32 = vld [vmem:[%s7594_s5 + $0x10e8] sm:$0xff] }
 0x1cd   : > { %5292 = vmatpush1.bf16.msra.mxu0 %v6525_v42  ;;  %v954_v33 = vld [vmem:[%s7594_s5 + $0x14c8] sm:$0xff]  ;;  %v6710_v42 = vcombine.high %v826_v31, %v830_v32  ;;  %v6709_v23 = vcombine.low %v826_v31, %v830_v32 }
 0x1ce   : > { %5293 = vmatprep.subr.bf16.mxu0 %v6534_v45  ;;  %v958_v35 = vld [vmem:[%s7594_s5 + $0x14e8] sm:$0xff] }
 0x1cf   : > { %5333 = vmatpush1.bf16.msra.mxu1 %v6653_v44  ;;  %v6838_v44 = vcombine.high %v954_v33, %v958_v35  ;;  %v834_v45 = vld [vmem:[%s7594_s5 + $0x1108] sm:$0xff]  ;;  %v6837_v49 = vcombine.low %v954_v33, %v958_v35 }
 0x1d0   : > { %5334 = vmatprep.subr.bf16.mxu1 %v6662_v20  ;;  %v838_v20 = vld [vmem:[%s7594_s5 + $0x1128] sm:$0xff] }
 0x1d1   : > { %5294 = vmatpush1.bf16.msra.mxu0 %v6533_v51  ;;  %v962_v46 = vld [vmem:[%s7594_s5 + $0x1508] sm:$0xff]  ;;  %v6718_v51 = vcombine.high %v834_v45, %v838_v20  ;;  %v6717_v61 = vcombine.low %v834_v45, %v838_v20 }
 0x1d2   : > { %5295 = vmatprep.subr.bf16.mxu0 %v6542_v53  ;;  %v966_v47 = vld [vmem:[%s7594_s5 + $0x1528] sm:$0xff] }
 0x1d3   : > { %5335 = vmatpush1.bf16.msra.mxu1 %v6661_v52  ;;  %v6846_v52 = vcombine.high %v962_v46, %v966_v47  ;;  %v842_v53 = vld [vmem:[%s7594_s5 + $0x1148] sm:$0xff]  ;;  %v6845_v62 = vcombine.low %v962_v46, %v966_v47 }
 0x1d4   : > { %5336 = vmatprep.subr.bf16.mxu1 %v6670_v56  ;;  %v846_v56 = vld [vmem:[%s7594_s5 + $0x1168] sm:$0xff] }
 0x1d5   : > { %5296 = vmatpush1.bf16.msra.mxu0 %v6541_v63  ;;  %v970_v57 = vld [vmem:[%s7594_s5 + $0x1548] sm:$0xff]  ;;  %v6726_v63 = vcombine.high %v842_v53, %v846_v56  ;;  %v6725_v6 = vcombine.low %v842_v53, %v846_v56 }
 0x1d6   : > { %5297 = vmatprep.subr.bf16.mxu0 %v6550_v1  ;;  %v974_v58 = vld [vmem:[%s7594_s5 + $0x1568] sm:$0xff] }
 0x1d7   : > { %5337 = vmatpush1.bf16.msra.mxu1 %v6669_v0  ;;  %v6854_v0 = vcombine.high %v970_v57, %v974_v58  ;;  %v850_v1 = vld [vmem:[%s7594_s5 + $0x1188] sm:$0xff]  ;;  %v6853_v7 = vcombine.low %v970_v57, %v974_v58 }
 0x1d8   : > { %5338 = vmatprep.subr.bf16.mxu1 %v6678_v2  ;;  %v854_v2 = vld [vmem:[%s7594_s5 + $0x11a8] sm:$0xff] }
 0x1d9   : > { %5298 = vmatpush1.bf16.msra.mxu0 %v6549_v9  ;;  %v978_v3 = vld [vmem:[%s7594_s5 + $0x1588] sm:$0xff]  ;;  %v6734_v9 = vcombine.high %v850_v1, %v854_v2  ;;  %v6733_v24 = vcombine.low %v850_v1, %v854_v2 }
 0x1da   : > { %5349 = vmatprep.subr.bf16.mxu0 %v6686_v11  ;;  %v982_v4 = vld [vmem:[%s7594_s5 + $0x15a8] sm:$0xff] }
 0x1db   : > { %5339 = vmatpush1.bf16.msra.mxu1 %v6677_v10  ;;  %v6862_v11 = vcombine.high %v978_v3, %v982_v4  ;;  %v862_v13 = vld [vmem:[%s7594_s5 + $0x11e8] sm:$0xff] }
 0x1dc   : > { %5390 = vmatprep.subr.bf16.mxu1 %v6814_v12  ;;  %5300 = vmatmul.mubr.bf16.vlgmr.msra.gmra.mrb[16].mxu0 %v7806_v37  ;;  %v858_v12 = vld [vmem:[%s7594_s5 + $0x11c8] sm:$0xff] }
 0x1dd   : > { %5350 = vmatpush1.bf16.msra.mxu0 %v6685_v43  ;;  %5381 = vmatprep.mubr.bf16.mxu0 %v7824_v48  ;;  %v986_v43 = vld [vmem:[%s7594_s5 + $0x15c8] sm:$0xff] }
 0x1de   : > { %5341 = vmatmul.mubr.bf16.vlgmr.msra.gmra.mrb[16].mxu1 %v7815_v41  ;;  %5351 = vmatprep.subr.bf16.mxu0 %v6694_v18  ;;  %v866_v31 = vld [vmem:[%s7594_s5 + $0x1208] sm:$0xff] }
 0x1df   : > { %5391 = vmatpush1.bf16.msra.mxu1 %v6813_v16  ;;  %5422 = vmatprep.mubr.bf16.mxu1 %v7831_v50  ;;  %v990_v16 = vld [vmem:[%s7594_s5 + $0x15e8] sm:$0xff] }
 0x1e0   : > { %5392 = vmatprep.subr.bf16.mxu1 %v6822_v19  ;;  %v870_v32 = vld [vmem:[%s7594_s5 + $0x1228] sm:$0xff] }
 0x1e1   : > { %5352 = vmatpush1.bf16.msra.mxu0 %v6693_v26  ;;  %v994_v33 = vld [vmem:[%s7594_s5 + $0x1608] sm:$0xff] }
 0x1e2   : > { %5353 = vmatprep.subr.bf16.mxu0 %v6702_v55  ;;  %v998_v35 = vld [vmem:[%s7594_s5 + $0x1628] sm:$0xff] }
 0x1e3   : > { %5393 = vmatpush1.bf16.msra.mxu1 %v6821_v27  ;;  %v6742_v27 = vcombine.high %v858_v12, %v862_v13  ;;  %v874_v45 = vld [vmem:[%s7594_s5 + $0x1248] sm:$0xff] }
 0x1e4   : > { %5394 = vmatprep.subr.bf16.mxu1 %v6830_v29  ;;  %v6870_v29 = vcombine.high %v986_v43, %v990_v16  ;;  %v878_v20 = vld [vmem:[%s7594_s5 + $0x1268] sm:$0xff] }
 0x1e5   : > { %5354 = vmatpush1.bf16.msra.mxu0 %v6701_v36  ;;  %v6741_v36 = vcombine.low %v858_v12, %v862_v13  ;;  %v1002_v46 = vld [vmem:[%s7594_s5 + $0x1648] sm:$0xff] }
 0x1e6   : > { %5355 = vmatprep.subr.bf16.mxu0 %v6710_v42  ;;  %v6750_v42 = vcombine.high %v866_v31, %v870_v32  ;;  %v1006_v47 = vld [vmem:[%s7594_s5 + $0x1668] sm:$0xff] }
 0x1e7   : > { %5395 = vmatpush1.bf16.msra.mxu1 %v6829_v38  ;;  %v6869_v38 = vcombine.low %v986_v43, %v990_v16  ;;  %v882_v53 = vld [vmem:[%s7594_s5 + $0x1288] sm:$0xff] }
 0x1e8   : > { %5396 = vmatprep.subr.bf16.mxu1 %v6838_v44  ;;  %v6878_v44 = vcombine.high %v994_v33, %v998_v35  ;;  %v886_v56 = vld [vmem:[%s7594_s5 + $0x12a8] sm:$0xff] }
 0x1e9   : > { %5356 = vmatpush1.bf16.msra.mxu0 %v6709_v23  ;;  %v6749_v23 = vcombine.low %v866_v31, %v870_v32  ;;  %v1010_v57 = vld [vmem:[%s7594_s5 + $0x1688] sm:$0xff] }
 0x1ea   : > { %5357 = vmatprep.subr.bf16.mxu0 %v6718_v51  ;;  %v6758_v51 = vcombine.high %v874_v45, %v878_v20  ;;  %v1014_v58 = vld [vmem:[%s7594_s5 + $0x16a8] sm:$0xff] }
 0x1eb   : > { %5397 = vmatpush1.bf16.msra.mxu1 %v6837_v49  ;;  %v6877_v49 = vcombine.low %v994_v33, %v998_v35  ;;  %v890_v1 = vld [vmem:[%s7594_s5 + $0x12c8] sm:$0xff] }
 0x1ec   : > { %5398 = vmatprep.subr.bf16.mxu1 %v6846_v52  ;;  %v6886_v52 = vcombine.high %v1002_v46, %v1006_v47  ;;  %v894_v2 = vld [vmem:[%s7594_s5 + $0x12e8] sm:$0xff] }
 0x1ed   : > { %5358 = vmatpush1.bf16.msra.mxu0 %v6717_v61  ;;  %v6757_v61 = vcombine.low %v874_v45, %v878_v20  ;;  %v902_v12 = vld [vmem:[%s7594_s5 + $0x1328] sm:$0xff] }
 0x1ee   : > { %5359 = vmatprep.subr.bf16.mxu0 %v6726_v63  ;;  %v5055_v10 = vpop.f32.mrb[4].mxu0  ;;  %v6766_v63 = vcombine.high %v882_v53, %v886_v56  ;;  %v1026_v13 = vld [vmem:[%s7594_s5 + $0x1708] sm:$0xff] }
 0x1ef   : > { %5399 = vmatpush1.bf16.msra.mxu1 %v6845_v62  ;;  %v5056_v40 = vadd.f32 %v5055_v10, %v8000_v34  ;;  %v5057_v15 = vpop.f32.mrb[5].mxu0  ;;  %v6861_v34 = vcombine.low %v978_v3, %v982_v4  ;;  %v6885_v62 = vcombine.low %v1002_v46, %v1006_v47  ;;  %v1018_v3 = vld [vmem:[%s7594_s5 + $0x16c8] sm:$0xff] }
 0x1f0   : > { %5400 = vmatprep.subr.bf16.mxu1 %v6854_v0  ;;  %v5096_v14 = vpop.f32.mrb[4].mxu1  ;;  %v5058_v18 = vadd.f32 %v5057_v15, %v8002_v39  ;;  %v5059_v22 = vpop.f32.mrb[6].mxu0  ;;  %v6894_v0 = vcombine.high %v1010_v57, %v1014_v58  ;;  %v1022_v4 = vld [vmem:[%s7594_s5 + $0x16e8] sm:$0xff] }
 0x1f1   : > { %v5098_v19 = vpop.f32.mrb[5].mxu1  ;;  %5360 = vmatpush1.bf16.msra.mxu0 %v6725_v6  ;;  %v8074_v25 = vadd.f32 %v5096_v14, %v5056_v40  ;;  %v5060_v26 = vpop.f32.mrb[7].mxu0  ;;  %v6765_v6 = vcombine.low %v882_v53, %v886_v56  ;;  %v6902_v10 = vcombine.high %v1018_v3, %v1022_v4  ;;  %v1030_v40 = vld [vmem:[%s7594_s5 + $0x1728] sm:$0xff]  ;;  %v6773_v14 = vcombine.low %v890_v1, %v894_v2  ;;  %v419_v53 = vld [vmem:[%s7594_s5 + $0x410] sm:$0xff] }
 0x1f2   : > { %v5100_v54 = vpop.f32.mrb[6].mxu1  ;;  %5361 = vmatprep.subr.bf16.mxu0 %v6734_v9  ;;  %v8076_v55 = vadd.f32 %v5098_v19, %v5058_v18  ;;  %v6774_v9 = vcombine.high %v890_v1, %v894_v2  ;;  %v6901_v15 = vcombine.low %v1018_v3, %v1022_v4  ;;  %v6910_v16 = vcombine.high %v1026_v13, %v1030_v40  ;;  %v906_v18 = vld [vmem:[%s7594_s5 + $0x1348] sm:$0xff]  ;;  %v423_v56 = vld [vmem:[%s7594_s5 + $0x430] sm:$0xff] }
 0x1f3   : > { %5401 = vmatpush1.bf16.msra.mxu1 %v6853_v7  ;;  %v5101_v39 = vpop.f32.mrb[7].mxu1  ;;  %v6893_v7 = vcombine.low %v1010_v57, %v1014_v58  ;;  %v910_v19 = vld [vmem:[%s7594_s5 + $0x1368] sm:$0xff]  ;;  %v6909_v26 = vcombine.low %v1026_v13, %v1030_v40  ;;  %v427_v1 = vld [vmem:[%s7594_s5 + $0x450] sm:$0xff]  ;;  %v6303_v4 = vcombine.low %v419_v53, %v423_v56 }
 0x1f4   : > { %5402 = vmatprep.subr.bf16.mxu1 %v6862_v11  ;;  %v898_v11 = vld [vmem:[%s7594_s5 + $0x1308] sm:$0xff]  ;;  %v6789_v33 = vcombine.low %v906_v18, %v910_v19  ;;  %v431_v2 = vld [vmem:[%s7594_s5 + $0x470] sm:$0xff] }
 0x1f5   : > { %5362 = vmatpush1.bf16.msra.mxu0 %v6733_v24  ;;  %v6782_v43 = vcombine.high %v898_v11, %v902_v12  ;;  %v1034_v22 = vld [vmem:[%s7594_s5 + $0x1748] sm:$0xff]  ;;  %v6781_v54 = vcombine.low %v898_v11, %v902_v12  ;;  %v435_v11 = vld [vmem:[%s7594_s5 + $0x490] sm:$0xff]  ;;  %v6311_v40 = vcombine.low %v427_v1, %v431_v2 }
 0x1f6   : > { %5363 = vmatprep.subr.bf16.mxu0 %v6742_v27  ;;  %v1038_v24 = vld [vmem:[%s7594_s5 + $0x1768] sm:$0xff]  ;;  %v439_v12 = vld [vmem:[%s7594_s5 + $0x4b0] sm:$0xff] }
 0x1f7   : > { %5403 = vmatpush1.bf16.msra.mxu1 %v6861_v34  ;;  %v6790_v34 = vcombine.high %v906_v18, %v910_v19  ;;  %v6918_v27 = vcombine.high %v1034_v22, %v1038_v24  ;;  %v914_v39 = vld [vmem:[%s7594_s5 + $0x1388] sm:$0xff]  ;;  %v6917_v35 = vcombine.low %v1034_v22, %v1038_v24  ;;  %v443_v18 = vld [vmem:[%s7594_s5 + $0x4d0] sm:$0xff]  ;;  %v6319_v24 = vcombine.low %v435_v11, %v439_v12 }
 0x1f8   : > { %5404 = vmatprep.subr.bf16.mxu1 %v6870_v29  ;;  %v918_v29 = vld [vmem:[%s7594_s5 + $0x13a8] sm:$0xff]  ;;  %v447_v19 = vld [vmem:[%s7594_s5 + $0x4f0] sm:$0xff] }
 0x1f9   : > { %5364 = vmatpush1.bf16.msra.mxu0 %v6741_v36  ;;  %v1042_v31 = vld [vmem:[%s7594_s5 + $0x1788] sm:$0xff]  ;;  %v6798_v36 = vcombine.high %v914_v39, %v918_v29  ;;  %v6797_v46 = vcombine.low %v914_v39, %v918_v29  ;;  %v451_v39 = vld [vmem:[%s7594_s5 + $0x510] sm:$0xff] }
 0x1fa   : > { %5365 = vmatprep.subr.bf16.mxu0 %v6750_v42  ;;  %v1046_v32 = vld [vmem:[%s7594_s5 + $0x17a8] sm:$0xff]  ;;  %v455_v29 = vld [vmem:[%s7594_s5 + $0x530] sm:$0xff] }
 0x1fb   : > { %5405 = vmatpush1.bf16.msra.mxu1 %v6869_v38  ;;  %v6926_v38 = vcombine.high %v1042_v31, %v1046_v32  ;;  %v922_v42 = vld [vmem:[%s7594_s5 + $0x13c8] sm:$0xff]  ;;  %v6925_v47 = vcombine.low %v1042_v31, %v1046_v32  ;;  %v6327_v32 = vcombine.low %v443_v18, %v447_v19 }
 0x1fc   : > { %5406 = vmatprep.subr.bf16.mxu1 %v6878_v44  ;;  %v926_v44 = vld [vmem:[%s7594_s5 + $0x13e8] sm:$0xff] }
 0x1fd   : > { %5366 = vmatpush1.bf16.msra.mxu0 %v6749_v23  ;;  %v1050_v45 = vld [vmem:[%s7594_s5 + $0x17c8] sm:$0xff]  ;;  %v6806_v23 = vcombine.high %v922_v42, %v926_v44  ;;  %v6805_v57 = vcombine.low %v922_v42, %v926_v44  ;;  %v459_v42 = vld [vmem:[%s7594_s5 + $0x550] sm:$0xff] }
 0x1fe   : > { %5367 = vmatprep.subr.bf16.mxu0 %v6758_v51  ;;  %v1054_v20 = vld [vmem:[%s7594_s5 + $0x17e8] sm:$0xff]  ;;  %v291_v51 = vld [vmem:[%s7594_s5 + $0x10] sm:$0xff] }
 0x1ff   : > { %5407 = vmatpush1.bf16.msra.mxu1 %v6877_v49  ;;  %v6934_v49 = vcombine.high %v1050_v45, %v1054_v20  ;;  %v6933_v58 = vcombine.low %v1050_v45, %v1054_v20  ;;  %v463_v44 = vld [vmem:[%s7594_s5 + $0x570] sm:$0xff]  ;;  %v6335_v20 = vcombine.low %v451_v39, %v455_v29 }
 0x200   : > { %5408 = vmatprep.subr.bf16.mxu1 %v6886_v52  ;;  %v295_v52 = vld [vmem:[%s7594_s5 + $0x30] sm:$0xff] }
 0x201   : > { %5368 = vmatpush1.bf16.msra.mxu0 %v6757_v61  ;;  %v6176_v61 = vcombine.high %v291_v51, %v295_v52  ;;  %v6175_v3 = vcombine.low %v291_v51, %v295_v52  ;;  %v467_v51 = vld [vmem:[%s7594_s5 + $0x590] sm:$0xff] }
 0x202   : > { %5369 = vmatprep.subr.bf16.mxu0 %v6766_v63  ;;  %v299_v63 = vld [vmem:[%s7594_s5 + $0x50] sm:$0xff] }
 0x203   : > { %5409 = vmatpush1.bf16.msra.mxu1 %v6885_v62  ;;  %v6304_v62 = vcombine.high %v419_v53, %v423_v56  ;;  %v471_v52 = vld [vmem:[%s7594_s5 + $0x5b0] sm:$0xff]  ;;  %v6343_v56 = vcombine.low %v459_v42, %v463_v44 }
 0x204   : > { %5410 = vmatprep.subr.bf16.mxu1 %v6894_v0  ;;  %v303_v0 = vld [vmem:[%s7594_s5 + $0x70] sm:$0xff] }
 0x205   : > { %5370 = vmatpush1.bf16.msra.mxu0 %v6765_v6  ;;  %v6184_v6 = vcombine.high %v299_v63, %v303_v0  ;;  %v6183_v13 = vcombine.low %v299_v63, %v303_v0  ;;  %v351_v63 = vld [vmem:[%s7594_s5 + $0x1f0] sm:$0xff] }
 0x206   : > { %5371 = vmatprep.subr.bf16.mxu0 %v6774_v9  ;;  %v307_v9 = vld [vmem:[%s7594_s5 + $0x90] sm:$0xff] }
 0x207   : > { %5411 = vmatpush1.bf16.msra.mxu1 %v6893_v7  ;;  %v6312_v7 = vcombine.high %v427_v1, %v431_v2 }
 0x208   : > { %5412 = vmatprep.subr.bf16.mxu1 %v6902_v10  ;;  %v311_v10 = vld [vmem:[%s7594_s5 + $0xb0] sm:$0xff] }
 0x209   : > { %5372 = vmatpush1.bf16.msra.mxu0 %v6773_v14  ;;  %v6192_v14 = vcombine.high %v307_v9, %v311_v10  ;;  %v6191_v22 = vcombine.low %v307_v9, %v311_v10 }
 0x20a   : > { %5373 = vmatprep.subr.bf16.mxu0 %v6782_v43  ;;  %v315_v43 = vld [vmem:[%s7594_s5 + $0xd0] sm:$0xff] }
 0x20b   : > { %5413 = vmatpush1.bf16.msra.mxu1 %v6901_v15  ;;  %v6320_v15 = vcombine.high %v435_v11, %v439_v12 }
 0x20c   : > { %5414 = vmatprep.subr.bf16.mxu1 %v6910_v16  ;;  %v319_v16 = vld [vmem:[%s7594_s5 + $0xf0] sm:$0xff] }
 0x20d   : > { %5374 = vmatpush1.bf16.msra.mxu0 %v6781_v54  ;;  %v6200_v54 = vcombine.high %v315_v43, %v319_v16  ;;  %v6199_v31 = vcombine.low %v315_v43, %v319_v16 }
 0x20e   : > { %5375 = vmatprep.subr.bf16.mxu0 %v6790_v34  ;;  %v323_v34 = vld [vmem:[%s7594_s5 + $0x110] sm:$0xff] }
 0x20f   : > { %5415 = vmatpush1.bf16.msra.mxu1 %v6909_v26  ;;  %v6328_v26 = vcombine.high %v443_v18, %v447_v19  ;;  %v355_v18 = vld [vmem:[%s7594_s5 + $0x210] sm:$0xff] }
 0x210   : > { %5416 = vmatprep.subr.bf16.mxu1 %v6918_v27  ;;  %v327_v27 = vld [vmem:[%s7594_s5 + $0x130] sm:$0xff] }
 0x211   : > { %5376 = vmatpush1.bf16.msra.mxu0 %v6789_v33  ;;  %v6208_v33 = vcombine.high %v323_v34, %v327_v27  ;;  %v6207_v45 = vcombine.low %v323_v34, %v327_v27  ;;  %v359_v19 = vld [vmem:[%s7594_s5 + $0x230] sm:$0xff] }
 0x212   : > { %5377 = vmatprep.subr.bf16.mxu0 %v6798_v36  ;;  %v331_v36 = vld [vmem:[%s7594_s5 + $0x150] sm:$0xff] }
 0x213   : > { %5417 = vmatpush1.bf16.msra.mxu1 %v6917_v35  ;;  %v6336_v35 = vcombine.high %v451_v39, %v455_v29  ;;  %v6240_v39 = vcombine.high %v355_v18, %v359_v19 }
 0x214   : > { %5418 = vmatprep.subr.bf16.mxu1 %v6926_v38  ;;  %v335_v38 = vld [vmem:[%s7594_s5 + $0x170] sm:$0xff] }
 0x215   : > { %5378 = vmatpush1.bf16.msra.mxu0 %v6797_v46  ;;  %v6216_v46 = vcombine.high %v331_v36, %v335_v38  ;;  %v6215_v53 = vcombine.low %v331_v36, %v335_v38  ;;  %v6239_v36 = vcombine.low %v355_v18, %v359_v19  ;;  %v531_v18 = vld [vmem:[%s7594_s5 + $0x790] sm:$0xff] }
 0x216   : > { %5379 = vmatprep.subr.bf16.mxu0 %v6806_v23  ;;  %v339_v23 = vld [vmem:[%s7594_s5 + $0x190] sm:$0xff] }
 0x217   : > { %5419 = vmatpush1.bf16.msra.mxu1 %v6925_v47  ;;  %v6344_v47 = vcombine.high %v459_v42, %v463_v44  ;;  %v535_v19 = vld [vmem:[%s7594_s5 + $0x7b0] sm:$0xff] }
 0x218   : > { %5420 = vmatprep.subr.bf16.mxu1 %v6934_v49  ;;  %v343_v49 = vld [vmem:[%s7594_s5 + $0x1b0] sm:$0xff] }
 0x219   : > { %5380 = vmatpush1.bf16.msra.mxu0 %v6805_v57  ;;  %v6224_v57 = vcombine.high %v339_v23, %v343_v49  ;;  %v6223_v11 = vcombine.low %v339_v23, %v343_v49 }
 0x21a   : > { %5431 = vmatprep.subr.bf16.mxu0 %v6176_v61  ;;  %v6352_v61 = vcombine.high %v467_v51, %v471_v52 }
 0x21b   : > { %5421 = vmatpush1.bf16.msra.mxu1 %v6933_v58 }
 0x21c   : > { %5472 = vmatprep.subr.bf16.mxu1 %v6304_v62  ;;  %5382 = vmatmul.mubr.bf16.vlgmr.msra.gmra.mrb[20].mxu0 %v7896_v5  ;;  %v347_v62 = vld [vmem:[%s7594_s5 + $0x1d0] sm:$0xff] }
 0x21d   : > { %5432 = vmatpush1.bf16.msra.mxu0 %v6175_v3  ;;  %5463 = vmatprep.mubr.bf16.mxu0 %v7666_v59  ;;  %v475_v3 = vld [vmem:[%s7594_s5 + $0x5d0] sm:$0xff]  ;;  %v6231_v34 = vcombine.low %v347_v62, %v351_v63 }
 0x21e   : > { %5423 = vmatmul.mubr.bf16.vlgmr.msra.gmra.mrb[20].mxu1 %v7902_v8  ;;  %5433 = vmatprep.subr.bf16.mxu0 %v6184_v6  ;;  %v271_v6 = vld [vmem:[%s7611_s4] sm:$0xff] }
 0x21f   : > { %5473 = vmatpush1.bf16.msra.mxu1 %v6303_v4  ;;  %5504 = vmatprep.mubr.bf16.mxu1 %v7670_v60  ;;  %v479_v4 = vld [vmem:[%s7594_s5 + $0x5f0] sm:$0xff] }
 0x220   : > { %5474 = vmatprep.subr.bf16.mxu1 %v6312_v7  ;;  %v6359_v27 = vcombine.low %v475_v3, %v479_v4 }
 0x221   : > { %5434 = vmatpush1.bf16.msra.mxu0 %v6183_v13  ;;  %v272_v13 = vld [vmem:[%s7611_s4 + $0x8] sm:$0xff] }
 0x222   : > { %5435 = vmatprep.subr.bf16.mxu0 %v6192_v14  ;;  %v6351_v14 = vcombine.low %v467_v51, %v471_v52 }
 0x223   : > { %5475 = vmatpush1.bf16.msra.mxu1 %v6311_v40 }
 0x224   : > { %5476 = vmatprep.subr.bf16.mxu1 %v6320_v15  ;;  %v6232_v15 = vcombine.high %v347_v62, %v351_v63 }
 0x225   : > { %5436 = vmatpush1.bf16.msra.mxu0 %v6191_v22 }
 0x226   : > { %5437 = vmatprep.subr.bf16.mxu0 %v6200_v54  ;;  %v487_v54 = vld [vmem:[%s7594_s5 + $0x630] sm:$0xff] }
 0x227   : > { %5477 = vmatpush1.bf16.msra.mxu1 %v6319_v24  ;;  %v483_v24 = vld [vmem:[%s7594_s5 + $0x610] sm:$0xff] }
 0x228   : > { %5478 = vmatprep.subr.bf16.mxu1 %v6328_v26  ;;  %v6368_v29 = vcombine.high %v483_v24, %v487_v54  ;;  %v6367_v38 = vcombine.low %v483_v24, %v487_v54 }
 0x229   : > { %5438 = vmatpush1.bf16.msra.mxu0 %v6199_v31  ;;  %v363_v31 = vld [vmem:[%s7594_s5 + $0x250] sm:$0xff] }
 0x22a   : > { %5439 = vmatprep.subr.bf16.mxu0 %v6208_v33  ;;  %v491_v33 = vld [vmem:[%s7594_s5 + $0x650] sm:$0xff] }
 0x22b   : > { %5479 = vmatpush1.bf16.msra.mxu1 %v6327_v32  ;;  %v367_v32 = vld [vmem:[%s7594_s5 + $0x270] sm:$0xff] }
 0x22c   : > { %5480 = vmatprep.subr.bf16.mxu1 %v6336_v35  ;;  %v495_v35 = vld [vmem:[%s7594_s5 + $0x670] sm:$0xff]  ;;  %v6248_v42 = vcombine.high %v363_v31, %v367_v32  ;;  %v6247_v23 = vcombine.low %v363_v31, %v367_v32  ;;  %v6415_v32 = vcombine.low %v531_v18, %v535_v19 }
 0x22d   : > { %5440 = vmatpush1.bf16.msra.mxu0 %v6207_v45  ;;  %v6376_v44 = vcombine.high %v491_v33, %v495_v35  ;;  %v371_v45 = vld [vmem:[%s7594_s5 + $0x290] sm:$0xff]  ;;  %v6375_v49 = vcombine.low %v491_v33, %v495_v35 }
 0x22e   : > { %5441 = vmatprep.subr.bf16.mxu0 %v6216_v46  ;;  %v499_v46 = vld [vmem:[%s7594_s5 + $0x690] sm:$0xff] }
 0x22f   : > { %5481 = vmatpush1.bf16.msra.mxu1 %v6335_v20  ;;  %v5137_v58 = vpop.f32.mrb[8].mxu0  ;;  %v375_v20 = vld [vmem:[%s7594_s5 + $0x2b0] sm:$0xff] }
 0x230   : > { %5482 = vmatprep.subr.bf16.mxu1 %v6344_v47  ;;  %v5138_v0 = vadd.f32 %v5137_v58, %v8074_v25  ;;  %v5139_v2 = vpop.f32.mrb[9].mxu0  ;;  %v503_v47 = vld [vmem:[%s7594_s5 + $0x6b0] sm:$0xff]  ;;  %v6256_v51 = vcombine.high %v371_v45, %v375_v20 }
 0x231   : > { %v5178_v1 = vpop.f32.mrb[8].mxu1  ;;  %v5140_v7 = vadd.f32 %v5139_v2, %v8076_v55  ;;  %v5141_v10 = vpop.f32.mrb[10].mxu0  ;;  %5442 = vmatpush1.bf16.msra.mxu0 %v6215_v53  ;;  %v6360_v55 = vcombine.high %v475_v3, %v479_v4  ;;  %v6384_v52 = vcombine.high %v499_v46, %v503_v47  ;;  %v379_v53 = vld [vmem:[%s7594_s5 + $0x2d0] sm:$0xff]  ;;  %v6383_v62 = vcombine.low %v499_v46, %v503_v47 }
 0x232   : > { %v5180_v9 = vpop.f32.mrb[9].mxu1  ;;  %v5179_v12 = vadd.f32 %v5178_v1, %v5138_v0  ;;  %v5142_v25 = vpop.f32.mrb[11].mxu0  ;;  %5443 = vmatprep.subr.bf16.mxu0 %v6224_v57  ;;  %v507_v57 = vld [vmem:[%s7594_s5 + $0x6d0] sm:$0xff] }
 0x233   : > { %v5182_v40 = vpop.f32.mrb[10].mxu1  ;;  %5483 = vmatpush1.bf16.msra.mxu1 %v6343_v56  ;;  %v5181_v43 = vadd.f32 %v5180_v9, %v5140_v7  ;;  %v383_v56 = vld [vmem:[%s7594_s5 + $0x2f0] sm:$0xff] }
 0x234   : > { %v5183_v16 = vpop.f32.mrb[11].mxu1  ;;  %5484 = vmatprep.subr.bf16.mxu1 %v6352_v61  ;;  %v5923_v22 = vadd.f32 %v5179_v12, %v271_v6  ;;  %v511_v58 = vld [vmem:[%s7594_s5 + $0x6f0] sm:$0xff]  ;;  %v6255_v61 = vcombine.low %v371_v45, %v375_v20  ;;  %v6264_v63 = vcombine.high %v379_v53, %v383_v56  ;;  %v6263_v6 = vcombine.low %v379_v53, %v383_v56 }
 0x235   : > { %v5924_v26 = vadd.f32 %v5181_v43, %v272_v13  ;;  %5444 = vmatpush1.bf16.msra.mxu0 %v6223_v11  ;;  %v6392_v0 = vcombine.high %v507_v57, %v511_v58  ;;  %v387_v1 = vld [vmem:[%s7594_s5 + $0x310] sm:$0xff]  ;;  %v6391_v7 = vcombine.low %v507_v57, %v511_v58 }
 0x236   : > { %5931 = vst [vmem:[%s7611_s4] sm:$0xff] %v5923_v22  ;;  %5445 = vmatprep.subr.bf16.mxu0 %v6232_v15  ;;  %v391_v2 = vld [vmem:[%s7594_s5 + $0x330] sm:$0xff] }
 0x237   : > { %5485 = vmatpush1.bf16.msra.mxu1 %v6351_v14  ;;  %5932 = vst [vmem:[%s7611_s4 + $0x8] sm:$0xff] %v5924_v26  ;;  %v515_v3 = vld [vmem:[%s7594_s5 + $0x710] sm:$0xff]  ;;  %v6272_v9 = vcombine.high %v387_v1, %v391_v2  ;;  %v6271_v25 = vcombine.low %v387_v1, %v391_v2  ;;  %v6416_v26 = vcombine.high %v531_v18, %v535_v19 }
 0x238   : > { %5486 = vmatprep.subr.bf16.mxu1 %v6360_v55  ;;  %v519_v4 = vld [vmem:[%s7594_s5 + $0x730] sm:$0xff] }
 0x239   : > { %5446 = vmatpush1.bf16.msra.mxu0 %v6231_v34  ;;  %v6400_v10 = vcombine.high %v515_v3, %v519_v4  ;;  %v395_v11 = vld [vmem:[%s7594_s5 + $0x350] sm:$0xff]  ;;  %v6399_v14 = vcombine.low %v515_v3, %v519_v4 }
 0x23a   : > { %5447 = vmatprep.subr.bf16.mxu0 %v6240_v39  ;;  %v399_v12 = vld [vmem:[%s7594_s5 + $0x370] sm:$0xff] }
 0x23b   : > { %5487 = vmatpush1.bf16.msra.mxu1 %v6359_v27  ;;  %v523_v13 = vld [vmem:[%s7594_s5 + $0x750] sm:$0xff]  ;;  %v6280_v15 = vcombine.high %v395_v11, %v399_v12  ;;  %v6279_v22 = vcombine.low %v395_v11, %v399_v12 }
 0x23c   : > { %5488 = vmatprep.subr.bf16.mxu1 %v6368_v29  ;;  %v527_v40 = vld [vmem:[%s7594_s5 + $0x770] sm:$0xff] }
 0x23d   : > { %5448 = vmatpush1.bf16.msra.mxu0 %v6239_v36  ;;  %v6408_v43 = vcombine.high %v523_v13, %v527_v40  ;;  %v403_v16 = vld [vmem:[%s7594_s5 + $0x390] sm:$0xff]  ;;  %v6407_v24 = vcombine.low %v523_v13, %v527_v40 }
 0x23e   : > { %5449 = vmatprep.subr.bf16.mxu0 %v6248_v42  ;;  %v407_v55 = vld [vmem:[%s7594_s5 + $0x3b0] sm:$0xff] }
 0x23f   : > { %5489 = vmatpush1.bf16.msra.mxu1 %v6367_v38  ;;  %v6288_v54 = vcombine.high %v403_v16, %v407_v55  ;;  %v411_v34 = vld [vmem:[%s7594_s5 + $0x3d0] sm:$0xff]  ;;  %v6287_v31 = vcombine.low %v403_v16, %v407_v55 }
 0x240   : > { %5490 = vmatprep.subr.bf16.mxu1 %v6376_v44  ;;  %v415_v27 = vld [vmem:[%s7594_s5 + $0x3f0] sm:$0xff] }
 0x241   : > { %5450 = vmatpush1.bf16.msra.mxu0 %v6247_v23  ;;  %v539_v39 = vld [vmem:[%s7594_s5 + $0x7d0] sm:$0xff]  ;;  %v6296_v33 = vcombine.high %v411_v34, %v415_v27  ;;  %v6295_v45 = vcombine.low %v411_v34, %v415_v27 }
 0x242   : > { %5451 = vmatprep.subr.bf16.mxu0 %v6256_v51  ;;  %v543_v29 = vld [vmem:[%s7594_s5 + $0x7f0] sm:$0xff] }
 0x243   : > { %5491 = vmatpush1.bf16.msra.mxu1 %v6375_v49  ;;  %v6424_v35 = vcombine.high %v539_v39, %v543_v29  ;;  %v547_v36 = vld [vmem:[%s7594_s5 + $0x810] sm:$0xff]  ;;  %v6423_v20 = vcombine.low %v539_v39, %v543_v29 }
 0x244   : > { %5492 = vmatprep.subr.bf16.mxu1 %v6384_v52  ;;  %v551_v38 = vld [vmem:[%s7594_s5 + $0x830] sm:$0xff] }
 0x245   : > { %5452 = vmatpush1.bf16.msra.mxu0 %v6255_v61  ;;  %v675_v42 = vld [vmem:[%s7594_s5 + $0xc10] sm:$0xff]  ;;  %v6432_v46 = vcombine.high %v547_v36, %v551_v38  ;;  %v6431_v53 = vcombine.low %v547_v36, %v551_v38 }
 0x246   : > { %5453 = vmatprep.subr.bf16.mxu0 %v6264_v63  ;;  %v679_v44 = vld [vmem:[%s7594_s5 + $0xc30] sm:$0xff] }
 0x247   : > { %5493 = vmatpush1.bf16.msra.mxu1 %v6383_v62  ;;  %v6560_v47 = vcombine.high %v675_v42, %v679_v44  ;;  %v555_v23 = vld [vmem:[%s7594_s5 + $0x850] sm:$0xff]  ;;  %v6559_v56 = vcombine.low %v675_v42, %v679_v44 }
 0x248   : > { %5494 = vmatprep.subr.bf16.mxu1 %v6392_v0  ;;  %v559_v49 = vld [vmem:[%s7594_s5 + $0x870] sm:$0xff] }
 0x249   : > { %5454 = vmatpush1.bf16.msra.mxu0 %v6263_v6  ;;  %v683_v51 = vld [vmem:[%s7594_s5 + $0xc50] sm:$0xff]  ;;  %v6440_v57 = vcombine.high %v555_v23, %v559_v49  ;;  %v6439_v1 = vcombine.low %v555_v23, %v559_v49 }
 0x24a   : > { %5455 = vmatprep.subr.bf16.mxu0 %v6272_v9  ;;  %v687_v52 = vld [vmem:[%s7594_s5 + $0xc70] sm:$0xff] }
 0x24b   : > { %5495 = vmatpush1.bf16.msra.mxu1 %v6391_v7  ;;  %v6568_v58 = vcombine.high %v683_v51, %v687_v52  ;;  %v563_v61 = vld [vmem:[%s7594_s5 + $0x890] sm:$0xff]  ;;  %v6567_v2 = vcombine.low %v683_v51, %v687_v52 }
 0x24c   : > { %5496 = vmatprep.subr.bf16.mxu1 %v6400_v10  ;;  %v567_v62 = vld [vmem:[%s7594_s5 + $0x8b0] sm:$0xff] }
 0x24d   : > { %5456 = vmatpush1.bf16.msra.mxu0 %v6271_v25  ;;  %v691_v63 = vld [vmem:[%s7594_s5 + $0xc90] sm:$0xff]  ;;  %v6448_v3 = vcombine.high %v563_v61, %v567_v62  ;;  %v6447_v11 = vcombine.low %v563_v61, %v567_v62 }
 0x24e   : > { %5457 = vmatprep.subr.bf16.mxu0 %v6280_v15  ;;  %v695_v0 = vld [vmem:[%s7594_s5 + $0xcb0] sm:$0xff] }
 0x24f   : > { %5497 = vmatpush1.bf16.msra.mxu1 %v6399_v14  ;;  %v6576_v4 = vcombine.high %v691_v63, %v695_v0  ;;  %v571_v6 = vld [vmem:[%s7594_s5 + $0x8d0] sm:$0xff]  ;;  %v6575_v12 = vcombine.low %v691_v63, %v695_v0 }
 0x250   : > { %5498 = vmatprep.subr.bf16.mxu1 %v6408_v43  ;;  %v575_v7 = vld [vmem:[%s7594_s5 + $0x8f0] sm:$0xff] }
 0x251   : > { %5458 = vmatpush1.bf16.msra.mxu0 %v6279_v22  ;;  %v699_v9 = vld [vmem:[%s7594_s5 + $0xcd0] sm:$0xff]  ;;  %v6456_v13 = vcombine.high %v571_v6, %v575_v7  ;;  %v6455_v16 = vcombine.low %v571_v6, %v575_v7 }
 0x252   : > { %5459 = vmatprep.subr.bf16.mxu0 %v6288_v54  ;;  %v703_v10 = vld [vmem:[%s7594_s5 + $0xcf0] sm:$0xff] }
 0x253   : > { %5499 = vmatpush1.bf16.msra.mxu1 %v6407_v24  ;;  %v6584_v40 = vcombine.high %v699_v9, %v703_v10  ;;  %v579_v25 = vld [vmem:[%s7594_s5 + $0x910] sm:$0xff]  ;;  %v6583_v55 = vcombine.low %v699_v9, %v703_v10 }
 0x254   : > { %5500 = vmatprep.subr.bf16.mxu1 %v6416_v26  ;;  %v583_v14 = vld [vmem:[%s7594_s5 + $0x930] sm:$0xff] }
 0x255   : > { %5460 = vmatpush1.bf16.msra.mxu0 %v6287_v31  ;;  %v707_v15 = vld [vmem:[%s7594_s5 + $0xd10] sm:$0xff]  ;;  %v6464_v18 = vcombine.high %v579_v25, %v583_v14  ;;  %v6463_v34 = vcombine.low %v579_v25, %v583_v14 }
 0x256   : > { %5461 = vmatprep.subr.bf16.mxu0 %v6296_v33  ;;  %v711_v43 = vld [vmem:[%s7594_s5 + $0xd30] sm:$0xff] }
 0x257   : > { %5501 = vmatpush1.bf16.msra.mxu1 %v6415_v32  ;;  %v6592_v19 = vcombine.high %v707_v15, %v711_v43  ;;  %v587_v22 = vld [vmem:[%s7594_s5 + $0x950] sm:$0xff]  ;;  %v6591_v27 = vcombine.low %v707_v15, %v711_v43 }
 0x258   : > { %5502 = vmatprep.subr.bf16.mxu1 %v6424_v35  ;;  %v591_v24 = vld [vmem:[%s7594_s5 + $0x970] sm:$0xff] }
 0x259   : > { %5462 = vmatpush1.bf16.msra.mxu0 %v6295_v45  ;;  %v715_v54 = vld [vmem:[%s7594_s5 + $0xd50] sm:$0xff]  ;;  %v6472_v39 = vcombine.high %v587_v22, %v591_v24  ;;  %v6471_v36 = vcombine.low %v587_v22, %v591_v24 }
 0x25a   : > { %5513 = vmatprep.subr.bf16.mxu0 %v6432_v46  ;;  %v719_v26 = vld [vmem:[%s7594_s5 + $0xd70] sm:$0xff] }
 0x25b   : > { %5503 = vmatpush1.bf16.msra.mxu1 %v6423_v20  ;;  %v6600_v29 = vcombine.high %v715_v54, %v719_v26  ;;  %v595_v31 = vld [vmem:[%s7594_s5 + $0x990] sm:$0xff]  ;;  %v6599_v38 = vcombine.low %v715_v54, %v719_v26 }
 0x25c   : > { %5554 = vmatprep.subr.bf16.mxu1 %v6560_v47  ;;  %5464 = vmatmul.mubr.bf16.vlgmr.msra.gmra.mrb[24].mxu0 %v7716_v17  ;;  %v599_v32 = vld [vmem:[%s7594_s5 + $0x9b0] sm:$0xff] }
 0x25d   : > { %5514 = vmatpush1.bf16.msra.mxu0 %v6431_v53  ;;  %5545 = vmatprep.mubr.bf16.mxu0 %v7734_v28  ;;  %v723_v33 = vld [vmem:[%s7594_s5 + $0xd90] sm:$0xff]  ;;  %v6480_v42 = vcombine.high %v595_v31, %v599_v32 }
 0x25e   : > { %5505 = vmatmul.mubr.bf16.vlgmr.msra.gmra.mrb[24].mxu1 %v7725_v21  ;;  %5515 = vmatprep.subr.bf16.mxu0 %v6440_v57  ;;  %v727_v35 = vld [vmem:[%s7594_s5 + $0xdb0] sm:$0xff]  ;;  %v6479_v57 = vcombine.low %v595_v31, %v599_v32 }
 0x25f   : > { %5555 = vmatpush1.bf16.msra.mxu1 %v6559_v56  ;;  %5586 = vmatprep.mubr.bf16.mxu1 %v7741_v30  ;;  %v6608_v45 = vcombine.high %v723_v33, %v727_v35  ;;  %v603_v20 = vld [vmem:[%s7594_s5 + $0x9d0] sm:$0xff]  ;;  %v6607_v63 = vcombine.low %v723_v33, %v727_v35 }
 0x260   : > { %5556 = vmatprep.subr.bf16.mxu1 %v6568_v58  ;;  %v607_v46 = vld [vmem:[%s7594_s5 + $0x9f0] sm:$0xff] }
 0x261   : > { %5516 = vmatpush1.bf16.msra.mxu0 %v6439_v1  ;;  %v731_v49 = vld [vmem:[%s7594_s5 + $0xdd0] sm:$0xff]  ;;  %v6488_v0 = vcombine.high %v603_v20, %v607_v46  ;;  %v6487_v9 = vcombine.low %v603_v20, %v607_v46 }
 0x262   : > { %5517 = vmatprep.subr.bf16.mxu0 %v6448_v3  ;;  %v735_v51 = vld [vmem:[%s7594_s5 + $0xdf0] sm:$0xff] }
 0x263   : > { %5557 = vmatpush1.bf16.msra.mxu1 %v6567_v2  ;;  %v6616_v2 = vcombine.high %v731_v49, %v735_v51  ;;  %v611_v3 = vld [vmem:[%s7594_s5 + $0xa10] sm:$0xff]  ;;  %v6615_v10 = vcombine.low %v731_v49, %v735_v51 }
 0x264   : > { %5558 = vmatprep.subr.bf16.mxu1 %v6576_v4  ;;  %v615_v4 = vld [vmem:[%s7594_s5 + $0xa30] sm:$0xff] }
 0x265   : > { %5518 = vmatpush1.bf16.msra.mxu0 %v6447_v11  ;;  %v739_v6 = vld [vmem:[%s7594_s5 + $0xe10] sm:$0xff]  ;;  %v6496_v11 = vcombine.high %v611_v3, %v615_v4  ;;  %v6495_v15 = vcombine.low %v611_v3, %v615_v4 }
 0x266   : > { %5519 = vmatprep.subr.bf16.mxu0 %v6456_v13  ;;  %v743_v7 = vld [vmem:[%s7594_s5 + $0xe30] sm:$0xff] }
 0x267   : > { %5559 = vmatpush1.bf16.msra.mxu1 %v6575_v12  ;;  %v6624_v12 = vcombine.high %v739_v6, %v743_v7  ;;  %v619_v13 = vld [vmem:[%s7594_s5 + $0xa50] sm:$0xff]  ;;  %v6623_v43 = vcombine.low %v739_v6, %v743_v7 }
 0x268   : > { %5560 = vmatprep.subr.bf16.mxu1 %v6584_v40  ;;  %v623_v40 = vld [vmem:[%s7594_s5 + $0xa70] sm:$0xff] }
 0x269   : > { %5520 = vmatpush1.bf16.msra.mxu0 %v6455_v16  ;;  %v747_v25 = vld [vmem:[%s7594_s5 + $0xe50] sm:$0xff]  ;;  %v6504_v16 = vcombine.high %v619_v13, %v623_v40  ;;  %v6503_v54 = vcombine.low %v619_v13, %v623_v40 }
 0x26a   : > { %5521 = vmatprep.subr.bf16.mxu0 %v6464_v18  ;;  %v751_v14 = vld [vmem:[%s7594_s5 + $0xe70] sm:$0xff] }
 0x26b   : > { %5561 = vmatpush1.bf16.msra.mxu1 %v6583_v55  ;;  %v6632_v55 = vcombine.high %v747_v25, %v751_v14  ;;  %v627_v18 = vld [vmem:[%s7594_s5 + $0xa90] sm:$0xff]  ;;  %v6631_v26 = vcombine.low %v747_v25, %v751_v14 }
 0x26c   : > { %5562 = vmatprep.subr.bf16.mxu1 %v6592_v19  ;;  %v631_v19 = vld [vmem:[%s7594_s5 + $0xab0] sm:$0xff] }
 0x26d   : > { %5522 = vmatpush1.bf16.msra.mxu0 %v6463_v34  ;;  %v755_v22 = vld [vmem:[%s7594_s5 + $0xe90] sm:$0xff]  ;;  %v6512_v34 = vcombine.high %v627_v18, %v631_v19  ;;  %v6511_v33 = vcombine.low %v627_v18, %v631_v19 }
 0x26e   : > { %5523 = vmatprep.subr.bf16.mxu0 %v6472_v39  ;;  %v759_v24 = vld [vmem:[%s7594_s5 + $0xeb0] sm:$0xff] }
 0x26f   : > { %5563 = vmatpush1.bf16.msra.mxu1 %v6591_v27  ;;  %v5219_v44 = vpop.f32.mrb[12].mxu0  ;;  %v6640_v27 = vcombine.high %v755_v22, %v759_v24  ;;  %v635_v39 = vld [vmem:[%s7594_s5 + $0xad0] sm:$0xff]  ;;  %v6639_v35 = vcombine.low %v755_v22, %v759_v24 }
 0x270   : > { %5564 = vmatprep.subr.bf16.mxu1 %v6600_v29  ;;  %v5221_v23 = vpop.f32.mrb[13].mxu0  ;;  %v639_v29 = vld [vmem:[%s7594_s5 + $0xaf0] sm:$0xff] }
 0x271   : > { %v5260_v47 = vpop.f32.mrb[12].mxu1  ;;  %v5223_v56 = vpop.f32.mrb[14].mxu0  ;;  %5524 = vmatpush1.bf16.msra.mxu0 %v6471_v36  ;;  %v763_v31 = vld [vmem:[%s7594_s5 + $0xed0] sm:$0xff]  ;;  %v6520_v36 = vcombine.high %v635_v39, %v639_v29  ;;  %v6519_v46 = vcombine.low %v635_v39, %v639_v29 }
 0x272   : > { %v8220_v52 = vadd.f32 %v5260_v47, %v5219_v44  ;;  %v5262_v53 = vpop.f32.mrb[13].mxu1  ;;  %v5224_v62 = vpop.f32.mrb[15].mxu0  ;;  %5525 = vmatprep.subr.bf16.mxu0 %v6480_v42  ;;  %v767_v32 = vld [vmem:[%s7594_s5 + $0xef0] sm:$0xff] }
 0x273   : > { %v8222_v58 = vadd.f32 %v5262_v53, %v5221_v23  ;;  %v5264_v61 = vpop.f32.mrb[14].mxu1  ;;  %5565 = vmatpush1.bf16.msra.mxu1 %v6599_v38  ;;  %v6648_v38 = vcombine.high %v763_v31, %v767_v32  ;;  %v643_v42 = vld [vmem:[%s7594_s5 + $0xb10] sm:$0xff]  ;;  %v6647_v47 = vcombine.low %v763_v31, %v767_v32 }
 0x274   : > { %v5265_v1 = vpop.f32.mrb[15].mxu1  ;;  %5566 = vmatprep.subr.bf16.mxu1 %v6608_v45  ;;  %v647_v44 = vld [vmem:[%s7594_s5 + $0xb30] sm:$0xff] }
 0x275   : > { %5526 = vmatpush1.bf16.msra.mxu0 %v6479_v57  ;;  %v771_v45 = vld [vmem:[%s7594_s5 + $0xf10] sm:$0xff]  ;;  %v6528_v23 = vcombine.high %v643_v42, %v647_v44  ;;  %v6527_v61 = vcombine.low %v643_v42, %v647_v44 }
 0x276   : > { %5527 = vmatprep.subr.bf16.mxu0 %v6488_v0  ;;  %v775_v20 = vld [vmem:[%s7594_s5 + $0xf30] sm:$0xff] }
 0x277   : > { %5567 = vmatpush1.bf16.msra.mxu1 %v6607_v63  ;;  %v6656_v49 = vcombine.high %v771_v45, %v775_v20  ;;  %v651_v51 = vld [vmem:[%s7594_s5 + $0xb50] sm:$0xff]  ;;  %v6655_v62 = vcombine.low %v771_v45, %v775_v20 }
 0x278   : > { %5568 = vmatprep.subr.bf16.mxu1 %v6616_v2  ;;  %v655_v53 = vld [vmem:[%s7594_s5 + $0xb70] sm:$0xff] }
 0x279   : > { %5528 = vmatpush1.bf16.msra.mxu0 %v6487_v9  ;;  %v779_v56 = vld [vmem:[%s7594_s5 + $0xf50] sm:$0xff]  ;;  %v6536_v63 = vcombine.high %v651_v51, %v655_v53  ;;  %v6535_v6 = vcombine.low %v651_v51, %v655_v53 }
 0x27a   : > { %5529 = vmatprep.subr.bf16.mxu0 %v6496_v11  ;;  %v783_v57 = vld [vmem:[%s7594_s5 + $0xf70] sm:$0xff] }
 0x27b   : > { %5569 = vmatpush1.bf16.msra.mxu1 %v6615_v10  ;;  %v6664_v0 = vcombine.high %v779_v56, %v783_v57  ;;  %v659_v1 = vld [vmem:[%s7594_s5 + $0xb90] sm:$0xff]  ;;  %v6663_v7 = vcombine.low %v779_v56, %v783_v57 }
 0x27c   : > { %5570 = vmatprep.subr.bf16.mxu1 %v6624_v12  ;;  %v663_v2 = vld [vmem:[%s7594_s5 + $0xbb0] sm:$0xff] }
 0x27d   : > { %5530 = vmatpush1.bf16.msra.mxu0 %v6495_v15  ;;  %v787_v3 = vld [vmem:[%s7594_s5 + $0xf90] sm:$0xff]  ;;  %v6544_v9 = vcombine.high %v659_v1, %v663_v2  ;;  %v6543_v25 = vcombine.low %v659_v1, %v663_v2 }
 0x27e   : > { %5531 = vmatprep.subr.bf16.mxu0 %v6504_v16  ;;  %v791_v4 = vld [vmem:[%s7594_s5 + $0xfb0] sm:$0xff] }
 0x27f   : > { %5571 = vmatpush1.bf16.msra.mxu1 %v6623_v43  ;;  %v6672_v10 = vcombine.high %v787_v3, %v791_v4  ;;  %v667_v11 = vld [vmem:[%s7594_s5 + $0xbd0] sm:$0xff]  ;;  %v6671_v14 = vcombine.low %v787_v3, %v791_v4 }
 0x280   : > { %5572 = vmatprep.subr.bf16.mxu1 %v6632_v55  ;;  %v671_v12 = vld [vmem:[%s7594_s5 + $0xbf0] sm:$0xff] }
 0x281   : > { %5532 = vmatpush1.bf16.msra.mxu0 %v6503_v54  ;;  %v795_v13 = vld [vmem:[%s7594_s5 + $0xfd0] sm:$0xff]  ;;  %v6552_v15 = vcombine.high %v667_v11, %v671_v12  ;;  %v6551_v22 = vcombine.low %v667_v11, %v671_v12 }
 0x282   : > { %5533 = vmatprep.subr.bf16.mxu0 %v6512_v34  ;;  %v799_v40 = vld [vmem:[%s7594_s5 + $0xff0] sm:$0xff] }
 0x283   : > { %5573 = vmatpush1.bf16.msra.mxu1 %v6631_v26  ;;  %v6680_v43 = vcombine.high %v795_v13, %v799_v40  ;;  %v803_v16 = vld [vmem:[%s7594_s5 + $0x1010] sm:$0xff]  ;;  %v6679_v24 = vcombine.low %v795_v13, %v799_v40 }
 0x284   : > { %5574 = vmatprep.subr.bf16.mxu1 %v6640_v27  ;;  %v807_v55 = vld [vmem:[%s7594_s5 + $0x1030] sm:$0xff] }
 0x285   : > { %5534 = vmatpush1.bf16.msra.mxu0 %v6511_v33  ;;  %v931_v18 = vld [vmem:[%s7594_s5 + $0x1410] sm:$0xff]  ;;  %v6688_v54 = vcombine.high %v803_v16, %v807_v55  ;;  %v6687_v31 = vcombine.low %v803_v16, %v807_v55 }
 0x286   : > { %5535 = vmatprep.subr.bf16.mxu0 %v6520_v36  ;;  %v935_v19 = vld [vmem:[%s7594_s5 + $0x1430] sm:$0xff] }
 0x287   : > { %5575 = vmatpush1.bf16.msra.mxu1 %v6639_v35  ;;  %v6816_v26 = vcombine.high %v931_v18, %v935_v19  ;;  %v811_v34 = vld [vmem:[%s7594_s5 + $0x1050] sm:$0xff]  ;;  %v6815_v32 = vcombine.low %v931_v18, %v935_v19 }
 0x288   : > { %5576 = vmatprep.subr.bf16.mxu1 %v6648_v38  ;;  %v815_v27 = vld [vmem:[%s7594_s5 + $0x1070] sm:$0xff] }
 0x289   : > { %5536 = vmatpush1.bf16.msra.mxu0 %v6519_v46  ;;  %v939_v39 = vld [vmem:[%s7594_s5 + $0x1450] sm:$0xff]  ;;  %v6696_v33 = vcombine.high %v811_v34, %v815_v27  ;;  %v6695_v45 = vcombine.low %v811_v34, %v815_v27 }
 0x28a   : > { %5537 = vmatprep.subr.bf16.mxu0 %v6528_v23  ;;  %v943_v29 = vld [vmem:[%s7594_s5 + $0x1470] sm:$0xff] }
 0x28b   : > { %5577 = vmatpush1.bf16.msra.mxu1 %v6647_v47  ;;  %v6824_v35 = vcombine.high %v939_v39, %v943_v29  ;;  %v819_v36 = vld [vmem:[%s7594_s5 + $0x1090] sm:$0xff]  ;;  %v6823_v20 = vcombine.low %v939_v39, %v943_v29 }
 0x28c   : > { %5578 = vmatprep.subr.bf16.mxu1 %v6656_v49  ;;  %v823_v38 = vld [vmem:[%s7594_s5 + $0x10b0] sm:$0xff] }
 0x28d   : > { %5538 = vmatpush1.bf16.msra.mxu0 %v6527_v61  ;;  %v947_v42 = vld [vmem:[%s7594_s5 + $0x1490] sm:$0xff]  ;;  %v6704_v46 = vcombine.high %v819_v36, %v823_v38  ;;  %v6703_v56 = vcombine.low %v819_v36, %v823_v38 }
 0x28e   : > { %5539 = vmatprep.subr.bf16.mxu0 %v6536_v63  ;;  %v951_v44 = vld [vmem:[%s7594_s5 + $0x14b0] sm:$0xff] }
 0x28f   : > { %5579 = vmatpush1.bf16.msra.mxu1 %v6655_v62  ;;  %v6832_v47 = vcombine.high %v947_v42, %v951_v44  ;;  %v827_v23 = vld [vmem:[%s7594_s5 + $0x10d0] sm:$0xff]  ;;  %v6831_v57 = vcombine.low %v947_v42, %v951_v44 }
 0x290   : > { %5580 = vmatprep.subr.bf16.mxu1 %v6664_v0  ;;  %v831_v49 = vld [vmem:[%s7594_s5 + $0x10f0] sm:$0xff] }
 0x291   : > { %5540 = vmatpush1.bf16.msra.mxu0 %v6535_v6  ;;  %v955_v51 = vld [vmem:[%s7594_s5 + $0x14d0] sm:$0xff]  ;;  %v6712_v61 = vcombine.high %v827_v23, %v831_v49  ;;  %v6711_v3 = vcombine.low %v827_v23, %v831_v49 }
 0x292   : > { %5541 = vmatprep.subr.bf16.mxu0 %v6544_v9  ;;  %v959_v53 = vld [vmem:[%s7594_s5 + $0x14f0] sm:$0xff] }
 0x293   : > { %5581 = vmatpush1.bf16.msra.mxu1 %v6663_v7  ;;  %v6840_v62 = vcombine.high %v955_v51, %v959_v53  ;;  %v835_v63 = vld [vmem:[%s7594_s5 + $0x1110] sm:$0xff]  ;;  %v6839_v4 = vcombine.low %v955_v51, %v959_v53 }
 0x294   : > { %5582 = vmatprep.subr.bf16.mxu1 %v6672_v10  ;;  %v839_v0 = vld [vmem:[%s7594_s5 + $0x1130] sm:$0xff] }
 0x295   : > { %5542 = vmatpush1.bf16.msra.mxu0 %v6543_v25  ;;  %v963_v1 = vld [vmem:[%s7594_s5 + $0x1510] sm:$0xff]  ;;  %v6720_v6 = vcombine.high %v835_v63, %v839_v0  ;;  %v6719_v13 = vcombine.low %v835_v63, %v839_v0 }
 0x296   : > { %5543 = vmatprep.subr.bf16.mxu0 %v6552_v15  ;;  %v967_v2 = vld [vmem:[%s7594_s5 + $0x1530] sm:$0xff] }
 0x297   : > { %5583 = vmatpush1.bf16.msra.mxu1 %v6671_v14  ;;  %v6848_v7 = vcombine.high %v963_v1, %v967_v2  ;;  %v843_v9 = vld [vmem:[%s7594_s5 + $0x1150] sm:$0xff]  ;;  %v6847_v40 = vcombine.low %v963_v1, %v967_v2 }
 0x298   : > { %5584 = vmatprep.subr.bf16.mxu1 %v6680_v43  ;;  %v847_v10 = vld [vmem:[%s7594_s5 + $0x1170] sm:$0xff] }
 0x299   : > { %5544 = vmatpush1.bf16.msra.mxu0 %v6551_v22  ;;  %v971_v11 = vld [vmem:[%s7594_s5 + $0x1550] sm:$0xff]  ;;  %v6728_v25 = vcombine.high %v843_v9, %v847_v10  ;;  %v6727_v18 = vcombine.low %v843_v9, %v847_v10 }
 0x29a   : > { %5595 = vmatprep.subr.bf16.mxu0 %v6688_v54  ;;  %v975_v12 = vld [vmem:[%s7594_s5 + $0x1570] sm:$0xff] }
 0x29b   : > { %5585 = vmatpush1.bf16.msra.mxu1 %v6679_v24  ;;  %v6856_v14 = vcombine.high %v971_v11, %v975_v12  ;;  %v851_v15 = vld [vmem:[%s7594_s5 + $0x1190] sm:$0xff]  ;;  %v6855_v19 = vcombine.low %v971_v11, %v975_v12 }
 0x29c   : > { %5636 = vmatprep.subr.bf16.mxu1 %v6816_v26  ;;  %5546 = vmatmul.mubr.bf16.vlgmr.msra.gmra.mrb[28].mxu0 %v7806_v37  ;;  %v855_v43 = vld [vmem:[%s7594_s5 + $0x11b0] sm:$0xff] }
 0x29d   : > { %5596 = vmatpush1.bf16.msra.mxu0 %v6687_v31  ;;  %5627 = vmatprep.mubr.bf16.mxu0 %v7824_v48  ;;  %v979_v16 = vld [vmem:[%s7594_s5 + $0x1590] sm:$0xff]  ;;  %v6736_v22 = vcombine.high %v851_v15, %v855_v43  ;;  %v6735_v38 = vcombine.low %v851_v15, %v855_v43 }
 0x29e   : > { %5587 = vmatmul.mubr.bf16.vlgmr.msra.gmra.mrb[28].mxu1 %v7815_v41  ;;  %5597 = vmatprep.subr.bf16.mxu0 %v6696_v33  ;;  %v983_v55 = vld [vmem:[%s7594_s5 + $0x15b0] sm:$0xff] }
 0x29f   : > { %5637 = vmatpush1.bf16.msra.mxu1 %v6815_v32  ;;  %5668 = vmatprep.mubr.bf16.mxu1 %v7831_v50  ;;  %v6864_v54 = vcombine.high %v979_v16, %v983_v55  ;;  %v859_v26 = vld [vmem:[%s7594_s5 + $0x11d0] sm:$0xff] }
 0x2a0   : > { %5638 = vmatprep.subr.bf16.mxu1 %v6824_v35  ;;  %v863_v34 = vld [vmem:[%s7594_s5 + $0x11f0] sm:$0xff] }
 0x2a1   : > { %5598 = vmatpush1.bf16.msra.mxu0 %v6695_v45  ;;  %v987_v31 = vld [vmem:[%s7594_s5 + $0x15d0] sm:$0xff] }
 0x2a2   : > { %5599 = vmatprep.subr.bf16.mxu0 %v6704_v46  ;;  %v991_v32 = vld [vmem:[%s7594_s5 + $0x15f0] sm:$0xff] }
 0x2a3   : > { %5639 = vmatpush1.bf16.msra.mxu1 %v6823_v20  ;;  %v6744_v20 = vcombine.high %v859_v26, %v863_v34  ;;  %v867_v23 = vld [vmem:[%s7594_s5 + $0x1210] sm:$0xff] }
 0x2a4   : > { %5640 = vmatprep.subr.bf16.mxu1 %v6832_v47  ;;  %v6872_v47 = vcombine.high %v987_v31, %v991_v32  ;;  %v871_v49 = vld [vmem:[%s7594_s5 + $0x1230] sm:$0xff] }
 0x2a5   : > { %5600 = vmatpush1.bf16.msra.mxu0 %v6703_v56  ;;  %v995_v51 = vld [vmem:[%s7594_s5 + $0x1610] sm:$0xff]  ;;  %v6743_v56 = vcombine.low %v859_v26, %v863_v34 }
 0x2a6   : > { %5601 = vmatprep.subr.bf16.mxu0 %v6712_v61  ;;  %v999_v53 = vld [vmem:[%s7594_s5 + $0x1630] sm:$0xff]  ;;  %v6752_v61 = vcombine.high %v867_v23, %v871_v49 }
 0x2a7   : > { %5641 = vmatpush1.bf16.msra.mxu1 %v6831_v57  ;;  %v6871_v57 = vcombine.low %v987_v31, %v991_v32  ;;  %v875_v63 = vld [vmem:[%s7594_s5 + $0x1250] sm:$0xff] }
 0x2a8   : > { %5642 = vmatprep.subr.bf16.mxu1 %v6840_v62  ;;  %v6880_v62 = vcombine.high %v995_v51, %v999_v53  ;;  %v879_v0 = vld [vmem:[%s7594_s5 + $0x1270] sm:$0xff] }
 0x2a9   : > { %5602 = vmatpush1.bf16.msra.mxu0 %v6711_v3  ;;  %v1003_v1 = vld [vmem:[%s7594_s5 + $0x1650] sm:$0xff]  ;;  %v6751_v3 = vcombine.low %v867_v23, %v871_v49 }
 0x2aa   : > { %5603 = vmatprep.subr.bf16.mxu0 %v6720_v6  ;;  %v1007_v2 = vld [vmem:[%s7594_s5 + $0x1670] sm:$0xff]  ;;  %v6760_v6 = vcombine.high %v875_v63, %v879_v0 }
 0x2ab   : > { %5643 = vmatpush1.bf16.msra.mxu1 %v6839_v4  ;;  %v6879_v4 = vcombine.low %v995_v51, %v999_v53  ;;  %v883_v9 = vld [vmem:[%s7594_s5 + $0x1290] sm:$0xff] }
 0x2ac   : > { %5644 = vmatprep.subr.bf16.mxu1 %v6848_v7  ;;  %v6888_v7 = vcombine.high %v1003_v1, %v1007_v2  ;;  %v887_v10 = vld [vmem:[%s7594_s5 + $0x12b0] sm:$0xff] }
 0x2ad   : > { %5604 = vmatpush1.bf16.msra.mxu0 %v6719_v13  ;;  %v1011_v11 = vld [vmem:[%s7594_s5 + $0x1690] sm:$0xff]  ;;  %v6759_v13 = vcombine.low %v875_v63, %v879_v0 }
 0x2ae   : > { %5605 = vmatprep.subr.bf16.mxu0 %v6728_v25  ;;  %v1015_v12 = vld [vmem:[%s7594_s5 + $0x16b0] sm:$0xff]  ;;  %v6768_v25 = vcombine.high %v883_v9, %v887_v10 }
 0x2af   : > { %5645 = vmatpush1.bf16.msra.mxu1 %v6847_v40  ;;  %v5301_v24 = vpop.f32.mrb[16].mxu0  ;;  %v6887_v40 = vcombine.low %v1003_v1, %v1007_v2  ;;  %v891_v15 = vld [vmem:[%s7594_s5 + $0x12d0] sm:$0xff] }
 0x2b0   : > { %5646 = vmatprep.subr.bf16.mxu1 %v6856_v14  ;;  %v5302_v27 = vadd.f32 %v5301_v24, %v8220_v52  ;;  %v5303_v29 = vpop.f32.mrb[17].mxu0  ;;  %v6863_v52 = vcombine.low %v979_v16, %v983_v55  ;;  %v6896_v14 = vcombine.high %v1011_v11, %v1015_v12  ;;  %v895_v43 = vld [vmem:[%s7594_s5 + $0x12f0] sm:$0xff] }
 0x2b1   : > { %v5342_v39 = vpop.f32.mrb[16].mxu1  ;;  %v5304_v33 = vadd.f32 %v5303_v29, %v8222_v58  ;;  %v5305_v36 = vpop.f32.mrb[18].mxu0  ;;  %5606 = vmatpush1.bf16.msra.mxu0 %v6727_v18  ;;  %v1019_v16 = vld [vmem:[%s7594_s5 + $0x16d0] sm:$0xff]  ;;  %v6767_v18 = vcombine.low %v883_v9, %v887_v10  ;;  %v420_v9 = vld [vmem:[%s7594_s5 + $0x418] sm:$0xff] }
 0x2b2   : > { %v5344_v35 = vpop.f32.mrb[17].mxu1  ;;  %v8294_v42 = vadd.f32 %v5342_v39, %v5302_v27  ;;  %v5306_v45 = vpop.f32.mrb[19].mxu0  ;;  %5607 = vmatprep.subr.bf16.mxu0 %v6736_v22  ;;  %v1023_v55 = vld [vmem:[%s7594_s5 + $0x16f0] sm:$0xff]  ;;  %v6776_v22 = vcombine.high %v891_v15, %v895_v43  ;;  %v6775_v39 = vcombine.low %v891_v15, %v895_v43  ;;  %v424_v10 = vld [vmem:[%s7594_s5 + $0x438] sm:$0xff] }
 0x2b3   : > { %v5346_v44 = vpop.f32.mrb[18].mxu1  ;;  %5647 = vmatpush1.bf16.msra.mxu1 %v6855_v19  ;;  %v8296_v46 = vadd.f32 %v5344_v35, %v5304_v33  ;;  %v6895_v19 = vcombine.low %v1011_v11, %v1015_v12  ;;  %v6904_v24 = vcombine.high %v1019_v16, %v1023_v55  ;;  %v903_v26 = vld [vmem:[%s7594_s5 + $0x1330] sm:$0xff]  ;;  %v6903_v29 = vcombine.low %v1019_v16, %v1023_v55  ;;  %v428_v15 = vld [vmem:[%s7594_s5 + $0x458] sm:$0xff] }
 0x2b4   : > { %v5347_v58 = vpop.f32.mrb[19].mxu1  ;;  %5648 = vmatprep.subr.bf16.mxu1 %v6864_v54  ;;  %v899_v54 = vld [vmem:[%s7594_s5 + $0x1310] sm:$0xff]  ;;  %v432_v43 = vld [vmem:[%s7594_s5 + $0x478] sm:$0xff]  ;;  %v6305_v55 = vcombine.low %v420_v9, %v424_v10 }
 0x2b5   : > { %5608 = vmatpush1.bf16.msra.mxu0 %v6735_v38  ;;  %v1027_v34 = vld [vmem:[%s7594_s5 + $0x1710] sm:$0xff]  ;;  %v6784_v31 = vcombine.high %v899_v54, %v903_v26  ;;  %v6783_v44 = vcombine.low %v899_v54, %v903_v26  ;;  %v436_v54 = vld [vmem:[%s7594_s5 + $0x498] sm:$0xff] }
 0x2b6   : > { %5609 = vmatprep.subr.bf16.mxu0 %v6744_v20  ;;  %v1031_v27 = vld [vmem:[%s7594_s5 + $0x1730] sm:$0xff]  ;;  %v440_v26 = vld [vmem:[%s7594_s5 + $0x4b8] sm:$0xff] }
 0x2b7   : > { %5649 = vmatpush1.bf16.msra.mxu1 %v6863_v52  ;;  %v6912_v32 = vcombine.high %v1027_v34, %v1031_v27  ;;  %v907_v33 = vld [vmem:[%s7594_s5 + $0x1350] sm:$0xff]  ;;  %v6911_v45 = vcombine.low %v1027_v34, %v1031_v27  ;;  %v6313_v27 = vcombine.low %v428_v15, %v432_v43 }
 0x2b8   : > { %5650 = vmatprep.subr.bf16.mxu1 %v6872_v47  ;;  %v911_v35 = vld [vmem:[%s7594_s5 + $0x1370] sm:$0xff] }
 0x2b9   : > { %5610 = vmatpush1.bf16.msra.mxu0 %v6743_v56  ;;  %v1035_v36 = vld [vmem:[%s7594_s5 + $0x1750] sm:$0xff]  ;;  %v6792_v52 = vcombine.high %v907_v33, %v911_v35  ;;  %v6791_v51 = vcombine.low %v907_v33, %v911_v35  ;;  %v444_v33 = vld [vmem:[%s7594_s5 + $0x4d8] sm:$0xff] }
 0x2ba   : > { %5611 = vmatprep.subr.bf16.mxu0 %v6752_v61  ;;  %v1039_v38 = vld [vmem:[%s7594_s5 + $0x1770] sm:$0xff]  ;;  %v448_v35 = vld [vmem:[%s7594_s5 + $0x4f8] sm:$0xff] }
 0x2bb   : > { %5651 = vmatpush1.bf16.msra.mxu1 %v6871_v57  ;;  %v6920_v20 = vcombine.high %v1035_v36, %v1039_v38  ;;  %v915_v58 = vld [vmem:[%s7594_s5 + $0x1390] sm:$0xff]  ;;  %v6919_v53 = vcombine.low %v1035_v36, %v1039_v38  ;;  %v6321_v38 = vcombine.low %v436_v54, %v440_v26 }
 0x2bc   : > { %5652 = vmatprep.subr.bf16.mxu1 %v6880_v62  ;;  %v919_v47 = vld [vmem:[%s7594_s5 + $0x13b0] sm:$0xff] }
 0x2bd   : > { %5612 = vmatpush1.bf16.msra.mxu0 %v6751_v3  ;;  %v1043_v23 = vld [vmem:[%s7594_s5 + $0x1790] sm:$0xff]  ;;  %v6800_v56 = vcombine.high %v915_v58, %v919_v47  ;;  %v6799_v1 = vcombine.low %v915_v58, %v919_v47  ;;  %v452_v58 = vld [vmem:[%s7594_s5 + $0x518] sm:$0xff] }
 0x2be   : > { %5613 = vmatprep.subr.bf16.mxu0 %v6760_v6  ;;  %v1047_v49 = vld [vmem:[%s7594_s5 + $0x17b0] sm:$0xff]  ;;  %v292_v6 = vld [vmem:[%s7594_s5 + $0x18] sm:$0xff] }
 0x2bf   : > { %5653 = vmatpush1.bf16.msra.mxu1 %v6879_v4  ;;  %v6928_v57 = vcombine.high %v1043_v23, %v1047_v49  ;;  %v923_v61 = vld [vmem:[%s7594_s5 + $0x13d0] sm:$0xff]  ;;  %v6927_v2 = vcombine.low %v1043_v23, %v1047_v49 }
 0x2c0   : > { %5654 = vmatprep.subr.bf16.mxu1 %v6888_v7  ;;  %v927_v62 = vld [vmem:[%s7594_s5 + $0x13f0] sm:$0xff]  ;;  %v296_v7 = vld [vmem:[%s7594_s5 + $0x38] sm:$0xff] }
 0x2c1   : > { %5614 = vmatpush1.bf16.msra.mxu0 %v6759_v13  ;;  %v1051_v63 = vld [vmem:[%s7594_s5 + $0x17d0] sm:$0xff]  ;;  %v6808_v3 = vcombine.high %v923_v61, %v927_v62  ;;  %v6807_v11 = vcombine.low %v923_v61, %v927_v62  ;;  %v6178_v13 = vcombine.high %v292_v6, %v296_v7  ;;  %v6177_v16 = vcombine.low %v292_v6, %v296_v7 }
 0x2c2   : > { %5615 = vmatprep.subr.bf16.mxu0 %v6768_v25  ;;  %v1055_v0 = vld [vmem:[%s7594_s5 + $0x17f0] sm:$0xff]  ;;  %v300_v25 = vld [vmem:[%s7594_s5 + $0x58] sm:$0xff] }
 0x2c3   : > { %5655 = vmatpush1.bf16.msra.mxu1 %v6887_v40  ;;  %v6936_v4 = vcombine.high %v1051_v63, %v1055_v0  ;;  %v6935_v12 = vcombine.low %v1051_v63, %v1055_v0  ;;  %v6306_v40 = vcombine.high %v420_v9, %v424_v10 }
 0x2c4   : > { %5656 = vmatprep.subr.bf16.mxu1 %v6896_v14  ;;  %v304_v14 = vld [vmem:[%s7594_s5 + $0x78] sm:$0xff] }
 0x2c5   : > { %5616 = vmatpush1.bf16.msra.mxu0 %v6767_v18  ;;  %v6186_v18 = vcombine.high %v300_v25, %v304_v14  ;;  %v6185_v34 = vcombine.low %v300_v25, %v304_v14 }
 0x2c6   : > { %5617 = vmatprep.subr.bf16.mxu0 %v6776_v22  ;;  %v308_v22 = vld [vmem:[%s7594_s5 + $0x98] sm:$0xff] }
 0x2c7   : > { %5657 = vmatpush1.bf16.msra.mxu1 %v6895_v19  ;;  %v6314_v19 = vcombine.high %v428_v15, %v432_v43  ;;  %v476_v15 = vld [vmem:[%s7594_s5 + $0x5d8] sm:$0xff] }
 0x2c8   : > { %5658 = vmatprep.subr.bf16.mxu1 %v6904_v24  ;;  %v312_v24 = vld [vmem:[%s7594_s5 + $0xb8] sm:$0xff] }
 0x2c9   : > { %5618 = vmatpush1.bf16.msra.mxu0 %v6775_v39  ;;  %v6194_v39 = vcombine.high %v308_v22, %v312_v24  ;;  %v6193_v36 = vcombine.low %v308_v22, %v312_v24  ;;  %v480_v43 = vld [vmem:[%s7594_s5 + $0x5f8] sm:$0xff] }
 0x2ca   : > { %5619 = vmatprep.subr.bf16.mxu0 %v6784_v31  ;;  %v316_v31 = vld [vmem:[%s7594_s5 + $0xd8] sm:$0xff] }
 0x2cb   : > { %5659 = vmatpush1.bf16.msra.mxu1 %v6903_v29  ;;  %v6322_v29 = vcombine.high %v436_v54, %v440_v26  ;;  %v274_v54 = vld [vmem:[%s7611_s4 + $0x18] sm:$0xff] }
 0x2cc   : > { %5660 = vmatprep.subr.bf16.mxu1 %v6912_v32  ;;  %v320_v32 = vld [vmem:[%s7594_s5 + $0xf8] sm:$0xff] }
 0x2cd   : > { %5620 = vmatpush1.bf16.msra.mxu0 %v6783_v44  ;;  %v6202_v44 = vcombine.high %v316_v31, %v320_v32  ;;  %v6201_v47 = vcombine.low %v316_v31, %v320_v32  ;;  %v356_v31 = vld [vmem:[%s7594_s5 + $0x218] sm:$0xff] }
 0x2ce   : > { %5621 = vmatprep.subr.bf16.mxu0 %v6792_v52  ;;  %v324_v52 = vld [vmem:[%s7594_s5 + $0x118] sm:$0xff] }
 0x2cf   : > { %5661 = vmatpush1.bf16.msra.mxu1 %v6911_v45  ;;  %v6330_v45 = vcombine.high %v444_v33, %v448_v35  ;;  %v360_v32 = vld [vmem:[%s7594_s5 + $0x238] sm:$0xff] }
 0x2d0   : > { %5662 = vmatprep.subr.bf16.mxu1 %v6920_v20  ;;  %v328_v20 = vld [vmem:[%s7594_s5 + $0x138] sm:$0xff] }
 0x2d1   : > { %5622 = vmatpush1.bf16.msra.mxu0 %v6791_v51  ;;  %v6210_v23 = vcombine.high %v324_v52, %v328_v20  ;;  %v332_v51 = vld [vmem:[%s7594_s5 + $0x158] sm:$0xff]  ;;  %v6209_v61 = vcombine.low %v324_v52, %v328_v20  ;;  %v6242_v52 = vcombine.high %v356_v31, %v360_v32 }
 0x2d2   : > { %5623 = vmatprep.subr.bf16.mxu0 %v6800_v56  ;;  %v460_v56 = vld [vmem:[%s7594_s5 + $0x558] sm:$0xff] }
 0x2d3   : > { %5663 = vmatpush1.bf16.msra.mxu1 %v6919_v53  ;;  %v336_v53 = vld [vmem:[%s7594_s5 + $0x178] sm:$0xff] }
 0x2d4   : > { %5664 = vmatprep.subr.bf16.mxu1 %v6928_v57  ;;  %v464_v57 = vld [vmem:[%s7594_s5 + $0x578] sm:$0xff]  ;;  %v6218_v63 = vcombine.high %v332_v51, %v336_v53  ;;  %v6217_v6 = vcombine.low %v332_v51, %v336_v53 }
 0x2d5   : > { %5624 = vmatpush1.bf16.msra.mxu0 %v6799_v1  ;;  %v6346_v0 = vcombine.high %v460_v56, %v464_v57  ;;  %v340_v1 = vld [vmem:[%s7594_s5 + $0x198] sm:$0xff]  ;;  %v6345_v7 = vcombine.low %v460_v56, %v464_v57 }
 0x2d6   : > { %5625 = vmatprep.subr.bf16.mxu0 %v6808_v3  ;;  %v468_v3 = vld [vmem:[%s7594_s5 + $0x598] sm:$0xff] }
 0x2d7   : > { %5665 = vmatpush1.bf16.msra.mxu1 %v6927_v2  ;;  %v344_v2 = vld [vmem:[%s7594_s5 + $0x1b8] sm:$0xff] }
 0x2d8   : > { %5666 = vmatprep.subr.bf16.mxu1 %v6936_v4  ;;  %v472_v4 = vld [vmem:[%s7594_s5 + $0x5b8] sm:$0xff]  ;;  %v6226_v9 = vcombine.high %v340_v1, %v344_v2  ;;  %v6225_v22 = vcombine.low %v340_v1, %v344_v2 }
 0x2d9   : > { %5626 = vmatpush1.bf16.msra.mxu0 %v6807_v11  ;;  %v6354_v11 = vcombine.high %v468_v3, %v472_v4  ;;  %v372_v56 = vld [vmem:[%s7594_s5 + $0x298] sm:$0xff] }
 0x2da   : > { %5677 = vmatprep.subr.bf16.mxu0 %v6178_v13  ;;  %v352_v13 = vld [vmem:[%s7594_s5 + $0x1f8] sm:$0xff] }
 0x2db   : > { %5667 = vmatpush1.bf16.msra.mxu1 %v6935_v12  ;;  %v348_v12 = vld [vmem:[%s7594_s5 + $0x1d8] sm:$0xff] }
 0x2dc   : > { %5718 = vmatprep.subr.bf16.mxu1 %v6306_v40  ;;  %5628 = vmatmul.mubr.bf16.vlgmr.msra.gmra.mrb[32].mxu0 %v7896_v5  ;;  %v376_v57 = vld [vmem:[%s7594_s5 + $0x2b8] sm:$0xff] }
 0x2dd   : > { %5678 = vmatpush1.bf16.msra.mxu0 %v6177_v16  ;;  %5709 = vmatprep.mubr.bf16.mxu0 %v7666_v59  ;;  %v456_v59 = vld [vmem:[%s7594_s5 + $0x538] sm:$0xff]  ;;  %v273_v16 = vld [vmem:[%s7611_s4 + $0x10] sm:$0xff]  ;;  %v6258_v1 = vcombine.high %v372_v56, %v376_v57 }
 0x2de   : > { %5669 = vmatmul.mubr.bf16.vlgmr.msra.gmra.mrb[32].mxu1 %v7902_v8  ;;  %5679 = vmatprep.subr.bf16.mxu0 %v6186_v18  ;;  %v6338_v49 = vcombine.high %v452_v58, %v456_v59  ;;  %v6337_v62 = vcombine.low %v452_v58, %v456_v59  ;;  %v364_v58 = vld [vmem:[%s7594_s5 + $0x258] sm:$0xff] }
 0x2df   : > { %5719 = vmatpush1.bf16.msra.mxu1 %v6305_v55  ;;  %5750 = vmatprep.mubr.bf16.mxu1 %v7670_v60  ;;  %v6329_v60 = vcombine.low %v444_v33, %v448_v35  ;;  %v484_v35 = vld [vmem:[%s7594_s5 + $0x618] sm:$0xff] }
 0x2e0   : > { %5720 = vmatprep.subr.bf16.mxu1 %v6314_v19  ;;  %v368_v59 = vld [vmem:[%s7594_s5 + $0x278] sm:$0xff] }
 0x2e1   : > { %5680 = vmatpush1.bf16.msra.mxu0 %v6185_v34  ;;  %v6353_v34 = vcombine.low %v468_v3, %v472_v4  ;;  %v6250_v51 = vcombine.high %v364_v58, %v368_v59  ;;  %v380_v3 = vld [vmem:[%s7594_s5 + $0x2d8] sm:$0xff] }
 0x2e2   : > { %5681 = vmatprep.subr.bf16.mxu0 %v6194_v39  ;;  %v384_v4 = vld [vmem:[%s7594_s5 + $0x2f8] sm:$0xff] }
 0x2e3   : > { %5721 = vmatpush1.bf16.msra.mxu1 %v6313_v27  ;;  %v6234_v27 = vcombine.high %v348_v12, %v352_v13 }
 0x2e4   : > { %5722 = vmatprep.subr.bf16.mxu1 %v6322_v29 }
 0x2e5   : > { %5682 = vmatpush1.bf16.msra.mxu0 %v6193_v36  ;;  %v488_v36 = vld [vmem:[%s7594_s5 + $0x638] sm:$0xff] }
 0x2e6   : > { %5683 = vmatprep.subr.bf16.mxu0 %v6202_v44  ;;  %v6233_v44 = vcombine.low %v348_v12, %v352_v13  ;;  %v6370_v20 = vcombine.high %v484_v35, %v488_v36  ;;  %v388_v13 = vld [vmem:[%s7594_s5 + $0x318] sm:$0xff] }
 0x2e7   : > { %5723 = vmatpush1.bf16.msra.mxu1 %v6321_v38 }
 0x2e8   : > { %5724 = vmatprep.subr.bf16.mxu1 %v6330_v45  ;;  %v6361_v45 = vcombine.low %v476_v15, %v480_v43 }
 0x2e9   : > { %5684 = vmatpush1.bf16.msra.mxu0 %v6201_v47  ;;  %v492_v47 = vld [vmem:[%s7594_s5 + $0x658] sm:$0xff] }
 0x2ea   : > { %5685 = vmatprep.subr.bf16.mxu0 %v6210_v23  ;;  %v6241_v23 = vcombine.low %v356_v31, %v360_v32 }
 0x2eb   : > { %5725 = vmatpush1.bf16.msra.mxu1 %v6329_v60  ;;  %v496_v60 = vld [vmem:[%s7594_s5 + $0x678] sm:$0xff] }
 0x2ec   : > { %5726 = vmatprep.subr.bf16.mxu1 %v6338_v49  ;;  %v6369_v49 = vcombine.low %v484_v35, %v488_v36  ;;  %v6378_v53 = vcombine.high %v492_v47, %v496_v60  ;;  %v412_v36 = vld [vmem:[%s7594_s5 + $0x3d8] sm:$0xff] }
 0x2ed   : > { %5686 = vmatpush1.bf16.msra.mxu0 %v6209_v61  ;;  %v500_v61 = vld [vmem:[%s7594_s5 + $0x698] sm:$0xff] }
 0x2ee   : > { %5687 = vmatprep.subr.bf16.mxu0 %v6218_v63  ;;  %v6249_v63 = vcombine.low %v364_v58, %v368_v59 }
 0x2ef   : > { %5727 = vmatpush1.bf16.msra.mxu1 %v6337_v62  ;;  %v5383_v10 = vpop.f32.mrb[20].mxu0  ;;  %v504_v62 = vld [vmem:[%s7594_s5 + $0x6b8] sm:$0xff] }
 0x2f0   : > { %5728 = vmatprep.subr.bf16.mxu1 %v6346_v0  ;;  %v5384_v40 = vadd.f32 %v5383_v10, %v8294_v42  ;;  %v5385_v14 = vpop.f32.mrb[21].mxu0  ;;  %v6377_v0 = vcombine.low %v492_v47, %v496_v60  ;;  %v6386_v2 = vcombine.high %v500_v61, %v504_v62  ;;  %v6385_v10 = vcombine.low %v500_v61, %v504_v62  ;;  %v548_v47 = vld [vmem:[%s7594_s5 + $0x818] sm:$0xff] }
 0x2f1   : > { %v5424_v25 = vpop.f32.mrb[20].mxu1  ;;  %v5386_v55 = vadd.f32 %v5385_v14, %v8296_v46  ;;  %v5387_v19 = vpop.f32.mrb[22].mxu0  ;;  %5688 = vmatpush1.bf16.msra.mxu0 %v6217_v6  ;;  %v6362_v46 = vcombine.high %v476_v15, %v480_v43  ;;  %v508_v6 = vld [vmem:[%s7594_s5 + $0x6d8] sm:$0xff]  ;;  %v6265_v15 = vcombine.low %v380_v3, %v384_v4 }
 0x2f2   : > { %v5426_v18 = vpop.f32.mrb[21].mxu1  ;;  %v5425_v24 = vadd.f32 %v5424_v25, %v5384_v40  ;;  %v5388_v42 = vpop.f32.mrb[23].mxu0  ;;  %5689 = vmatprep.subr.bf16.mxu0 %v6226_v9  ;;  %v6257_v9 = vcombine.low %v372_v56, %v376_v57  ;;  %v392_v40 = vld [vmem:[%s7594_s5 + $0x338] sm:$0xff] }
 0x2f3   : > { %v5428_v26 = vpop.f32.mrb[22].mxu1  ;;  %5729 = vmatpush1.bf16.msra.mxu1 %v6345_v7  ;;  %v5427_v39 = vadd.f32 %v5426_v18, %v5386_v55  ;;  %v512_v7 = vld [vmem:[%s7594_s5 + $0x6f8] sm:$0xff] }
 0x2f4   : > { %v5429_v29 = vpop.f32.mrb[23].mxu1  ;;  %5730 = vmatprep.subr.bf16.mxu1 %v6354_v11  ;;  %v5925_v33 = vadd.f32 %v5425_v24, %v273_v16  ;;  %v6266_v11 = vcombine.high %v380_v3, %v384_v4  ;;  %v6394_v12 = vcombine.high %v508_v6, %v512_v7  ;;  %v516_v25 = vld [vmem:[%s7594_s5 + $0x718] sm:$0xff]  ;;  %v6393_v43 = vcombine.low %v508_v6, %v512_v7 }
 0x2f5   : > { %v5926_v38 = vadd.f32 %v5427_v39, %v274_v54  ;;  %5690 = vmatpush1.bf16.msra.mxu0 %v6225_v22  ;;  %v520_v14 = vld [vmem:[%s7594_s5 + $0x738] sm:$0xff]  ;;  %v6274_v16 = vcombine.high %v388_v13, %v392_v40  ;;  %v6273_v54 = vcombine.low %v388_v13, %v392_v40 }
 0x2f6   : > { %5933 = vst [vmem:[%s7611_s4 + $0x10] sm:$0xff] %v5925_v33  ;;  %5691 = vmatprep.subr.bf16.mxu0 %v6234_v27  ;;  %v6402_v55 = vcombine.high %v516_v25, %v520_v14  ;;  %v396_v18 = vld [vmem:[%s7594_s5 + $0x358] sm:$0xff]  ;;  %v6401_v26 = vcombine.low %v516_v25, %v520_v14 }
 0x2f7   : > { %5731 = vmatpush1.bf16.msra.mxu1 %v6353_v34  ;;  %5934 = vst [vmem:[%s7611_s4 + $0x18] sm:$0xff] %v5926_v38  ;;  %v400_v19 = vld [vmem:[%s7594_s5 + $0x378] sm:$0xff] }
 0x2f8   : > { %5732 = vmatprep.subr.bf16.mxu1 %v6362_v46  ;;  %v524_v22 = vld [vmem:[%s7594_s5 + $0x758] sm:$0xff]  ;;  %v6282_v42 = vcombine.high %v396_v18, %v400_v19  ;;  %v6281_v31 = vcombine.low %v396_v18, %v400_v19 }
 0x2f9   : > { %5692 = vmatpush1.bf16.msra.mxu0 %v6233_v44  ;;  %v528_v24 = vld [vmem:[%s7594_s5 + $0x778] sm:$0xff] }
 0x2fa   : > { %5693 = vmatprep.subr.bf16.mxu0 %v6242_v52  ;;  %v6410_v34 = vcombine.high %v524_v22, %v528_v24  ;;  %v404_v27 = vld [vmem:[%s7594_s5 + $0x398] sm:$0xff]  ;;  %v6409_v32 = vcombine.low %v524_v22, %v528_v24 }
 0x2fb   : > { %5733 = vmatpush1.bf16.msra.mxu1 %v6361_v45  ;;  %v408_v39 = vld [vmem:[%s7594_s5 + $0x3b8] sm:$0xff] }
 0x2fc   : > { %5734 = vmatprep.subr.bf16.mxu1 %v6370_v20  ;;  %v532_v29 = vld [vmem:[%s7594_s5 + $0x798] sm:$0xff]  ;;  %v6290_v33 = vcombine.high %v404_v27, %v408_v39  ;;  %v6289_v52 = vcombine.low %v404_v27, %v408_v39 }
 0x2fd   : > { %5694 = vmatpush1.bf16.msra.mxu0 %v6241_v23  ;;  %v536_v46 = vld [vmem:[%s7594_s5 + $0x7b8] sm:$0xff] }
 0x2fe   : > { %5695 = vmatprep.subr.bf16.mxu0 %v6250_v51  ;;  %v6418_v35 = vcombine.high %v532_v29, %v536_v46  ;;  %v416_v38 = vld [vmem:[%s7594_s5 + $0x3f8] sm:$0xff]  ;;  %v6417_v20 = vcombine.low %v532_v29, %v536_v46 }
 0x2ff   : > { %5735 = vmatpush1.bf16.msra.mxu1 %v6369_v49  ;;  %v540_v44 = vld [vmem:[%s7594_s5 + $0x7d8] sm:$0xff]  ;;  %v6298_v58 = vcombine.high %v412_v36, %v416_v38  ;;  %v6297_v51 = vcombine.low %v412_v36, %v416_v38 }
 0x300   : > { %5736 = vmatprep.subr.bf16.mxu1 %v6378_v53  ;;  %v544_v45 = vld [vmem:[%s7594_s5 + $0x7f8] sm:$0xff] }
 0x301   : > { %5696 = vmatpush1.bf16.msra.mxu0 %v6249_v63  ;;  %v6426_v59 = vcombine.high %v540_v44, %v544_v45  ;;  %v552_v60 = vld [vmem:[%s7594_s5 + $0x838] sm:$0xff]  ;;  %v6425_v53 = vcombine.low %v540_v44, %v544_v45 }
 0x302   : > { %5697 = vmatprep.subr.bf16.mxu0 %v6258_v1  ;;  %v676_v23 = vld [vmem:[%s7594_s5 + $0xc18] sm:$0xff]  ;;  %v6434_v56 = vcombine.high %v548_v47, %v552_v60  ;;  %v6433_v1 = vcombine.low %v548_v47, %v552_v60 }
 0x303   : > { %5737 = vmatpush1.bf16.msra.mxu1 %v6377_v0  ;;  %v680_v49 = vld [vmem:[%s7594_s5 + $0xc38] sm:$0xff] }
 0x304   : > { %5738 = vmatprep.subr.bf16.mxu1 %v6386_v2  ;;  %v6562_v57 = vcombine.high %v676_v23, %v680_v49  ;;  %v556_v61 = vld [vmem:[%s7594_s5 + $0x858] sm:$0xff]  ;;  %v6561_v2 = vcombine.low %v676_v23, %v680_v49 }
 0x305   : > { %5698 = vmatpush1.bf16.msra.mxu0 %v6257_v9  ;;  %v560_v62 = vld [vmem:[%s7594_s5 + $0x878] sm:$0xff] }
 0x306   : > { %5699 = vmatprep.subr.bf16.mxu0 %v6266_v11  ;;  %v684_v63 = vld [vmem:[%s7594_s5 + $0xc58] sm:$0xff]  ;;  %v6442_v3 = vcombine.high %v556_v61, %v560_v62  ;;  %v6441_v11 = vcombine.low %v556_v61, %v560_v62 }
 0x307   : > { %5739 = vmatpush1.bf16.msra.mxu1 %v6385_v10  ;;  %v688_v0 = vld [vmem:[%s7594_s5 + $0xc78] sm:$0xff] }
 0x308   : > { %5740 = vmatprep.subr.bf16.mxu1 %v6394_v12  ;;  %v6570_v4 = vcombine.high %v684_v63, %v688_v0  ;;  %v564_v6 = vld [vmem:[%s7594_s5 + $0x898] sm:$0xff]  ;;  %v6569_v12 = vcombine.low %v684_v63, %v688_v0 }
 0x309   : > { %5700 = vmatpush1.bf16.msra.mxu0 %v6265_v15  ;;  %v568_v7 = vld [vmem:[%s7594_s5 + $0x8b8] sm:$0xff] }
 0x30a   : > { %5701 = vmatprep.subr.bf16.mxu0 %v6274_v16  ;;  %v692_v9 = vld [vmem:[%s7594_s5 + $0xc98] sm:$0xff]  ;;  %v6450_v13 = vcombine.high %v564_v6, %v568_v7 }
 0x30b   : > { %5741 = vmatpush1.bf16.msra.mxu1 %v6393_v43  ;;  %v696_v10 = vld [vmem:[%s7594_s5 + $0xcb8] sm:$0xff] }
 0x30c   : > { %5742 = vmatprep.subr.bf16.mxu1 %v6402_v55  ;;  %v6578_v40 = vcombine.high %v692_v9, %v696_v10  ;;  %v572_v25 = vld [vmem:[%s7594_s5 + $0x8d8] sm:$0xff]  ;;  %v6577_v43 = vcombine.low %v692_v9, %v696_v10 }
 0x30d   : > { %5702 = vmatpush1.bf16.msra.mxu0 %v6273_v54  ;;  %v576_v14 = vld [vmem:[%s7594_s5 + $0x8f8] sm:$0xff] }
 0x30e   : > { %5703 = vmatprep.subr.bf16.mxu0 %v6282_v42  ;;  %v704_v15 = vld [vmem:[%s7594_s5 + $0xcf8] sm:$0xff]  ;;  %v6458_v16 = vcombine.high %v572_v25, %v576_v14  ;;  %v6457_v24 = vcombine.low %v572_v25, %v576_v14 }
 0x30f   : > { %5743 = vmatpush1.bf16.msra.mxu1 %v6401_v26  ;;  %v580_v18 = vld [vmem:[%s7594_s5 + $0x918] sm:$0xff] }
 0x310   : > { %5744 = vmatprep.subr.bf16.mxu1 %v6410_v34  ;;  %v584_v19 = vld [vmem:[%s7594_s5 + $0x938] sm:$0xff] }
 0x311   : > { %5704 = vmatpush1.bf16.msra.mxu0 %v6281_v31  ;;  %v708_v22 = vld [vmem:[%s7594_s5 + $0xd18] sm:$0xff]  ;;  %v6466_v54 = vcombine.high %v580_v18, %v584_v19  ;;  %v6465_v29 = vcombine.low %v580_v18, %v584_v19 }
 0x312   : > { %5705 = vmatprep.subr.bf16.mxu0 %v6290_v33  ;;  %v588_v42 = vld [vmem:[%s7594_s5 + $0x958] sm:$0xff] }
 0x313   : > { %5745 = vmatpush1.bf16.msra.mxu1 %v6409_v32  ;;  %v592_v34 = vld [vmem:[%s7594_s5 + $0x978] sm:$0xff] }
 0x314   : > { %5746 = vmatprep.subr.bf16.mxu1 %v6418_v35  ;;  %v716_v27 = vld [vmem:[%s7594_s5 + $0xd58] sm:$0xff]  ;;  %v6474_v31 = vcombine.high %v588_v42, %v592_v34  ;;  %v6473_v44 = vcombine.low %v588_v42, %v592_v34 }
 0x315   : > { %5706 = vmatpush1.bf16.msra.mxu0 %v6289_v52  ;;  %v720_v39 = vld [vmem:[%s7594_s5 + $0xd78] sm:$0xff] }
 0x316   : > { %5707 = vmatprep.subr.bf16.mxu0 %v6298_v58  ;;  %v6602_v32 = vcombine.high %v716_v27, %v720_v39  ;;  %v596_v33 = vld [vmem:[%s7594_s5 + $0x998] sm:$0xff]  ;;  %v6601_v45 = vcombine.low %v716_v27, %v720_v39 }
 0x317   : > { %5747 = vmatpush1.bf16.msra.mxu1 %v6417_v20  ;;  %v600_v35 = vld [vmem:[%s7594_s5 + $0x9b8] sm:$0xff] }
 0x318   : > { %5748 = vmatprep.subr.bf16.mxu1 %v6426_v59  ;;  %v724_v36 = vld [vmem:[%s7594_s5 + $0xd98] sm:$0xff]  ;;  %v6482_v52 = vcombine.high %v596_v33, %v600_v35  ;;  %v6481_v61 = vcombine.low %v596_v33, %v600_v35 }
 0x319   : > { %5708 = vmatpush1.bf16.msra.mxu0 %v6297_v51  ;;  %v728_v38 = vld [vmem:[%s7594_s5 + $0xdb8] sm:$0xff] }
 0x31a   : > { %5759 = vmatprep.subr.bf16.mxu0 %v6434_v56  ;;  %v6610_v58 = vcombine.high %v724_v36, %v728_v38  ;;  %v604_v59 = vld [vmem:[%s7594_s5 + $0x9d8] sm:$0xff] }
 0x31b   : > { %5749 = vmatpush1.bf16.msra.mxu1 %v6425_v53  ;;  %v608_v47 = vld [vmem:[%s7594_s5 + $0x9f8] sm:$0xff] }
 0x31c   : > { %5800 = vmatprep.subr.bf16.mxu1 %v6562_v57  ;;  %5710 = vmatmul.mubr.bf16.vlgmr.msra.gmra.mrb[36].mxu0 %v7716_v17  ;;  %v700_v17 = vld [vmem:[%s7594_s5 + $0xcd8] sm:$0xff] }
 0x31d   : > { %5760 = vmatpush1.bf16.msra.mxu0 %v6433_v1  ;;  %5791 = vmatprep.mubr.bf16.mxu0 %v7734_v28  ;;  %v6586_v55 = vcombine.high %v700_v17, %v704_v15  ;;  %v712_v28 = vld [vmem:[%s7594_s5 + $0xd38] sm:$0xff]  ;;  %v6609_v1 = vcombine.low %v724_v36, %v728_v38 }
 0x31e   : > { %5751 = vmatmul.mubr.bf16.vlgmr.msra.gmra.mrb[36].mxu1 %v7725_v21  ;;  %5761 = vmatprep.subr.bf16.mxu0 %v6442_v3  ;;  %v6449_v21 = vcombine.low %v564_v6, %v568_v7  ;;  %v6594_v26 = vcombine.high %v708_v22, %v712_v28  ;;  %v6593_v46 = vcombine.low %v708_v22, %v712_v28  ;;  %v732_v49 = vld [vmem:[%s7594_s5 + $0xdd8] sm:$0xff] }
 0x31f   : > { %5801 = vmatpush1.bf16.msra.mxu1 %v6561_v2  ;;  %5832 = vmatprep.mubr.bf16.mxu1 %v7741_v30  ;;  %v6585_v30 = vcombine.low %v700_v17, %v704_v15  ;;  %v736_v51 = vld [vmem:[%s7594_s5 + $0xdf8] sm:$0xff]  ;;  %v6490_v2 = vcombine.high %v604_v59, %v608_v47 }
 0x320   : > { %5802 = vmatprep.subr.bf16.mxu1 %v6570_v4  ;;  %v6618_v4 = vcombine.high %v732_v49, %v736_v51  ;;  %v612_v6 = vld [vmem:[%s7594_s5 + $0xa18] sm:$0xff] }
 0x321   : > { %5762 = vmatpush1.bf16.msra.mxu0 %v6441_v11  ;;  %v616_v7 = vld [vmem:[%s7594_s5 + $0xa38] sm:$0xff]  ;;  %v6489_v11 = vcombine.low %v604_v59, %v608_v47 }
 0x322   : > { %5763 = vmatprep.subr.bf16.mxu0 %v6450_v13  ;;  %v740_v9 = vld [vmem:[%s7594_s5 + $0xe18] sm:$0xff]  ;;  %v6498_v13 = vcombine.high %v612_v6, %v616_v7 }
 0x323   : > { %5803 = vmatpush1.bf16.msra.mxu1 %v6569_v12  ;;  %v744_v10 = vld [vmem:[%s7594_s5 + $0xe38] sm:$0xff]  ;;  %v6617_v12 = vcombine.low %v732_v49, %v736_v51 }
 0x324   : > { %5804 = vmatprep.subr.bf16.mxu1 %v6578_v40  ;;  %v6626_v40 = vcombine.high %v740_v9, %v744_v10  ;;  %v620_v25 = vld [vmem:[%s7594_s5 + $0xa58] sm:$0xff] }
 0x325   : > { %5764 = vmatpush1.bf16.msra.mxu0 %v6449_v21  ;;  %v624_v14 = vld [vmem:[%s7594_s5 + $0xa78] sm:$0xff]  ;;  %v6497_v21 = vcombine.low %v612_v6, %v616_v7 }
 0x326   : > { %5765 = vmatprep.subr.bf16.mxu0 %v6458_v16  ;;  %v748_v17 = vld [vmem:[%s7594_s5 + $0xe58] sm:$0xff]  ;;  %v6506_v16 = vcombine.high %v620_v25, %v624_v14 }
 0x327   : > { %5805 = vmatpush1.bf16.msra.mxu1 %v6577_v43  ;;  %v752_v15 = vld [vmem:[%s7594_s5 + $0xe78] sm:$0xff]  ;;  %v6625_v43 = vcombine.low %v740_v9, %v744_v10 }
 0x328   : > { %5806 = vmatprep.subr.bf16.mxu1 %v6586_v55  ;;  %v6634_v55 = vcombine.high %v748_v17, %v752_v15  ;;  %v628_v18 = vld [vmem:[%s7594_s5 + $0xa98] sm:$0xff] }
 0x329   : > { %5766 = vmatpush1.bf16.msra.mxu0 %v6457_v24  ;;  %v632_v19 = vld [vmem:[%s7594_s5 + $0xab8] sm:$0xff]  ;;  %v6505_v24 = vcombine.low %v620_v25, %v624_v14 }
 0x32a   : > { %5767 = vmatprep.subr.bf16.mxu0 %v6466_v54  ;;  %v756_v22 = vld [vmem:[%s7594_s5 + $0xe98] sm:$0xff]  ;;  %v6514_v54 = vcombine.high %v628_v18, %v632_v19 }
 0x32b   : > { %5807 = vmatpush1.bf16.msra.mxu1 %v6585_v30  ;;  %v760_v28 = vld [vmem:[%s7594_s5 + $0xeb8] sm:$0xff]  ;;  %v6633_v30 = vcombine.low %v748_v17, %v752_v15 }
 0x32c   : > { %5808 = vmatprep.subr.bf16.mxu1 %v6594_v26  ;;  %v6642_v26 = vcombine.high %v756_v22, %v760_v28  ;;  %v636_v42 = vld [vmem:[%s7594_s5 + $0xad8] sm:$0xff] }
 0x32d   : > { %5768 = vmatpush1.bf16.msra.mxu0 %v6465_v29  ;;  %v640_v34 = vld [vmem:[%s7594_s5 + $0xaf8] sm:$0xff]  ;;  %v6513_v29 = vcombine.low %v628_v18, %v632_v19 }
 0x32e   : > { %5769 = vmatprep.subr.bf16.mxu0 %v6474_v31  ;;  %v764_v27 = vld [vmem:[%s7594_s5 + $0xed8] sm:$0xff]  ;;  %v6522_v31 = vcombine.high %v636_v42, %v640_v34 }
 0x32f   : > { %5809 = vmatpush1.bf16.msra.mxu1 %v6593_v46  ;;  %v5465_v20 = vpop.f32.mrb[24].mxu0  ;;  %v768_v39 = vld [vmem:[%s7594_s5 + $0xef8] sm:$0xff]  ;;  %v6641_v46 = vcombine.low %v756_v22, %v760_v28 }
 0x330   : > { %5810 = vmatprep.subr.bf16.mxu1 %v6602_v32  ;;  %v5467_v23 = vpop.f32.mrb[25].mxu0  ;;  %v6650_v32 = vcombine.high %v764_v27, %v768_v39  ;;  %v644_v33 = vld [vmem:[%s7594_s5 + $0xb18] sm:$0xff] }
 0x331   : > { %v5506_v60 = vpop.f32.mrb[24].mxu1  ;;  %v5469_v57 = vpop.f32.mrb[26].mxu0  ;;  %5770 = vmatpush1.bf16.msra.mxu0 %v6473_v44  ;;  %v648_v35 = vld [vmem:[%s7594_s5 + $0xb38] sm:$0xff]  ;;  %v6521_v44 = vcombine.low %v636_v42, %v640_v34 }
 0x332   : > { %v8440_v53 = vadd.f32 %v5506_v60, %v5465_v20  ;;  %v5508_v56 = vpop.f32.mrb[25].mxu1  ;;  %v5470_v0 = vpop.f32.mrb[27].mxu0  ;;  %5771 = vmatprep.subr.bf16.mxu0 %v6482_v52  ;;  %v772_v36 = vld [vmem:[%s7594_s5 + $0xf18] sm:$0xff]  ;;  %v6530_v52 = vcombine.high %v644_v33, %v648_v35 }
 0x333   : > { %v8442_v62 = vadd.f32 %v5508_v56, %v5467_v23  ;;  %v5510_v63 = vpop.f32.mrb[26].mxu1  ;;  %5811 = vmatpush1.bf16.msra.mxu1 %v6601_v45  ;;  %v776_v38 = vld [vmem:[%s7594_s5 + $0xf38] sm:$0xff]  ;;  %v6649_v45 = vcombine.low %v764_v27, %v768_v39  ;;  %v6529_v23 = vcombine.low %v644_v33, %v648_v35 }
 0x334   : > { %v5511_v3 = vpop.f32.mrb[27].mxu1  ;;  %5812 = vmatprep.subr.bf16.mxu1 %v6610_v58  ;;  %v6658_v20 = vcombine.high %v772_v36, %v776_v38  ;;  %v652_v58 = vld [vmem:[%s7594_s5 + $0xb58] sm:$0xff]  ;;  %v6657_v49 = vcombine.low %v772_v36, %v776_v38 }
 0x335   : > { %5772 = vmatpush1.bf16.msra.mxu0 %v6481_v61  ;;  %v656_v59 = vld [vmem:[%s7594_s5 + $0xb78] sm:$0xff] }
 0x336   : > { %5773 = vmatprep.subr.bf16.mxu0 %v6490_v2  ;;  %v780_v47 = vld [vmem:[%s7594_s5 + $0xf58] sm:$0xff]  ;;  %v6538_v51 = vcombine.high %v652_v58, %v656_v59 }
 0x337   : > { %5813 = vmatpush1.bf16.msra.mxu1 %v6609_v1  ;;  %v784_v60 = vld [vmem:[%s7594_s5 + $0xf78] sm:$0xff]  ;;  %v6537_v1 = vcombine.low %v652_v58, %v656_v59 }
 0x338   : > { %5814 = vmatprep.subr.bf16.mxu1 %v6618_v4  ;;  %v6666_v56 = vcombine.high %v780_v47, %v784_v60  ;;  %v660_v57 = vld [vmem:[%s7594_s5 + $0xb98] sm:$0xff]  ;;  %v6665_v2 = vcombine.low %v780_v47, %v784_v60 }
 0x339   : > { %5774 = vmatpush1.bf16.msra.mxu0 %v6489_v11  ;;  %v664_v61 = vld [vmem:[%s7594_s5 + $0xbb8] sm:$0xff] }
 0x33a   : > { %5775 = vmatprep.subr.bf16.mxu0 %v6498_v13  ;;  %v788_v63 = vld [vmem:[%s7594_s5 + $0xf98] sm:$0xff]  ;;  %v6546_v3 = vcombine.high %v660_v57, %v664_v61  ;;  %v6545_v11 = vcombine.low %v660_v57, %v664_v61 }
 0x33b   : > { %5815 = vmatpush1.bf16.msra.mxu1 %v6617_v12  ;;  %v792_v0 = vld [vmem:[%s7594_s5 + $0xfb8] sm:$0xff] }
 0x33c   : > { %5816 = vmatprep.subr.bf16.mxu1 %v6626_v40  ;;  %v6674_v4 = vcombine.high %v788_v63, %v792_v0  ;;  %v668_v6 = vld [vmem:[%s7594_s5 + $0xbd8] sm:$0xff]  ;;  %v6673_v12 = vcombine.low %v788_v63, %v792_v0 }
 0x33d   : > { %5776 = vmatpush1.bf16.msra.mxu0 %v6497_v21  ;;  %v672_v7 = vld [vmem:[%s7594_s5 + $0xbf8] sm:$0xff] }
 0x33e   : > { %5777 = vmatprep.subr.bf16.mxu0 %v6506_v16  ;;  %v796_v9 = vld [vmem:[%s7594_s5 + $0xfd8] sm:$0xff]  ;;  %v6554_v13 = vcombine.high %v668_v6, %v672_v7  ;;  %v6553_v21 = vcombine.low %v668_v6, %v672_v7 }
 0x33f   : > { %5817 = vmatpush1.bf16.msra.mxu1 %v6625_v43  ;;  %v800_v10 = vld [vmem:[%s7594_s5 + $0xff8] sm:$0xff] }
 0x340   : > { %5818 = vmatprep.subr.bf16.mxu1 %v6634_v55  ;;  %v6682_v40 = vcombine.high %v796_v9, %v800_v10  ;;  %v804_v25 = vld [vmem:[%s7594_s5 + $0x1018] sm:$0xff]  ;;  %v6681_v43 = vcombine.low %v796_v9, %v800_v10 }
 0x341   : > { %5778 = vmatpush1.bf16.msra.mxu0 %v6505_v24  ;;  %v808_v14 = vld [vmem:[%s7594_s5 + $0x1038] sm:$0xff] }
 0x342   : > { %5779 = vmatprep.subr.bf16.mxu0 %v6514_v54  ;;  %v932_v17 = vld [vmem:[%s7594_s5 + $0x1418] sm:$0xff]  ;;  %v6690_v16 = vcombine.high %v804_v25, %v808_v14  ;;  %v6689_v24 = vcombine.low %v804_v25, %v808_v14 }
 0x343   : > { %5819 = vmatpush1.bf16.msra.mxu1 %v6633_v30  ;;  %v936_v15 = vld [vmem:[%s7594_s5 + $0x1438] sm:$0xff] }
 0x344   : > { %5820 = vmatprep.subr.bf16.mxu1 %v6642_v26  ;;  %v6818_v55 = vcombine.high %v932_v17, %v936_v15  ;;  %v812_v18 = vld [vmem:[%s7594_s5 + $0x1058] sm:$0xff]  ;;  %v6817_v30 = vcombine.low %v932_v17, %v936_v15 }
 0x345   : > { %5780 = vmatpush1.bf16.msra.mxu0 %v6513_v29  ;;  %v816_v19 = vld [vmem:[%s7594_s5 + $0x1078] sm:$0xff] }
 0x346   : > { %5781 = vmatprep.subr.bf16.mxu0 %v6522_v31  ;;  %v940_v22 = vld [vmem:[%s7594_s5 + $0x1458] sm:$0xff]  ;;  %v6698_v54 = vcombine.high %v812_v18, %v816_v19  ;;  %v6697_v29 = vcombine.low %v812_v18, %v816_v19 }
 0x347   : > { %5821 = vmatpush1.bf16.msra.mxu1 %v6641_v46  ;;  %v944_v28 = vld [vmem:[%s7594_s5 + $0x1478] sm:$0xff] }
 0x348   : > { %5822 = vmatprep.subr.bf16.mxu1 %v6650_v32  ;;  %v6826_v26 = vcombine.high %v940_v22, %v944_v28  ;;  %v820_v42 = vld [vmem:[%s7594_s5 + $0x1098] sm:$0xff]  ;;  %v6825_v46 = vcombine.low %v940_v22, %v944_v28 }
 0x349   : > { %5782 = vmatpush1.bf16.msra.mxu0 %v6521_v44  ;;  %v824_v34 = vld [vmem:[%s7594_s5 + $0x10b8] sm:$0xff] }
 0x34a   : > { %5783 = vmatprep.subr.bf16.mxu0 %v6530_v52  ;;  %v948_v27 = vld [vmem:[%s7594_s5 + $0x1498] sm:$0xff]  ;;  %v6706_v31 = vcombine.high %v820_v42, %v824_v34 }
 0x34b   : > { %5823 = vmatpush1.bf16.msra.mxu1 %v6649_v45  ;;  %v952_v39 = vld [vmem:[%s7594_s5 + $0x14b8] sm:$0xff] }
 0x34c   : > { %5824 = vmatprep.subr.bf16.mxu1 %v6658_v20  ;;  %v6834_v32 = vcombine.high %v948_v27, %v952_v39  ;;  %v828_v33 = vld [vmem:[%s7594_s5 + $0x10d8] sm:$0xff]  ;;  %v6833_v38 = vcombine.low %v948_v27, %v952_v39 }
 0x34d   : > { %5784 = vmatpush1.bf16.msra.mxu0 %v6529_v23  ;;  %v832_v35 = vld [vmem:[%s7594_s5 + $0x10f8] sm:$0xff] }
 0x34e   : > { %5785 = vmatprep.subr.bf16.mxu0 %v6538_v51  ;;  %v960_v36 = vld [vmem:[%s7594_s5 + $0x14f8] sm:$0xff]  ;;  %v6714_v44 = vcombine.high %v828_v33, %v832_v35  ;;  %v6713_v59 = vcombine.low %v828_v33, %v832_v35 }
 0x34f   : > { %5825 = vmatpush1.bf16.msra.mxu1 %v6657_v49  ;;  %v836_v52 = vld [vmem:[%s7594_s5 + $0x1118] sm:$0xff] }
 0x350   : > { %5826 = vmatprep.subr.bf16.mxu1 %v6666_v56  ;;  %v840_v20 = vld [vmem:[%s7594_s5 + $0x1138] sm:$0xff] }
 0x351   : > { %5786 = vmatpush1.bf16.msra.mxu0 %v6537_v1  ;;  %v964_v58 = vld [vmem:[%s7594_s5 + $0x1518] sm:$0xff]  ;;  %v6722_v47 = vcombine.high %v836_v52, %v840_v20  ;;  %v6721_v57 = vcombine.low %v836_v52, %v840_v20 }
 0x352   : > { %5787 = vmatprep.subr.bf16.mxu0 %v6546_v3  ;;  %v844_v23 = vld [vmem:[%s7594_s5 + $0x1158] sm:$0xff] }
 0x353   : > { %5827 = vmatpush1.bf16.msra.mxu1 %v6665_v2  ;;  %v848_v49 = vld [vmem:[%s7594_s5 + $0x1178] sm:$0xff] }
 0x354   : > { %5828 = vmatprep.subr.bf16.mxu1 %v6674_v4  ;;  %v972_v51 = vld [vmem:[%s7594_s5 + $0x1558] sm:$0xff]  ;;  %v6730_v63 = vcombine.high %v844_v23, %v848_v49  ;;  %v6729_v6 = vcombine.low %v844_v23, %v848_v49 }
 0x355   : > { %5788 = vmatpush1.bf16.msra.mxu0 %v6545_v11  ;;  %v976_v56 = vld [vmem:[%s7594_s5 + $0x1578] sm:$0xff] }
 0x356   : > { %5789 = vmatprep.subr.bf16.mxu0 %v6554_v13  ;;  %v6858_v0 = vcombine.high %v972_v51, %v976_v56  ;;  %v852_v1 = vld [vmem:[%s7594_s5 + $0x1198] sm:$0xff]  ;;  %v6857_v7 = vcombine.low %v972_v51, %v976_v56 }
 0x357   : > { %5829 = vmatpush1.bf16.msra.mxu1 %v6673_v12  ;;  %v856_v2 = vld [vmem:[%s7594_s5 + $0x11b8] sm:$0xff] }
 0x358   : > { %5830 = vmatprep.subr.bf16.mxu1 %v6682_v40  ;;  %v980_v3 = vld [vmem:[%s7594_s5 + $0x1598] sm:$0xff]  ;;  %v6738_v9 = vcombine.high %v852_v1, %v856_v2 }
 0x359   : > { %5790 = vmatpush1.bf16.msra.mxu0 %v6553_v21  ;;  %v984_v4 = vld [vmem:[%s7594_s5 + $0x15b8] sm:$0xff] }
 0x35a   : > { %5841 = vmatprep.subr.bf16.mxu0 %v6690_v16  ;;  %v6866_v11 = vcombine.high %v980_v3, %v984_v4  ;;  %v860_v12 = vld [vmem:[%s7594_s5 + $0x11d8] sm:$0xff] }
 0x35b   : > { %5831 = vmatpush1.bf16.msra.mxu1 %v6681_v43  ;;  %v864_v13 = vld [vmem:[%s7594_s5 + $0x11f8] sm:$0xff] }
 0x35c   : > { %5882 = vmatprep.subr.bf16.mxu1 %v6818_v55  ;;  %5792 = vmatmul.mubr.bf16.vlgmr.msra.gmra.mrb[40].mxu0 %v7806_v37  ;;  %v956_v37 = vld [vmem:[%s7594_s5 + $0x14d8] sm:$0xff]  ;;  %v6737_v55 = vcombine.low %v852_v1, %v856_v2  ;;  %v6746_v28 = vcombine.high %v860_v12, %v864_v13  ;;  %v6745_v27 = vcombine.low %v860_v12, %v864_v13 }
 0x35d   : > { %5842 = vmatpush1.bf16.msra.mxu0 %v6689_v24  ;;  %5873 = vmatprep.mubr.bf16.mxu0 %v7824_v48  ;;  %v6842_v45 = vcombine.high %v956_v37, %v960_v36  ;;  %v968_v48 = vld [vmem:[%s7594_s5 + $0x1538] sm:$0xff] }
 0x35e   : > { %5833 = vmatmul.mubr.bf16.vlgmr.msra.gmra.mrb[40].mxu1 %v7815_v41  ;;  %5843 = vmatprep.subr.bf16.mxu0 %v6698_v54  ;;  %v6705_v41 = vcombine.low %v820_v42, %v824_v34  ;;  %v6850_v60 = vcombine.high %v964_v58, %v968_v48  ;;  %v6849_v61 = vcombine.low %v964_v58, %v968_v48  ;;  %v988_v17 = vld [vmem:[%s7594_s5 + $0x15d8] sm:$0xff] }
 0x35f   : > { %5883 = vmatpush1.bf16.msra.mxu1 %v6817_v30  ;;  %5914 = vmatprep.mubr.bf16.mxu1 %v7831_v50  ;;  %v6841_v50 = vcombine.low %v956_v37, %v960_v36  ;;  %v992_v15 = vld [vmem:[%s7594_s5 + $0x15f8] sm:$0xff] }
 0x360   : > { %5884 = vmatprep.subr.bf16.mxu1 %v6826_v26  ;;  %v6874_v30 = vcombine.high %v988_v17, %v992_v15  ;;  %v868_v54 = vld [vmem:[%s7594_s5 + $0x1218] sm:$0xff]  ;;  %v6873_v39 = vcombine.low %v988_v17, %v992_v15 }
 0x361   : > { %5844 = vmatpush1.bf16.msra.mxu0 %v6697_v29  ;;  %v872_v26 = vld [vmem:[%s7594_s5 + $0x1238] sm:$0xff] }
 0x362   : > { %5845 = vmatprep.subr.bf16.mxu0 %v6706_v31  ;;  %v996_v42 = vld [vmem:[%s7594_s5 + $0x1618] sm:$0xff]  ;;  %v6754_v29 = vcombine.high %v868_v54, %v872_v26  ;;  %v6753_v37 = vcombine.low %v868_v54, %v872_v26 }
 0x363   : > { %5885 = vmatpush1.bf16.msra.mxu1 %v6825_v46  ;;  %v1000_v34 = vld [vmem:[%s7594_s5 + $0x1638] sm:$0xff] }
 0x364   : > { %5886 = vmatprep.subr.bf16.mxu1 %v6834_v32  ;;  %v6882_v46 = vcombine.high %v996_v42, %v1000_v34  ;;  %v876_v31 = vld [vmem:[%s7594_s5 + $0x1258] sm:$0xff]  ;;  %v6881_v36 = vcombine.low %v996_v42, %v1000_v34 }
 0x365   : > { %5846 = vmatpush1.bf16.msra.mxu0 %v6705_v41  ;;  %v880_v32 = vld [vmem:[%s7594_s5 + $0x1278] sm:$0xff] }
 0x366   : > { %5847 = vmatprep.subr.bf16.mxu0 %v6714_v44  ;;  %v1004_v33 = vld [vmem:[%s7594_s5 + $0x1658] sm:$0xff]  ;;  %v6762_v41 = vcombine.high %v876_v31, %v880_v32  ;;  %v6761_v58 = vcombine.low %v876_v31, %v880_v32 }
 0x367   : > { %5887 = vmatpush1.bf16.msra.mxu1 %v6833_v38  ;;  %v1008_v35 = vld [vmem:[%s7594_s5 + $0x1678] sm:$0xff] }
 0x368   : > { %5888 = vmatprep.subr.bf16.mxu1 %v6842_v45  ;;  %v6890_v38 = vcombine.high %v1004_v33, %v1008_v35  ;;  %v884_v44 = vld [vmem:[%s7594_s5 + $0x1298] sm:$0xff]  ;;  %v6889_v48 = vcombine.low %v1004_v33, %v1008_v35  ;;  %v275_v33 = vld [vmem:[%s7611_s4 + $0x20] sm:$0xff] }
 0x369   : > { %5848 = vmatpush1.bf16.msra.mxu0 %v6713_v59  ;;  %v888_v45 = vld [vmem:[%s7594_s5 + $0x12b8] sm:$0xff] }
 0x36a   : > { %5849 = vmatprep.subr.bf16.mxu0 %v6722_v47  ;;  %v1012_v52 = vld [vmem:[%s7594_s5 + $0x1698] sm:$0xff]  ;;  %v6770_v59 = vcombine.high %v884_v44, %v888_v45  ;;  %v6769_v51 = vcombine.low %v884_v44, %v888_v45 }
 0x36b   : > { %5889 = vmatpush1.bf16.msra.mxu1 %v6841_v50  ;;  %v1016_v20 = vld [vmem:[%s7594_s5 + $0x16b8] sm:$0xff] }
 0x36c   : > { %5890 = vmatprep.subr.bf16.mxu1 %v6850_v60  ;;  %v6898_v50 = vcombine.high %v1012_v52, %v1016_v20  ;;  %v892_v47 = vld [vmem:[%s7594_s5 + $0x12d8] sm:$0xff]  ;;  %v6897_v56 = vcombine.low %v1012_v52, %v1016_v20 }
 0x36d   : > { %5850 = vmatpush1.bf16.msra.mxu0 %v6721_v57  ;;  %v896_v60 = vld [vmem:[%s7594_s5 + $0x12f8] sm:$0xff] }
 0x36e   : > { %5851 = vmatprep.subr.bf16.mxu0 %v6730_v63  ;;  %v1020_v23 = vld [vmem:[%s7594_s5 + $0x16d8] sm:$0xff]  ;;  %v6778_v57 = vcombine.high %v892_v47, %v896_v60 }
 0x36f   : > { %5891 = vmatpush1.bf16.msra.mxu1 %v6849_v61  ;;  %v5547_v10 = vpop.f32.mrb[28].mxu0  ;;  %v1024_v49 = vld [vmem:[%s7594_s5 + $0x16f8] sm:$0xff] }
 0x370   : > { %5892 = vmatprep.subr.bf16.mxu1 %v6858_v0  ;;  %v5548_v40 = vadd.f32 %v5547_v10, %v8440_v53  ;;  %v5549_v14 = vpop.f32.mrb[29].mxu0  ;;  %v6865_v53 = vcombine.low %v980_v3, %v984_v4  ;;  %v6906_v61 = vcombine.high %v1020_v23, %v1024_v49  ;;  %v900_v63 = vld [vmem:[%s7594_s5 + $0x1318] sm:$0xff]  ;;  %v6777_v3 = vcombine.low %v892_v47, %v896_v60 }
 0x371   : > { %v5588_v25 = vpop.f32.mrb[28].mxu1  ;;  %v5550_v21 = vadd.f32 %v5549_v14, %v8442_v62  ;;  %v5551_v16 = vpop.f32.mrb[30].mxu0  ;;  %5852 = vmatpush1.bf16.msra.mxu0 %v6729_v6  ;;  %v904_v0 = vld [vmem:[%s7594_s5 + $0x1338] sm:$0xff]  ;;  %v6905_v4 = vcombine.low %v1020_v23, %v1024_v49 }
 0x372   : > { %v5590_v43 = vpop.f32.mrb[29].mxu1  ;;  %v8514_v18 = vadd.f32 %v5588_v25, %v5548_v40  ;;  %v5552_v22 = vpop.f32.mrb[31].mxu0  ;;  %5853 = vmatprep.subr.bf16.mxu0 %v6738_v9  ;;  %v1028_v1 = vld [vmem:[%s7594_s5 + $0x1718] sm:$0xff]  ;;  %v6786_v6 = vcombine.high %v900_v63, %v904_v0  ;;  %v6785_v13 = vcombine.low %v900_v63, %v904_v0 }
 0x373   : > { %v5592_v19 = vpop.f32.mrb[30].mxu1  ;;  %5893 = vmatpush1.bf16.msra.mxu1 %v6857_v7  ;;  %v8516_v24 = vadd.f32 %v5590_v43, %v5550_v21  ;;  %v1032_v2 = vld [vmem:[%s7594_s5 + $0x1738] sm:$0xff] }
 0x374   : > { %v5593_v62 = vpop.f32.mrb[31].mxu1  ;;  %5894 = vmatprep.subr.bf16.mxu1 %v6866_v11  ;;  %v6914_v7 = vcombine.high %v1028_v1, %v1032_v2  ;;  %v908_v9 = vld [vmem:[%s7594_s5 + $0x1358] sm:$0xff]  ;;  %v6913_v40 = vcombine.low %v1028_v1, %v1032_v2 }
 0x375   : > { %5854 = vmatpush1.bf16.msra.mxu0 %v6737_v55  ;;  %v912_v10 = vld [vmem:[%s7594_s5 + $0x1378] sm:$0xff] }
 0x376   : > { %5855 = vmatprep.subr.bf16.mxu0 %v6746_v28  ;;  %v1036_v11 = vld [vmem:[%s7594_s5 + $0x1758] sm:$0xff]  ;;  %v6794_v25 = vcombine.high %v908_v9, %v912_v10  ;;  %v6793_v16 = vcombine.low %v908_v9, %v912_v10 }
 0x377   : > { %5895 = vmatpush1.bf16.msra.mxu1 %v6865_v53  ;;  %v1040_v12 = vld [vmem:[%s7594_s5 + $0x1778] sm:$0xff] }
 0x378   : > { %5896 = vmatprep.subr.bf16.mxu1 %v6874_v30  ;;  %v6922_v14 = vcombine.high %v1036_v11, %v1040_v12  ;;  %v916_v17 = vld [vmem:[%s7594_s5 + $0x1398] sm:$0xff]  ;;  %v6921_v55 = vcombine.low %v1036_v11, %v1040_v12 }
 0x379   : > { %5856 = vmatpush1.bf16.msra.mxu0 %v6745_v27  ;;  %v920_v15 = vld [vmem:[%s7594_s5 + $0x13b8] sm:$0xff] }
 0x37a   : > { %5857 = vmatprep.subr.bf16.mxu0 %v6754_v29  ;;  %v1044_v21 = vld [vmem:[%s7594_s5 + $0x1798] sm:$0xff]  ;;  %v6802_v19 = vcombine.high %v916_v17, %v920_v15  ;;  %v6801_v54 = vcombine.low %v916_v17, %v920_v15  ;;  %v278_v15 = vld [vmem:[%s7611_s4 + $0x38] sm:$0xff] }
 0x37b   : > { %5897 = vmatpush1.bf16.msra.mxu1 %v6873_v39  ;;  %v1048_v43 = vld [vmem:[%s7594_s5 + $0x17b8] sm:$0xff] }
 0x37c   : > { %5898 = vmatprep.subr.bf16.mxu1 %v6882_v46  ;;  %v6930_v22 = vcombine.high %v1044_v21, %v1048_v43  ;;  %v924_v53 = vld [vmem:[%s7594_s5 + $0x13d8] sm:$0xff]  ;;  %v6929_v26 = vcombine.low %v1044_v21, %v1048_v43 }
 0x37d   : > { %5858 = vmatpush1.bf16.msra.mxu0 %v6753_v37  ;;  %v928_v28 = vld [vmem:[%s7594_s5 + $0x13f8] sm:$0xff] }
 0x37e   : > { %5859 = vmatprep.subr.bf16.mxu0 %v6762_v41  ;;  %v1052_v62 = vld [vmem:[%s7594_s5 + $0x17d8] sm:$0xff]  ;;  %v6810_v42 = vcombine.high %v924_v53, %v928_v28  ;;  %v6809_v27 = vcombine.low %v924_v53, %v928_v28  ;;  %v5953_v53 = vlaneseq (!%p6939_p7) }
 0x37f   : > { %5899 = vmatpush1.bf16.msra.mxu1 %v6881_v36  ;;  %v1056_v30 = vld [vmem:[%s7594_s5 + $0x17f8] sm:$0xff] }
 0x380   : > { %5900 = vmatprep.subr.bf16.mxu1 %v6890_v38  ;;  %v6938_v34 = vcombine.high %v1052_v62, %v1056_v30  ;;  %v6937_v39 = vcombine.low %v1052_v62, %v1056_v30  ;;  %v276_v38 = vld [vmem:[%s7611_s4 + $0x28] sm:$0xff]  ;;  %v5954_v28 = vshrl.u32 (!%p6939_p7), %v5953_v53, 7  ;;  %v5943_v62 = vld [vmem:[%s7611_s4] sm:$0xff] (!%p6939_p7)  ;;  %v5951_v30 = vld [vmem:[%s7604_s23] sm:$0xff] (!%p6939_p7) }
 0x381   : > { %5860 = vmatpush1.bf16.msra.mxu0 %v6761_v58 }
 0x382   : > { %5861 = vmatprep.subr.bf16.mxu0 %v6770_v59 }
 0x383   : > { %5901 = vmatpush1.bf16.msra.mxu1 %v6889_v48 }
 0x384   : > { %5902 = vmatprep.subr.bf16.mxu1 %v6898_v50 }
 0x385   : > { %5862 = vmatpush1.bf16.msra.mxu0 %v6769_v51 }
 0x386   : > { %5863 = vmatprep.subr.bf16.mxu0 %v6778_v57 }
 0x387   : > { %5903 = vmatpush1.bf16.msra.mxu1 %v6897_v56 }
 0x388   : > { %5904 = vmatprep.subr.bf16.mxu1 %v6906_v61 }
 0x389   : > { %5864 = vmatpush1.bf16.msra.mxu0 %v6777_v3 }
 0x38a   : > { %5865 = vmatprep.subr.bf16.mxu0 %v6786_v6 }
 0x38b   : > { %5905 = vmatpush1.bf16.msra.mxu1 %v6905_v4 }
 0x38c   : > { %5906 = vmatprep.subr.bf16.mxu1 %v6914_v7 }
 0x38d   : > { %5866 = vmatpush1.bf16.msra.mxu0 %v6785_v13  ;;  %v277_v13 = vld [vmem:[%s7611_s4 + $0x30] sm:$0xff] }
 0x38e   : > { %5867 = vmatprep.subr.bf16.mxu0 %v6794_v25 }
 0x38f   : > { %5907 = vmatpush1.bf16.msra.mxu1 %v6913_v40 }
 0x390   : > { %5908 = vmatprep.subr.bf16.mxu1 %v6922_v14 }
 0x391   : > { %5868 = vmatpush1.bf16.msra.mxu0 %v6793_v16 }
 0x392   : > { %5869 = vmatprep.subr.bf16.mxu0 %v6802_v19 }
 0x393   : > { %5909 = vmatpush1.bf16.msra.mxu1 %v6921_v55 }
 0x394   : > { %5910 = vmatprep.subr.bf16.mxu1 %v6930_v22 }
 0x395   : > { %5870 = vmatpush1.bf16.msra.mxu0 %v6801_v54  ;;  %v5955_v54 = vsub.s32 (!%p6939_p7), 0, %v5954_v28 }
 0x396   : > { %5871 = vmatprep.subr.bf16.mxu0 %v6810_v42  ;;  %v5959_v42 = vsub.s32 (!%p6939_p7), 1, %v5954_v28 }
 0x397   : > { %5911 = vmatpush1.bf16.msra.mxu1 %v6929_v26  ;;  %v5944_v26 = vld [vmem:[%s7611_s4 + $0x8] sm:$0xff] (!%p6939_p7) }
 0x398   : > { %5912 = vmatprep.subr.bf16.mxu1 %v6938_v34  ;;  %v5945_v34 = vld [vmem:[%s7611_s4 + $0x10] sm:$0xff] (!%p6939_p7) }
 0x399   : > { %5872 = vmatpush1.bf16.msra.mxu0 %v6809_v27  ;;  %v5963_v27 = vsub.s32 (!%p6939_p7), 2, %v5954_v28 }
 0x39b   : > { %5913 = vmatpush1.bf16.msra.mxu1 %v6937_v39  ;;  %v5967_v39 = vsub.s32 (!%p6939_p7), 3, %v5954_v28 }
 0x39c   : > { %5874 = vmatmul.mubr.bf16.vlgmr.msra.gmra.mrb[44].mxu0 %v7896_v5 }
 0x39e   : > { %5915 = vmatmul.mubr.bf16.vlgmr.msra.gmra.mrb[44].mxu1 %v7902_v8 }
 0x3af   : > { %v5629_v29 = vpop.f32.mrb[32].mxu0 }
 0x3b0   : > { %v5630_v46 = vadd.f32 %v5629_v29, %v8514_v18  ;;  %v5631_v32 = vpop.f32.mrb[33].mxu0  ;;  %v5946_v29 = vld [vmem:[%s7611_s4 + $0x18] sm:$0xff] (!%p6939_p7) }
 0x3b1   : > { %v5670_v31 = vpop.f32.mrb[32].mxu1  ;;  %v5632_v35 = vadd.f32 %v5631_v32, %v8516_v24  ;;  %v5633_v36 = vpop.f32.mrb[34].mxu0  ;;  %v5975_v32 = vsub.s32 (!%p6939_p7), 5, %v5954_v28 }
 0x3b2   : > { %v5672_v37 = vpop.f32.mrb[33].mxu1  ;;  %v5671_v41 = vadd.f32 %v5670_v31, %v5630_v46  ;;  %v5634_v45 = vpop.f32.mrb[35].mxu0  ;;  %v5971_v31 = vsub.s32 (!%p6939_p7), 4, %v5954_v28  ;;  %v5960_v36 = vrot.slane (!%p6939_p7), %v5951_v30, %v5959_v42 }
 0x3b3   : > { %v5674_v44 = vpop.f32.mrb[34].mxu1  ;;  %v5673_v52 = vadd.f32 %v5672_v37, %v5632_v35  ;;  %v5983_v35 = vsub.s32 (!%p6939_p7), 7, %v5954_v28  ;;  %v5956_v37 = vrot.slane (!%p6939_p7), %v5951_v30, %v5955_v54 }
 0x3b4   : > { %v5675_v5 = vpop.f32.mrb[35].mxu1  ;;  %v5927_v20 = vadd.f32 %v5671_v41, %v275_v33  ;;  %v5979_v33 = vsub.s32 (!%p6939_p7), 6, %v5954_v28  ;;  %v5964_v41 = vrot.slane (!%p6939_p7), %v5951_v30, %v5963_v27 }
 0x3b5   : > { %v5928_v8 = vadd.f32 %v5673_v52, %v276_v38  ;;  %v5968_v38 = vrot.slane (!%p6939_p7), %v5951_v30, %v5967_v39  ;;  %v5972_v5 = vrot.slane (!%p6939_p7), %v5951_v30, %v5971_v31 }
 0x3b6   : > { %5935 = vst [vmem:[%s7611_s4 + $0x20] sm:$0xff] %v5927_v20  ;;  %v5976_v20 = vrot.slane (!%p6939_p7), %v5951_v30, %v5975_v32 }
 0x3b7   : > { %5936 = vst [vmem:[%s7611_s4 + $0x28] sm:$0xff] %v5928_v8  ;;  %v5980_v8 = vrot.slane (!%p6939_p7), %v5951_v30, %v5979_v33 }
 0x3bd   : > { %v5947_v46 = vld [vmem:[%s7611_s4 + $0x20] sm:$0xff] (!%p6939_p7) }
 0x3be   : > { %v5948_v44 = vld [vmem:[%s7611_s4 + $0x28] sm:$0xff] (!%p6939_p7) }
 0x3ef   : > { %v5711_v58 = vpop.f32.mrb[36].mxu0 }
 0x3f0   : > { %v5713_v48 = vpop.f32.mrb[37].mxu0 }
 0x3f1   : > { %v5752_v18 = vpop.f32.mrb[36].mxu1  ;;  %v5715_v47 = vpop.f32.mrb[38].mxu0 }
 0x3f2   : > { %v5753_v59 = vadd.f32 %v5752_v18, %v5711_v58  ;;  %v5754_v50 = vpop.f32.mrb[37].mxu1  ;;  %v5716_v23 = vpop.f32.mrb[39].mxu0  ;;  %v5984_v58 = vrot.slane (!%p6939_p7), %v5951_v30, %v5983_v35  ;;  %v5993_v18 = vadd.f32 (!%p6939_p7), %v5956_v37, %v5943_v62  ;;  %v5997_v47 = vadd.f32 (!%p6939_p7), %v5972_v5, %v5947_v46 }
 0x3f3   : > { %v5755_v60 = vadd.f32 %v5754_v50, %v5713_v48  ;;  %v5756_v24 = vpop.f32.mrb[38].mxu1  ;;  %v5994_v48 = vadd.f32 (!%p6939_p7), %v5960_v36, %v5944_v26  ;;  %v5996_v50 = vadd.f32 (!%p6939_p7), %v5968_v38, %v5946_v29 }
 0x3f4   : > { %v5757_v49 = vpop.f32.mrb[39].mxu1  ;;  %6001 = vst [vmem:[%s7611_s4] sm:$0xff] (!%p6939_p7), %v5993_v18  ;;  %6005 = vst [vmem:[%s7611_s4 + $0x20] sm:$0xff] (!%p6939_p7), %v5997_v47 }
 0x3f5   : > { %6002 = vst [vmem:[%s7611_s4 + $0x8] sm:$0xff] (!%p6939_p7), %v5994_v48  ;;  %6004 = vst [vmem:[%s7611_s4 + $0x18] sm:$0xff] (!%p6939_p7), %v5996_v50 }
 0x42f   : > { %v5793_v51 = vpop.f32.mrb[40].mxu0 }
 0x430   : > { %v5794_v56 = vadd.f32 %v5793_v51, %v5753_v59  ;;  %v5795_v61 = vpop.f32.mrb[41].mxu0  ;;  %v5995_v59 = vadd.f32 (!%p6939_p7), %v5964_v41, %v5945_v34 }
 0x431   : > { %v5834_v57 = vpop.f32.mrb[40].mxu1  ;;  %v5796_v63 = vadd.f32 %v5795_v61, %v5755_v60  ;;  %v5797_v1 = vpop.f32.mrb[42].mxu0  ;;  %v5998_v60 = vadd.f32 (!%p6939_p7), %v5976_v20, %v5948_v44 }
 0x432   : > { %v5836_v0 = vpop.f32.mrb[41].mxu1  ;;  %v5835_v2 = vadd.f32 %v5834_v57, %v5794_v56  ;;  %v5798_v4 = vpop.f32.mrb[43].mxu0  ;;  %6003 = vst [vmem:[%s7611_s4 + $0x10] sm:$0xff] (!%p6939_p7), %v5995_v59 }
 0x433   : > { %v5838_v3 = vpop.f32.mrb[42].mxu1  ;;  %v5837_v6 = vadd.f32 %v5836_v0, %v5796_v63  ;;  %6006 = vst [vmem:[%s7611_s4 + $0x28] sm:$0xff] (!%p6939_p7), %v5998_v60 }
 0x434   : > { %v5839_v7 = vpop.f32.mrb[43].mxu1 }
 0x46f   : > { %v5875_v9 = vpop.f32.mrb[44].mxu0 }
 0x470   : > { %v5876_v10 = vadd.f32 %v5875_v9, %v5835_v2  ;;  %v5877_v12 = vpop.f32.mrb[45].mxu0 }
 0x471   : > { %v5916_v11 = vpop.f32.mrb[44].mxu1  ;;  %v5878_v40 = vadd.f32 %v5877_v12, %v5837_v6  ;;  %v5879_v14 = vpop.f32.mrb[46].mxu0  ;;  %5942 = sbr.rel (%p6939_p7) target bundleno = 1154 (0x482), region = 52 }
 0x472   : > { %v5918_v25 = vpop.f32.mrb[45].mxu1  ;;  %v5917_v17 = vadd.f32 %v5916_v11, %v5876_v10  ;;  %v5880_v43 = vpop.f32.mrb[47].mxu0 }
 0x473   : > { %v5920_v21 = vpop.f32.mrb[46].mxu1  ;;  %v5919_v16 = vadd.f32 %v5918_v25, %v5878_v40 }
 0x474   : > { %v5921_v55 = vpop.f32.mrb[47].mxu1  ;;  %v5929_v19 = vadd.f32 %v5917_v17, %v277_v13 }
 0x475   : > { %v5930_v22 = vadd.f32 %v5919_v16, %v278_v15 }
 0x476   : > { %5937 = vst [vmem:[%s7611_s4 + $0x30] sm:$0xff] %v5929_v19 }
 0x477   : > { %5938 = vst [vmem:[%s7611_s4 + $0x38] sm:$0xff] %v5930_v22 }
 0x47d   : > { %v5949_v45 = vld [vmem:[%s7611_s4 + $0x30] sm:$0xff] }
 0x47e   : > { %v5950_v52 = vld [vmem:[%s7611_s4 + $0x38] sm:$0xff]  ;;  %v5999_v24 = vadd.f32 %v5980_v8, %v5949_v45 }
 0x47f   : > { %v6000_v23 = vadd.f32 %v5984_v58, %v5950_v52 }
 0x480   : > { %6007 = vst [vmem:[%s7611_s4 + $0x30] sm:$0xff] %v5999_v24 }
 0x481   : > { %6008 = vst [vmem:[%s7611_s4 + $0x38] sm:$0xff] %v6000_v23 }
 0x482 PF: > { %s6947_s18 = sshll.u32 %s7290_s19, 10  ;;  %s8681_s8 = sld [smem:[#allocation17_spill]] }
 0x483   : > { %s6024_s29 = sshll.u32 %s7611_s4, 4  ;;  %s6010_s6 = scalar_lea.sflag [#allocation4], %s7601_s25  ;;  %s6025_s29 = int_to_ptr.vmem [resolvable:$true] %s6024_s29 }
 0x484   : > { %s7172_s5 = scalar_lea.vmem %s6025_s29, 1024  ;;  %s7311_s26 = smov [#allocation8]  }
 0x485   : > { %p7173_p4 = scmp.ne.s32.totalorder %s6025_s29, %s7172_s5  ;;  %s7176_s23 = sshll.u32 %s7311_s26, 4  ;;  %s7177_s23 = int_to_ptr.vmem [resolvable:$false] %s7176_s23 }
 0x486   : > { %s7178_s24 = scalar_lea.vmem %s7177_s23, 2048  ;;  %p7179_p10 = scmp.lt.s32.totalorder %s6025_s29, %s7177_s23 }
 0x487   : > { %p7174_p12 = pnand %p7173_p4, %p7540_p5  ;;  %p7180_p13 = scmp.lt.s32.totalorder %s7178_s24, %s7172_s5 }
 0x488   : > { %s8584_s30 = scalar_lea.hbm %s8681_s8, %s6947_s18 }
 0x489   : > { %p7175_p3 = pneg %p7174_p12  ;;  %p7181_p0 = por %p7180_p13, %p7179_p10 }
 0x48b   : > { %p7182_p8 = pnand %p7181_p0, %p7175_p3 }
 0x48d   : > { %7185 = shalt.err (!%p7182_p8)
}
 0x48e   : > { %s7186_s19 = scalar_lea.hbm %s8584_s30, 1024  ;;  %s7190_s3 = scalar_lea.hbm %s8681_s8, 8192 }
 0x48f   : > { %p7187_p11 = scmp.ne.s32.totalorder %s8584_s30, %s7186_s19  ;;  %p7191_p6 = scmp.lt.u32.totalorder %s8584_s30, %s8681_s8 }
 0x490   : > { %p7192_p1 = scmp.lt.u32.totalorder %s7190_s3, %s7186_s19  ;;  %p7194_p4 = scmp.lt.u32.totalorder %s7186_s19, %s8584_s30 }
 0x491   : > { %p7188_p2 = pnand %p7187_p11, %p7540_p5 }
 0x492   : > { %p7193_p7 = por %p7192_p1, %p7191_p6 }
 0x493   : > { %p7189_p9 = pneg %p7188_p2 }
 0x494   : > { %p7195_p12 = por %p7194_p4, %p7193_p7 }
 0x496   : > { %p7196_p3 = pnand %p7195_p12, %p7189_p9 }
 0x498   : > { %7199 = shalt.err (!%p7196_p3)
}
 0x499   : > { %6958 = dma.vmem_to_hbm [thread:$0]  (%p7540_p5), %s6025_s29, 1024, %s8584_s30, %s6010_s6  }
 0x49a PF: > { %p6978_p10 = scmp.ge.s32.totalorder %s7302_s22, 2  ;;  %s6036_s28 = sand.u32 1, %s7262_s12  }
 0x49b   : > { %p8682_p13 = scmp.ne.s32.totalorder %s8666_s9, 0  ;;  %s6037_s18 = scalar_lea.sflag [#allocation4], %s6036_s28 }
 0x49d   : > { %p6972_p0 = pnand %p6978_p10, %p8682_p13 }
 0x49f   : > { %7257 = dma.done.wait (!%p6972_p0), %s6037_s18, 1024  }
 0x4a0   : > { %7259 = vsyncadd (!%p6972_p0), %s6037_s18, 4294966272  ;;  %s20_s22 = sadd.s32 1, %s7302_s22   ;;  %s8683_s18 = sld [smem:[#allocation13_spill]] }
 0x4a1   : > { %p17_p8 = scmp.ge.s32.totalorder %s20_s22, 18   ;;  %s8684_s20 = sld [smem:[#allocation14_spill]] }
 0x4a2   : > { %s8685_s1 = sld [smem:[#allocation15_spill]]  ;;  %s8686_s12 = smov %s7266_s13 }
 0x4a3   : > { %s8687_s13 = smov %s7270_s14  ;;  %s8688_s14 = smov %s7508_s11 }
 0x4a4   : > { %s8689_s15 = smov %s7278_s16  ;;  %s8690_s16 = smov %s7282_s17 }
 0x4a5   : > { %s8691_s17 = smov %s7417_s10  ;;  %s8692_s19 = smov %s7298_s21 }
 0x4a6   :  { %19 = sbr.rel (!%p17_p8) target bundleno = 13 (0xd), region = 102 }
 0x4a8   : > { %s8693_s21 = smov %s8685_s1 }
 0x4ad   :  { %6042 = vsyncpa [#allocation3], 1 }
 0x4ae   :  { %6044 = vsyncpa [#allocation3 + $0x1], 1 }
 0x4af   :  { %6045 = vsyncpa [#allocation6], 1 }
 0x4b0   :  { %6047 = vsyncpa [#allocation6 + $0x1], 1 }
 0x4b1   :  { %6048 = vsyncpa [#allocation4], 1 }
 0x4b2   :  { %6050 = vsyncpa [#allocation4 + $0x1], 1 }

</bundles_post_ra>
